<compile_context>
chip_gen: v7x
topology: tpu7x:2x2x1
jax: 0.10.0
libtpu: 0.0.40
codegen_flags: <defaults>
</compile_context>

<pallas_src>
import numpy as np
import jax
import jax.numpy as jnp
from jax.experimental import pallas as pl
from jax.experimental.pallas import tpu as pltpu


def _sigmoid(z):
    # Exact sigmoid via the tanh identity: one EUP transcendental, no division.
    return 0.5 * jnp.tanh(0.5 * z) + 0.5


# ----------------------------------------------------------------------------
# Fused kernel builder
# ----------------------------------------------------------------------------
def make_fused_kernel(T, D, H, num_layers, num_classes):

    def lstm_layer(x_seq, wih_ref, whh_ref, b_ref, collect_seq):
        """One LSTM layer over the whole (statically unrolled) sequence.

        x_seq: (T, Din) value.  Input projection is hoisted out of the
        recurrence; the unrolled time loop only does h @ W_hh + gate math.
        Returns (h_last, full_seq_or_None); everything stays in values/vregs.
        """
        gx = jnp.dot(x_seq, wih_ref[...],
                     preferred_element_type=jnp.float32) + b_ref[...]   # (T, 4H)
        whh = whh_ref[...]                                              # (H, 4H)

        h = jnp.zeros((1, H), jnp.float32)
        c = jnp.zeros((1, H), jnp.float32)
        hs = []
        for t in range(T):                 # static unroll: all slices compile-time
            gates = gx[t:t + 1, :] + jnp.dot(
                h, whh, preferred_element_type=jnp.float32)             # (1, 4H)
            sg = _sigmoid(gates)                   # full-vreg sigmoid (i, f, ., o)
            i = sg[:, 0:H]
            f = sg[:, H:2 * H]
            o = sg[:, 3 * H:4 * H]
            g = jnp.tanh(gates[:, 2 * H:3 * H])    # tanh only on the g-gate slice
            c = f * c + i * g
            h = o * jnp.tanh(c)
            if collect_seq:
                hs.append(h)
        seq = jnp.concatenate(hs, axis=0) if collect_seq else None      # (T, H)
        return h, seq

    def run_stack(x_seq, layer_refs, need_full_seq):
        """Run a num_layers LSTM stack.  Returns (last_h, full_seq_or_None)."""
        cur = x_seq
        h_last, full_seq = None, None
        for l in range(num_layers):
            wih_ref, whh_ref, b_ref = layer_refs[3 * l: 3 * l + 3]
            is_last = (l == num_layers - 1)
            collect = (not is_last) or need_full_seq
            h_last, seq = lstm_layer(cur, wih_ref, whh_ref, b_ref, collect)
            if collect:
                cur = seq                          # (T, H) input for the next layer
                full_seq = seq
        return h_last, (full_seq if need_full_seq else None)

    def kernel(*refs):
        n_lstm = 3 * num_layers
        x_ref = refs[0]
        idx = 1
        stack1_refs = refs[idx: idx + n_lstm]; idx += n_lstm    # self.lstm
        stack2_refs = refs[idx: idx + n_lstm]; idx += n_lstm    # self.lstm2
        (w_td_ref, b_td_ref, w_fd_ref, b_fd_ref,
         w_fc2_ref, b_fc2_ref) = refs[idx: idx + 6]; idx += 6
        out_ref = refs[idx]

        x_seq = x_ref[...]                                      # (T, D)

        # ---- self.lstm: full hidden sequence of the last layer (values only) ----
        _, rnn_seq = run_stack(x_seq, stack1_refs, need_full_seq=True)   # (T, H)

        # ---- temporal attention: tanh(dense) -> softmax over T -> / mean ----
        s = jnp.tanh(jnp.dot(rnn_seq, w_td_ref[...],
                             preferred_element_type=jnp.float32) + b_td_ref[...])  # (T,1)
        e = jnp.exp(s - jnp.max(s, axis=0, keepdims=True))
        alpha = e / jnp.sum(e, axis=0, keepdims=True)
        alpha_norm = alpha / jnp.mean(alpha, axis=0, keepdims=True)       # (T, 1)

        # Spatial branch: for batch == 1 (the only case where torch.cat in
        # get_spatial_beta type-checks), Sparsemax over the length-1 spatial axis
        # gives beta ≡ 1 and beta / mean(beta) ≡ 1, so lstm3 / spatial_embed /
        # spatial_dense cannot influence the output and are omitted entirely.
        # TODO(synk): a sort-based Sparsemax would only matter if the torch.cat in
        # get_spatial_beta allowed batch > 1.
        ctx = alpha_norm * x_seq                                          # (T, D)

        # ---- self.lstm2 on the context: only the last hidden state is needed ----
        st_last, _ = run_stack(ctx, stack2_refs, need_full_seq=False)     # (1, H)

        # ---- head: final_dense -> fc2 -> sigmoid ----
        emb = jnp.dot(st_last, w_fd_ref[...],
                      preferred_element_type=jnp.float32) + b_fd_ref[...]       # (1, D)
        logits = jnp.dot(emb, w_fc2_ref[...],
                         preferred_element_type=jnp.float32) + b_fc2_ref[...]   # (1, C)
        out_ref[...] = _sigmoid(logits)

    return kernel


# ----------------------------------------------------------------------------
# Wrapper
# ----------------------------------------------------------------------------
def lstm_sparse_classifier_forward(x, params):
    """x: (B, T, input_dim) batch-first like the PyTorch module. Returns (B, num_classes)."""
    B, T, D = x.shape
    assert B == 1, "LSTM_sparse_classifier forward only type-checks for batch == 1"
    x2d = x[0].astype(jnp.float32)                              # (T, D)

    stack1 = params['lstm']
    stack2 = params['lstm2']
    num_layers = len(stack1)
    H = stack1[0][1].shape[0]                                   # whh_t: (H, 4H)
    num_classes = params['b_fc2'].shape[-1]

    args = [x2d]
    for (wih_t, whh_t, b) in stack1:
        args += [wih_t, whh_t, b]
    for (wih_t, whh_t, b) in stack2:
        args += [wih_t, whh_t, b]
    args += [params['w_td'], params['b_td'],
             params['w_fd'], params['b_fd'],
             params['w_fc2'], params['b_fc2']]

    vmem = pl.BlockSpec(memory_space=pltpu.MemorySpace.VMEM)
    kernel = make_fused_kernel(T, D, H, num_layers, num_classes)
    out = pl.pallas_call(
        kernel,
        out_shape=jax.ShapeDtypeStruct((1, num_classes), jnp.float32),
        in_specs=[vmem] * len(args),
        out_specs=vmem,
    )(*args)
    return out                                                  # (1, num_classes)


# ----------------------------------------------------------------------------
# Parameter init (PyTorch default uniform init; weights stored pre-transposed
# in kernel layout so no per-call transposes are needed).
# ----------------------------------------------------------------------------
def init_params(key, input_dim, hidden_dim, num_layers, output_dim, num_classes):
    def linear(k, fan_in, fan_out):
        k1, k2 = jax.random.split(k)
        lim = 1.0 / np.sqrt(fan_in)
        w = jax.random.uniform(k1, (fan_out, fan_in), jnp.float32, -lim, lim)
        b = jax.random.uniform(k2, (fan_out,), jnp.float32, -lim, lim)
        return jnp.transpose(w), b.reshape(1, -1)               # (fan_in, fan_out), (1, fan_out)

    def lstm_stack(k):
        layers = []
        lim = 1.0 / np.sqrt(hidden_dim)
        for layer in range(num_layers):
            in_dim = input_dim if layer == 0 else hidden_dim
            k, k1, k2, k3, k4 = jax.random.split(k, 5)
            w_ih = jax.random.uniform(k1, (4 * hidden_dim, in_dim), jnp.float32, -lim, lim)
            w_hh = jax.random.uniform(k2, (4 * hidden_dim, hidden_dim), jnp.float32, -lim, lim)
            b_ih = jax.random.uniform(k3, (4 * hidden_dim,), jnp.float32, -lim, lim)
            b_hh = jax.random.uniform(k4, (4 * hidden_dim,), jnp.float32, -lim, lim)
            layers.append((jnp.transpose(w_ih),                 # (in_dim, 4H)
                           jnp.transpose(w_hh),                 # (H, 4H)
                           (b_ih + b_hh).reshape(1, -1)))       # (1, 4H) fused bias
        return layers

    keys = jax.random.split(key, 5)
    w_td, b_td = linear(keys[2], hidden_dim, 1)                 # temporal_dense
    w_fd, b_fd = linear(keys[3], hidden_dim, input_dim)         # final_dense
    w_fc2, b_fc2 = linear(keys[4], output_dim, num_classes)     # fc2
    # Not materialized (cannot affect the forward output):
    #  * self.fc is never used in forward().
    #  * lstm3 / spatial_embed / spatial_dense only feed the spatial beta, which
    #    is identically 1 for batch == 1 (Sparsemax over a length-1 axis).
    return {
        'lstm': lstm_stack(keys[0]),
        'lstm2': lstm_stack(keys[1]),
        'w_td': w_td, 'b_td': b_td,
        'w_fd': w_fd, 'b_fd': b_fd,
        'w_fc2': w_fc2, 'b_fc2': b_fc2,
    }


if __name__ == "__main__":
    input_dim = 8
    hidden_dim = 32
    num_layers = 2
    output_dim = 8      # must equal input_dim for fc2(final_dense(...)) to type-check
    num_classes = 4
    B, T = 1, 8         # torch.cat in get_spatial_beta only works for batch == 1

    key = jax.random.PRNGKey(0)
    kx, kp = jax.random.split(key)
    x = jax.random.normal(kx, (B, T, input_dim), jnp.float32)
    params = init_params(kp, input_dim, hidden_dim, num_layers, output_dim, num_classes)

    out = lstm_sparse_classifier_forward(x, params)
    out = jax.block_until_ready(out)
    assert out.shape == (B, num_classes)
    assert bool(jnp.all(jnp.isfinite(out)))
    print("KERNEL_OK")
</pallas_src>

<mosaic_0001>
module attributes {stable_mosaic.version = 11 : i64} {
  func.func @kernel(%arg0: memref<8x8xf32, #tpu.memory_space<vmem>>, %arg1: memref<8x128xf32, #tpu.memory_space<vmem>>, %arg2: memref<32x128xf32, #tpu.memory_space<vmem>>, %arg3: memref<1x128xf32, #tpu.memory_space<vmem>>, %arg4: memref<32x128xf32, #tpu.memory_space<vmem>>, %arg5: memref<32x128xf32, #tpu.memory_space<vmem>>, %arg6: memref<1x128xf32, #tpu.memory_space<vmem>>, %arg7: memref<8x128xf32, #tpu.memory_space<vmem>>, %arg8: memref<32x128xf32, #tpu.memory_space<vmem>>, %arg9: memref<1x128xf32, #tpu.memory_space<vmem>>, %arg10: memref<32x128xf32, #tpu.memory_space<vmem>>, %arg11: memref<32x128xf32, #tpu.memory_space<vmem>>, %arg12: memref<1x128xf32, #tpu.memory_space<vmem>>, %arg13: memref<32x1xf32, #tpu.memory_space<vmem>>, %arg14: memref<1x1xf32, #tpu.memory_space<vmem>>, %arg15: memref<32x8xf32, #tpu.memory_space<vmem>>, %arg16: memref<1x8xf32, #tpu.memory_space<vmem>>, %arg17: memref<8x4xf32, #tpu.memory_space<vmem>>, %arg18: memref<1x4xf32, #tpu.memory_space<vmem>>, %arg19: memref<1x4xf32, #tpu.memory_space<vmem>>) attributes {dimension_semantics = [], scalar_prefetch = 0 : i64, scratch_operands = 0 : i64, tpu.core_type = #tpu.core_type<tc>} {
    %c0 = arith.constant 0 : index
    %c0_0 = arith.constant 0 : index
    %0 = vector.load %arg0[%c0, %c0_0] : memref<8x8xf32, #tpu.memory_space<vmem>>, vector<8x8xf32>
    %c0_1 = arith.constant 0 : index
    %c0_2 = arith.constant 0 : index
    %1 = vector.load %arg1[%c0_1, %c0_2] : memref<8x128xf32, #tpu.memory_space<vmem>>, vector<8x128xf32>
    %cst = arith.constant dense<0.000000e+00> : vector<8x128xf32>
    %2 = tpu.matmul %0, %1, %cst {dimension_numbers = #tpu.dot_dimension_numbers<[1], [0], [0], [1], [0, 0, 1, 1], [], []>} : vector<8x8xf32>, vector<8x128xf32>, vector<8x128xf32> -> vector<8x128xf32>
    %c0_3 = arith.constant 0 : index
    %c0_4 = arith.constant 0 : index
    %3 = vector.load %arg3[%c0_3, %c0_4] : memref<1x128xf32, #tpu.memory_space<vmem>>, vector<1x128xf32>
    %4 = vector.broadcast %3 : vector<1x128xf32> to vector<8x128xf32>
    %5 = arith.addf %2, %4 : vector<8x128xf32>
    %c0_5 = arith.constant 0 : index
    %c0_6 = arith.constant 0 : index
    %6 = vector.load %arg2[%c0_5, %c0_6] : memref<32x128xf32, #tpu.memory_space<vmem>>, vector<32x128xf32>
    %cst_7 = arith.constant 0.000000e+00 : f32
    %7 = vector.broadcast %cst_7 : f32 to vector<1x32xf32>
    %cst_8 = arith.constant 0.000000e+00 : f32
    %8 = vector.broadcast %cst_8 : f32 to vector<1x32xf32>
    %9 = vector.extract_strided_slice %5 {offsets = [0, 0], sizes = [1, 128], strides = [1, 1]} : vector<8x128xf32> to vector<1x128xf32>
    %cst_9 = arith.constant dense<0.000000e+00> : vector<1x128xf32>
    %10 = tpu.matmul %7, %6, %cst_9 {dimension_numbers = #tpu.dot_dimension_numbers<[1], [0], [0], [1], [0, 0, 1, 1], [], []>} : vector<1x32xf32>, vector<32x128xf32>, vector<1x128xf32> -> vector<1x128xf32>
    %11 = arith.addf %9, %10 : vector<1x128xf32>
    %cst_10 = arith.constant 5.000000e-01 : f32
    %12 = vector.broadcast %cst_10 : f32 to vector<1x128xf32>
    %13 = arith.mulf %12, %11 : vector<1x128xf32>
    %14 = math.tanh %13 : vector<1x128xf32>
    %cst_11 = arith.constant 5.000000e-01 : f32
    %15 = vector.broadcast %cst_11 : f32 to vector<1x128xf32>
    %16 = arith.mulf %15, %14 : vector<1x128xf32>
    %cst_12 = arith.constant 5.000000e-01 : f32
    %17 = vector.broadcast %cst_12 : f32 to vector<1x128xf32>
    %18 = arith.addf %16, %17 : vector<1x128xf32>
    %19 = vector.extract_strided_slice %18 {offsets = [0, 0], sizes = [1, 32], strides = [1, 1]} : vector<1x128xf32> to vector<1x32xf32>
    %20 = vector.extract_strided_slice %18 {offsets = [0, 32], sizes = [1, 32], strides = [1, 1]} : vector<1x128xf32> to vector<1x32xf32>
    %21 = vector.extract_strided_slice %18 {offsets = [0, 96], sizes = [1, 32], strides = [1, 1]} : vector<1x128xf32> to vector<1x32xf32>
    %22 = vector.extract_strided_slice %11 {offsets = [0, 64], sizes = [1, 32], strides = [1, 1]} : vector<1x128xf32> to vector<1x32xf32>
    %23 = math.tanh %22 : vector<1x32xf32>
    %24 = arith.mulf %20, %8 : vector<1x32xf32>
    %25 = arith.mulf %19, %23 : vector<1x32xf32>
    %26 = arith.addf %24, %25 : vector<1x32xf32>
    %27 = math.tanh %26 : vector<1x32xf32>
    %28 = arith.mulf %21, %27 : vector<1x32xf32>
    %29 = vector.extract_strided_slice %5 {offsets = [1, 0], sizes = [1, 128], strides = [1, 1]} : vector<8x128xf32> to vector<1x128xf32>
    %cst_13 = arith.constant dense<0.000000e+00> : vector<1x128xf32>
    %30 = tpu.matmul %28, %6, %cst_13 {dimension_numbers = #tpu.dot_dimension_numbers<[1], [0], [0], [1], [0, 0, 1, 1], [], []>} : vector<1x32xf32>, vector<32x128xf32>, vector<1x128xf32> -> vector<1x128xf32>
    %31 = arith.addf %29, %30 : vector<1x128xf32>
    %cst_14 = arith.constant 5.000000e-01 : f32
    %32 = vector.broadcast %cst_14 : f32 to vector<1x128xf32>
    %33 = arith.mulf %32, %31 : vector<1x128xf32>
    %34 = math.tanh %33 : vector<1x128xf32>
    %cst_15 = arith.constant 5.000000e-01 : f32
    %35 = vector.broadcast %cst_15 : f32 to vector<1x128xf32>
    %36 = arith.mulf %35, %34 : vector<1x128xf32>
    %cst_16 = arith.constant 5.000000e-01 : f32
    %37 = vector.broadcast %cst_16 : f32 to vector<1x128xf32>
    %38 = arith.addf %36, %37 : vector<1x128xf32>
    %39 = vector.extract_strided_slice %38 {offsets = [0, 0], sizes = [1, 32], strides = [1, 1]} : vector<1x128xf32> to vector<1x32xf32>
    %40 = vector.extract_strided_slice %38 {offsets = [0, 32], sizes = [1, 32], strides = [1, 1]} : vector<1x128xf32> to vector<1x32xf32>
    %41 = vector.extract_strided_slice %38 {offsets = [0, 96], sizes = [1, 32], strides = [1, 1]} : vector<1x128xf32> to vector<1x32xf32>
    %42 = vector.extract_strided_slice %31 {offsets = [0, 64], sizes = [1, 32], strides = [1, 1]} : vector<1x128xf32> to vector<1x32xf32>
    %43 = math.tanh %42 : vector<1x32xf32>
    %44 = arith.mulf %40, %26 : vector<1x32xf32>
    %45 = arith.mulf %39, %43 : vector<1x32xf32>
    %46 = arith.addf %44, %45 : vector<1x32xf32>
    %47 = math.tanh %46 : vector<1x32xf32>
    %48 = arith.mulf %41, %47 : vector<1x32xf32>
    %49 = vector.extract_strided_slice %5 {offsets = [2, 0], sizes = [1, 128], strides = [1, 1]} : vector<8x128xf32> to vector<1x128xf32>
    %cst_17 = arith.constant dense<0.000000e+00> : vector<1x128xf32>
    %50 = tpu.matmul %48, %6, %cst_17 {dimension_numbers = #tpu.dot_dimension_numbers<[1], [0], [0], [1], [0, 0, 1, 1], [], []>} : vector<1x32xf32>, vector<32x128xf32>, vector<1x128xf32> -> vector<1x128xf32>
    %51 = arith.addf %49, %50 : vector<1x128xf32>
    %cst_18 = arith.constant 5.000000e-01 : f32
    %52 = vector.broadcast %cst_18 : f32 to vector<1x128xf32>
    %53 = arith.mulf %52, %51 : vector<1x128xf32>
    %54 = math.tanh %53 : vector<1x128xf32>
    %cst_19 = arith.constant 5.000000e-01 : f32
    %55 = vector.broadcast %cst_19 : f32 to vector<1x128xf32>
    %56 = arith.mulf %55, %54 : vector<1x128xf32>
    %cst_20 = arith.constant 5.000000e-01 : f32
    %57 = vector.broadcast %cst_20 : f32 to vector<1x128xf32>
    %58 = arith.addf %56, %57 : vector<1x128xf32>
    %59 = vector.extract_strided_slice %58 {offsets = [0, 0], sizes = [1, 32], strides = [1, 1]} : vector<1x128xf32> to vector<1x32xf32>
    %60 = vector.extract_strided_slice %58 {offsets = [0, 32], sizes = [1, 32], strides = [1, 1]} : vector<1x128xf32> to vector<1x32xf32>
    %61 = vector.extract_strided_slice %58 {offsets = [0, 96], sizes = [1, 32], strides = [1, 1]} : vector<1x128xf32> to vector<1x32xf32>
    %62 = vector.extract_strided_slice %51 {offsets = [0, 64], sizes = [1, 32], strides = [1, 1]} : vector<1x128xf32> to vector<1x32xf32>
    %63 = math.tanh %62 : vector<1x32xf32>
    %64 = arith.mulf %60, %46 : vector<1x32xf32>
    %65 = arith.mulf %59, %63 : vector<1x32xf32>
    %66 = arith.addf %64, %65 : vector<1x32xf32>
    %67 = math.tanh %66 : vector<1x32xf32>
    %68 = arith.mulf %61, %67 : vector<1x32xf32>
    %69 = vector.extract_strided_slice %5 {offsets = [3, 0], sizes = [1, 128], strides = [1, 1]} : vector<8x128xf32> to vector<1x128xf32>
    %cst_21 = arith.constant dense<0.000000e+00> : vector<1x128xf32>
    %70 = tpu.matmul %68, %6, %cst_21 {dimension_numbers = #tpu.dot_dimension_numbers<[1], [0], [0], [1], [0, 0, 1, 1], [], []>} : vector<1x32xf32>, vector<32x128xf32>, vector<1x128xf32> -> vector<1x128xf32>
    %71 = arith.addf %69, %70 : vector<1x128xf32>
    %cst_22 = arith.constant 5.000000e-01 : f32
    %72 = vector.broadcast %cst_22 : f32 to vector<1x128xf32>
    %73 = arith.mulf %72, %71 : vector<1x128xf32>
    %74 = math.tanh %73 : vector<1x128xf32>
    %cst_23 = arith.constant 5.000000e-01 : f32
    %75 = vector.broadcast %cst_23 : f32 to vector<1x128xf32>
    %76 = arith.mulf %75, %74 : vector<1x128xf32>
    %cst_24 = arith.constant 5.000000e-01 : f32
    %77 = vector.broadcast %cst_24 : f32 to vector<1x128xf32>
    %78 = arith.addf %76, %77 : vector<1x128xf32>
    %79 = vector.extract_strided_slice %78 {offsets = [0, 0], sizes = [1, 32], strides = [1, 1]} : vector<1x128xf32> to vector<1x32xf32>
    %80 = vector.extract_strided_slice %78 {offsets = [0, 32], sizes = [1, 32], strides = [1, 1]} : vector<1x128xf32> to vector<1x32xf32>
    %81 = vector.extract_strided_slice %78 {offsets = [0, 96], sizes = [1, 32], strides = [1, 1]} : vector<1x128xf32> to vector<1x32xf32>
    %82 = vector.extract_strided_slice %71 {offsets = [0, 64], sizes = [1, 32], strides = [1, 1]} : vector<1x128xf32> to vector<1x32xf32>
    %83 = math.tanh %82 : vector<1x32xf32>
    %84 = arith.mulf %80, %66 : vector<1x32xf32>
    %85 = arith.mulf %79, %83 : vector<1x32xf32>
    %86 = arith.addf %84, %85 : vector<1x32xf32>
    %87 = math.tanh %86 : vector<1x32xf32>
    %88 = arith.mulf %81, %87 : vector<1x32xf32>
    %89 = vector.extract_strided_slice %5 {offsets = [4, 0], sizes = [1, 128], strides = [1, 1]} : vector<8x128xf32> to vector<1x128xf32>
    %cst_25 = arith.constant dense<0.000000e+00> : vector<1x128xf32>
    %90 = tpu.matmul %88, %6, %cst_25 {dimension_numbers = #tpu.dot_dimension_numbers<[1], [0], [0], [1], [0, 0, 1, 1], [], []>} : vector<1x32xf32>, vector<32x128xf32>, vector<1x128xf32> -> vector<1x128xf32>
    %91 = arith.addf %89, %90 : vector<1x128xf32>
    %cst_26 = arith.constant 5.000000e-01 : f32
    %92 = vector.broadcast %cst_26 : f32 to vector<1x128xf32>
    %93 = arith.mulf %92, %91 : vector<1x128xf32>
    %94 = math.tanh %93 : vector<1x128xf32>
    %cst_27 = arith.constant 5.000000e-01 : f32
    %95 = vector.broadcast %cst_27 : f32 to vector<1x128xf32>
    %96 = arith.mulf %95, %94 : vector<1x128xf32>
    %cst_28 = arith.constant 5.000000e-01 : f32
    %97 = vector.broadcast %cst_28 : f32 to vector<1x128xf32>
    %98 = arith.addf %96, %97 : vector<1x128xf32>
    %99 = vector.extract_strided_slice %98 {offsets = [0, 0], sizes = [1, 32], strides = [1, 1]} : vector<1x128xf32> to vector<1x32xf32>
    %100 = vector.extract_strided_slice %98 {offsets = [0, 32], sizes = [1, 32], strides = [1, 1]} : vector<1x128xf32> to vector<1x32xf32>
    %101 = vector.extract_strided_slice %98 {offsets = [0, 96], sizes = [1, 32], strides = [1, 1]} : vector<1x128xf32> to vector<1x32xf32>
    %102 = vector.extract_strided_slice %91 {offsets = [0, 64], sizes = [1, 32], strides = [1, 1]} : vector<1x128xf32> to vector<1x32xf32>
    %103 = math.tanh %102 : vector<1x32xf32>
    %104 = arith.mulf %100, %86 : vector<1x32xf32>
    %105 = arith.mulf %99, %103 : vector<1x32xf32>
    %106 = arith.addf %104, %105 : vector<1x32xf32>
    %107 = math.tanh %106 : vector<1x32xf32>
    %108 = arith.mulf %101, %107 : vector<1x32xf32>
    %109 = vector.extract_strided_slice %5 {offsets = [5, 0], sizes = [1, 128], strides = [1, 1]} : vector<8x128xf32> to vector<1x128xf32>
    %cst_29 = arith.constant dense<0.000000e+00> : vector<1x128xf32>
    %110 = tpu.matmul %108, %6, %cst_29 {dimension_numbers = #tpu.dot_dimension_numbers<[1], [0], [0], [1], [0, 0, 1, 1], [], []>} : vector<1x32xf32>, vector<32x128xf32>, vector<1x128xf32> -> vector<1x128xf32>
    %111 = arith.addf %109, %110 : vector<1x128xf32>
    %cst_30 = arith.constant 5.000000e-01 : f32
    %112 = vector.broadcast %cst_30 : f32 to vector<1x128xf32>
    %113 = arith.mulf %112, %111 : vector<1x128xf32>
    %114 = math.tanh %113 : vector<1x128xf32>
    %cst_31 = arith.constant 5.000000e-01 : f32
    %115 = vector.broadcast %cst_31 : f32 to vector<1x128xf32>
    %116 = arith.mulf %115, %114 : vector<1x128xf32>
    %cst_32 = arith.constant 5.000000e-01 : f32
    %117 = vector.broadcast %cst_32 : f32 to vector<1x128xf32>
    %118 = arith.addf %116, %117 : vector<1x128xf32>
    %119 = vector.extract_strided_slice %118 {offsets = [0, 0], sizes = [1, 32], strides = [1, 1]} : vector<1x128xf32> to vector<1x32xf32>
    %120 = vector.extract_strided_slice %118 {offsets = [0, 32], sizes = [1, 32], strides = [1, 1]} : vector<1x128xf32> to vector<1x32xf32>
    %121 = vector.extract_strided_slice %118 {offsets = [0, 96], sizes = [1, 32], strides = [1, 1]} : vector<1x128xf32> to vector<1x32xf32>
    %122 = vector.extract_strided_slice %111 {offsets = [0, 64], sizes = [1, 32], strides = [1, 1]} : vector<1x128xf32> to vector<1x32xf32>
    %123 = math.tanh %122 : vector<1x32xf32>
    %124 = arith.mulf %120, %106 : vector<1x32xf32>
    %125 = arith.mulf %119, %123 : vector<1x32xf32>
    %126 = arith.addf %124, %125 : vector<1x32xf32>
    %127 = math.tanh %126 : vector<1x32xf32>
    %128 = arith.mulf %121, %127 : vector<1x32xf32>
    %129 = vector.extract_strided_slice %5 {offsets = [6, 0], sizes = [1, 128], strides = [1, 1]} : vector<8x128xf32> to vector<1x128xf32>
    %cst_33 = arith.constant dense<0.000000e+00> : vector<1x128xf32>
    %130 = tpu.matmul %128, %6, %cst_33 {dimension_numbers = #tpu.dot_dimension_numbers<[1], [0], [0], [1], [0, 0, 1, 1], [], []>} : vector<1x32xf32>, vector<32x128xf32>, vector<1x128xf32> -> vector<1x128xf32>
    %131 = arith.addf %129, %130 : vector<1x128xf32>
    %cst_34 = arith.constant 5.000000e-01 : f32
    %132 = vector.broadcast %cst_34 : f32 to vector<1x128xf32>
    %133 = arith.mulf %132, %131 : vector<1x128xf32>
    %134 = math.tanh %133 : vector<1x128xf32>
    %cst_35 = arith.constant 5.000000e-01 : f32
    %135 = vector.broadcast %cst_35 : f32 to vector<1x128xf32>
    %136 = arith.mulf %135, %134 : vector<1x128xf32>
    %cst_36 = arith.constant 5.000000e-01 : f32
    %137 = vector.broadcast %cst_36 : f32 to vector<1x128xf32>
    %138 = arith.addf %136, %137 : vector<1x128xf32>
    %139 = vector.extract_strided_slice %138 {offsets = [0, 0], sizes = [1, 32], strides = [1, 1]} : vector<1x128xf32> to vector<1x32xf32>
    %140 = vector.extract_strided_slice %138 {offsets = [0, 32], sizes = [1, 32], strides = [1, 1]} : vector<1x128xf32> to vector<1x32xf32>
    %141 = vector.extract_strided_slice %138 {offsets = [0, 96], sizes = [1, 32], strides = [1, 1]} : vector<1x128xf32> to vector<1x32xf32>
    %142 = vector.extract_strided_slice %131 {offsets = [0, 64], sizes = [1, 32], strides = [1, 1]} : vector<1x128xf32> to vector<1x32xf32>
    %143 = math.tanh %142 : vector<1x32xf32>
    %144 = arith.mulf %140, %126 : vector<1x32xf32>
    %145 = arith.mulf %139, %143 : vector<1x32xf32>
    %146 = arith.addf %144, %145 : vector<1x32xf32>
    %147 = math.tanh %146 : vector<1x32xf32>
    %148 = arith.mulf %141, %147 : vector<1x32xf32>
    %149 = vector.extract_strided_slice %5 {offsets = [7, 0], sizes = [1, 128], strides = [1, 1]} : vector<8x128xf32> to vector<1x128xf32>
    %cst_37 = arith.constant dense<0.000000e+00> : vector<1x128xf32>
    %150 = tpu.matmul %148, %6, %cst_37 {dimension_numbers = #tpu.dot_dimension_numbers<[1], [0], [0], [1], [0, 0, 1, 1], [], []>} : vector<1x32xf32>, vector<32x128xf32>, vector<1x128xf32> -> vector<1x128xf32>
    %151 = arith.addf %149, %150 : vector<1x128xf32>
    %cst_38 = arith.constant 5.000000e-01 : f32
    %152 = vector.broadcast %cst_38 : f32 to vector<1x128xf32>
    %153 = arith.mulf %152, %151 : vector<1x128xf32>
    %154 = math.tanh %153 : vector<1x128xf32>
    %cst_39 = arith.constant 5.000000e-01 : f32
    %155 = vector.broadcast %cst_39 : f32 to vector<1x128xf32>
    %156 = arith.mulf %155, %154 : vector<1x128xf32>
    %cst_40 = arith.constant 5.000000e-01 : f32
    %157 = vector.broadcast %cst_40 : f32 to vector<1x128xf32>
    %158 = arith.addf %156, %157 : vector<1x128xf32>
    %159 = vector.extract_strided_slice %158 {offsets = [0, 0], sizes = [1, 32], strides = [1, 1]} : vector<1x128xf32> to vector<1x32xf32>
    %160 = vector.extract_strided_slice %158 {offsets = [0, 32], sizes = [1, 32], strides = [1, 1]} : vector<1x128xf32> to vector<1x32xf32>
    %161 = vector.extract_strided_slice %158 {offsets = [0, 96], sizes = [1, 32], strides = [1, 1]} : vector<1x128xf32> to vector<1x32xf32>
    %162 = vector.extract_strided_slice %151 {offsets = [0, 64], sizes = [1, 32], strides = [1, 1]} : vector<1x128xf32> to vector<1x32xf32>
    %163 = math.tanh %162 : vector<1x32xf32>
    %164 = arith.mulf %160, %146 : vector<1x32xf32>
    %165 = arith.mulf %159, %163 : vector<1x32xf32>
    %166 = arith.addf %164, %165 : vector<1x32xf32>
    %167 = math.tanh %166 : vector<1x32xf32>
    %168 = arith.mulf %161, %167 : vector<1x32xf32>
    %169 = tpu.concatenate %28, %48, %68, %88, %108, %128, %148, %168 in 0 : vector<1x32xf32>, vector<1x32xf32>, vector<1x32xf32>, vector<1x32xf32>, vector<1x32xf32>, vector<1x32xf32>, vector<1x32xf32>, vector<1x32xf32> -> vector<8x32xf32>
    %c0_41 = arith.constant 0 : index
    %c0_42 = arith.constant 0 : index
    %170 = vector.load %arg4[%c0_41, %c0_42] : memref<32x128xf32, #tpu.memory_space<vmem>>, vector<32x128xf32>
    %cst_43 = arith.constant dense<0.000000e+00> : vector<8x128xf32>
    %171 = tpu.matmul %169, %170, %cst_43 {dimension_numbers = #tpu.dot_dimension_numbers<[1], [0], [0], [1], [0, 0, 1, 1], [], []>} : vector<8x32xf32>, vector<32x128xf32>, vector<8x128xf32> -> vector<8x128xf32>
    %c0_44 = arith.constant 0 : index
    %c0_45 = arith.constant 0 : index
    %172 = vector.load %arg6[%c0_44, %c0_45] : memref<1x128xf32, #tpu.memory_space<vmem>>, vector<1x128xf32>
    %173 = vector.broadcast %172 : vector<1x128xf32> to vector<8x128xf32>
    %174 = arith.addf %171, %173 : vector<8x128xf32>
    %c0_46 = arith.constant 0 : index
    %c0_47 = arith.constant 0 : index
    %175 = vector.load %arg5[%c0_46, %c0_47] : memref<32x128xf32, #tpu.memory_space<vmem>>, vector<32x128xf32>
    %cst_48 = arith.constant 0.000000e+00 : f32
    %176 = vector.broadcast %cst_48 : f32 to vector<1x32xf32>
    %cst_49 = arith.constant 0.000000e+00 : f32
    %177 = vector.broadcast %cst_49 : f32 to vector<1x32xf32>
    %178 = vector.extract_strided_slice %174 {offsets = [0, 0], sizes = [1, 128], strides = [1, 1]} : vector<8x128xf32> to vector<1x128xf32>
    %cst_50 = arith.constant dense<0.000000e+00> : vector<1x128xf32>
    %179 = tpu.matmul %176, %175, %cst_50 {dimension_numbers = #tpu.dot_dimension_numbers<[1], [0], [0], [1], [0, 0, 1, 1], [], []>} : vector<1x32xf32>, vector<32x128xf32>, vector<1x128xf32> -> vector<1x128xf32>
    %180 = arith.addf %178, %179 : vector<1x128xf32>
    %cst_51 = arith.constant 5.000000e-01 : f32
    %181 = vector.broadcast %cst_51 : f32 to vector<1x128xf32>
    %182 = arith.mulf %181, %180 : vector<1x128xf32>
    %183 = math.tanh %182 : vector<1x128xf32>
    %cst_52 = arith.constant 5.000000e-01 : f32
    %184 = vector.broadcast %cst_52 : f32 to vector<1x128xf32>
    %185 = arith.mulf %184, %183 : vector<1x128xf32>
    %cst_53 = arith.constant 5.000000e-01 : f32
    %186 = vector.broadcast %cst_53 : f32 to vector<1x128xf32>
    %187 = arith.addf %185, %186 : vector<1x128xf32>
    %188 = vector.extract_strided_slice %187 {offsets = [0, 0], sizes = [1, 32], strides = [1, 1]} : vector<1x128xf32> to vector<1x32xf32>
    %189 = vector.extract_strided_slice %187 {offsets = [0, 32], sizes = [1, 32], strides = [1, 1]} : vector<1x128xf32> to vector<1x32xf32>
    %190 = vector.extract_strided_slice %187 {offsets = [0, 96], sizes = [1, 32], strides = [1, 1]} : vector<1x128xf32> to vector<1x32xf32>
    %191 = vector.extract_strided_slice %180 {offsets = [0, 64], sizes = [1, 32], strides = [1, 1]} : vector<1x128xf32> to vector<1x32xf32>
    %192 = math.tanh %191 : vector<1x32xf32>
    %193 = arith.mulf %189, %177 : vector<1x32xf32>
    %194 = arith.mulf %188, %192 : vector<1x32xf32>
    %195 = arith.addf %193, %194 : vector<1x32xf32>
    %196 = math.tanh %195 : vector<1x32xf32>
    %197 = arith.mulf %190, %196 : vector<1x32xf32>
    %198 = vector.extract_strided_slice %174 {offsets = [1, 0], sizes = [1, 128], strides = [1, 1]} : vector<8x128xf32> to vector<1x128xf32>
    %cst_54 = arith.constant dense<0.000000e+00> : vector<1x128xf32>
    %199 = tpu.matmul %197, %175, %cst_54 {dimension_numbers = #tpu.dot_dimension_numbers<[1], [0], [0], [1], [0, 0, 1, 1], [], []>} : vector<1x32xf32>, vector<32x128xf32>, vector<1x128xf32> -> vector<1x128xf32>
    %200 = arith.addf %198, %199 : vector<1x128xf32>
    %cst_55 = arith.constant 5.000000e-01 : f32
    %201 = vector.broadcast %cst_55 : f32 to vector<1x128xf32>
    %202 = arith.mulf %201, %200 : vector<1x128xf32>
    %203 = math.tanh %202 : vector<1x128xf32>
    %cst_56 = arith.constant 5.000000e-01 : f32
    %204 = vector.broadcast %cst_56 : f32 to vector<1x128xf32>
    %205 = arith.mulf %204, %203 : vector<1x128xf32>
    %cst_57 = arith.constant 5.000000e-01 : f32
    %206 = vector.broadcast %cst_57 : f32 to vector<1x128xf32>
    %207 = arith.addf %205, %206 : vector<1x128xf32>
    %208 = vector.extract_strided_slice %207 {offsets = [0, 0], sizes = [1, 32], strides = [1, 1]} : vector<1x128xf32> to vector<1x32xf32>
    %209 = vector.extract_strided_slice %207 {offsets = [0, 32], sizes = [1, 32], strides = [1, 1]} : vector<1x128xf32> to vector<1x32xf32>
    %210 = vector.extract_strided_slice %207 {offsets = [0, 96], sizes = [1, 32], strides = [1, 1]} : vector<1x128xf32> to vector<1x32xf32>
    %211 = vector.extract_strided_slice %200 {offsets = [0, 64], sizes = [1, 32], strides = [1, 1]} : vector<1x128xf32> to vector<1x32xf32>
    %212 = math.tanh %211 : vector<1x32xf32>
    %213 = arith.mulf %209, %195 : vector<1x32xf32>
    %214 = arith.mulf %208, %212 : vector<1x32xf32>
    %215 = arith.addf %213, %214 : vector<1x32xf32>
    %216 = math.tanh %215 : vector<1x32xf32>
    %217 = arith.mulf %210, %216 : vector<1x32xf32>
    %218 = vector.extract_strided_slice %174 {offsets = [2, 0], sizes = [1, 128], strides = [1, 1]} : vector<8x128xf32> to vector<1x128xf32>
    %cst_58 = arith.constant dense<0.000000e+00> : vector<1x128xf32>
    %219 = tpu.matmul %217, %175, %cst_58 {dimension_numbers = #tpu.dot_dimension_numbers<[1], [0], [0], [1], [0, 0, 1, 1], [], []>} : vector<1x32xf32>, vector<32x128xf32>, vector<1x128xf32> -> vector<1x128xf32>
    %220 = arith.addf %218, %219 : vector<1x128xf32>
    %cst_59 = arith.constant 5.000000e-01 : f32
    %221 = vector.broadcast %cst_59 : f32 to vector<1x128xf32>
    %222 = arith.mulf %221, %220 : vector<1x128xf32>
    %223 = math.tanh %222 : vector<1x128xf32>
    %cst_60 = arith.constant 5.000000e-01 : f32
    %224 = vector.broadcast %cst_60 : f32 to vector<1x128xf32>
    %225 = arith.mulf %224, %223 : vector<1x128xf32>
    %cst_61 = arith.constant 5.000000e-01 : f32
    %226 = vector.broadcast %cst_61 : f32 to vector<1x128xf32>
    %227 = arith.addf %225, %226 : vector<1x128xf32>
    %228 = vector.extract_strided_slice %227 {offsets = [0, 0], sizes = [1, 32], strides = [1, 1]} : vector<1x128xf32> to vector<1x32xf32>
    %229 = vector.extract_strided_slice %227 {offsets = [0, 32], sizes = [1, 32], strides = [1, 1]} : vector<1x128xf32> to vector<1x32xf32>
    %230 = vector.extract_strided_slice %227 {offsets = [0, 96], sizes = [1, 32], strides = [1, 1]} : vector<1x128xf32> to vector<1x32xf32>
    %231 = vector.extract_strided_slice %220 {offsets = [0, 64], sizes = [1, 32], strides = [1, 1]} : vector<1x128xf32> to vector<1x32xf32>
    %232 = math.tanh %231 : vector<1x32xf32>
    %233 = arith.mulf %229, %215 : vector<1x32xf32>
    %234 = arith.mulf %228, %232 : vector<1x32xf32>
    %235 = arith.addf %233, %234 : vector<1x32xf32>
    %236 = math.tanh %235 : vector<1x32xf32>
    %237 = arith.mulf %230, %236 : vector<1x32xf32>
    %238 = vector.extract_strided_slice %174 {offsets = [3, 0], sizes = [1, 128], strides = [1, 1]} : vector<8x128xf32> to vector<1x128xf32>
    %cst_62 = arith.constant dense<0.000000e+00> : vector<1x128xf32>
    %239 = tpu.matmul %237, %175, %cst_62 {dimension_numbers = #tpu.dot_dimension_numbers<[1], [0], [0], [1], [0, 0, 1, 1], [], []>} : vector<1x32xf32>, vector<32x128xf32>, vector<1x128xf32> -> vector<1x128xf32>
    %240 = arith.addf %238, %239 : vector<1x128xf32>
    %cst_63 = arith.constant 5.000000e-01 : f32
    %241 = vector.broadcast %cst_63 : f32 to vector<1x128xf32>
    %242 = arith.mulf %241, %240 : vector<1x128xf32>
    %243 = math.tanh %242 : vector<1x128xf32>
    %cst_64 = arith.constant 5.000000e-01 : f32
    %244 = vector.broadcast %cst_64 : f32 to vector<1x128xf32>
    %245 = arith.mulf %244, %243 : vector<1x128xf32>
    %cst_65 = arith.constant 5.000000e-01 : f32
    %246 = vector.broadcast %cst_65 : f32 to vector<1x128xf32>
    %247 = arith.addf %245, %246 : vector<1x128xf32>
    %248 = vector.extract_strided_slice %247 {offsets = [0, 0], sizes = [1, 32], strides = [1, 1]} : vector<1x128xf32> to vector<1x32xf32>
    %249 = vector.extract_strided_slice %247 {offsets = [0, 32], sizes = [1, 32], strides = [1, 1]} : vector<1x128xf32> to vector<1x32xf32>
    %250 = vector.extract_strided_slice %247 {offsets = [0, 96], sizes = [1, 32], strides = [1, 1]} : vector<1x128xf32> to vector<1x32xf32>
    %251 = vector.extract_strided_slice %240 {offsets = [0, 64], sizes = [1, 32], strides = [1, 1]} : vector<1x128xf32> to vector<1x32xf32>
    %252 = math.tanh %251 : vector<1x32xf32>
    %253 = arith.mulf %249, %235 : vector<1x32xf32>
    %254 = arith.mulf %248, %252 : vector<1x32xf32>
    %255 = arith.addf %253, %254 : vector<1x32xf32>
    %256 = math.tanh %255 : vector<1x32xf32>
    %257 = arith.mulf %250, %256 : vector<1x32xf32>
    %258 = vector.extract_strided_slice %174 {offsets = [4, 0], sizes = [1, 128], strides = [1, 1]} : vector<8x128xf32> to vector<1x128xf32>
    %cst_66 = arith.constant dense<0.000000e+00> : vector<1x128xf32>
    %259 = tpu.matmul %257, %175, %cst_66 {dimension_numbers = #tpu.dot_dimension_numbers<[1], [0], [0], [1], [0, 0, 1, 1], [], []>} : vector<1x32xf32>, vector<32x128xf32>, vector<1x128xf32> -> vector<1x128xf32>
    %260 = arith.addf %258, %259 : vector<1x128xf32>
    %cst_67 = arith.constant 5.000000e-01 : f32
    %261 = vector.broadcast %cst_67 : f32 to vector<1x128xf32>
    %262 = arith.mulf %261, %260 : vector<1x128xf32>
    %263 = math.tanh %262 : vector<1x128xf32>
    %cst_68 = arith.constant 5.000000e-01 : f32
    %264 = vector.broadcast %cst_68 : f32 to vector<1x128xf32>
    %265 = arith.mulf %264, %263 : vector<1x128xf32>
    %cst_69 = arith.constant 5.000000e-01 : f32
    %266 = vector.broadcast %cst_69 : f32 to vector<1x128xf32>
    %267 = arith.addf %265, %266 : vector<1x128xf32>
    %268 = vector.extract_strided_slice %267 {offsets = [0, 0], sizes = [1, 32], strides = [1, 1]} : vector<1x128xf32> to vector<1x32xf32>
    %269 = vector.extract_strided_slice %267 {offsets = [0, 32], sizes = [1, 32], strides = [1, 1]} : vector<1x128xf32> to vector<1x32xf32>
    %270 = vector.extract_strided_slice %267 {offsets = [0, 96], sizes = [1, 32], strides = [1, 1]} : vector<1x128xf32> to vector<1x32xf32>
    %271 = vector.extract_strided_slice %260 {offsets = [0, 64], sizes = [1, 32], strides = [1, 1]} : vector<1x128xf32> to vector<1x32xf32>
    %272 = math.tanh %271 : vector<1x32xf32>
    %273 = arith.mulf %269, %255 : vector<1x32xf32>
    %274 = arith.mulf %268, %272 : vector<1x32xf32>
    %275 = arith.addf %273, %274 : vector<1x32xf32>
    %276 = math.tanh %275 : vector<1x32xf32>
    %277 = arith.mulf %270, %276 : vector<1x32xf32>
    %278 = vector.extract_strided_slice %174 {offsets = [5, 0], sizes = [1, 128], strides = [1, 1]} : vector<8x128xf32> to vector<1x128xf32>
    %cst_70 = arith.constant dense<0.000000e+00> : vector<1x128xf32>
    %279 = tpu.matmul %277, %175, %cst_70 {dimension_numbers = #tpu.dot_dimension_numbers<[1], [0], [0], [1], [0, 0, 1, 1], [], []>} : vector<1x32xf32>, vector<32x128xf32>, vector<1x128xf32> -> vector<1x128xf32>
    %280 = arith.addf %278, %279 : vector<1x128xf32>
    %cst_71 = arith.constant 5.000000e-01 : f32
    %281 = vector.broadcast %cst_71 : f32 to vector<1x128xf32>
    %282 = arith.mulf %281, %280 : vector<1x128xf32>
    %283 = math.tanh %282 : vector<1x128xf32>
    %cst_72 = arith.constant 5.000000e-01 : f32
    %284 = vector.broadcast %cst_72 : f32 to vector<1x128xf32>
    %285 = arith.mulf %284, %283 : vector<1x128xf32>
    %cst_73 = arith.constant 5.000000e-01 : f32
    %286 = vector.broadcast %cst_73 : f32 to vector<1x128xf32>
    %287 = arith.addf %285, %286 : vector<1x128xf32>
    %288 = vector.extract_strided_slice %287 {offsets = [0, 0], sizes = [1, 32], strides = [1, 1]} : vector<1x128xf32> to vector<1x32xf32>
    %289 = vector.extract_strided_slice %287 {offsets = [0, 32], sizes = [1, 32], strides = [1, 1]} : vector<1x128xf32> to vector<1x32xf32>
    %290 = vector.extract_strided_slice %287 {offsets = [0, 96], sizes = [1, 32], strides = [1, 1]} : vector<1x128xf32> to vector<1x32xf32>
    %291 = vector.extract_strided_slice %280 {offsets = [0, 64], sizes = [1, 32], strides = [1, 1]} : vector<1x128xf32> to vector<1x32xf32>
    %292 = math.tanh %291 : vector<1x32xf32>
    %293 = arith.mulf %289, %275 : vector<1x32xf32>
    %294 = arith.mulf %288, %292 : vector<1x32xf32>
    %295 = arith.addf %293, %294 : vector<1x32xf32>
    %296 = math.tanh %295 : vector<1x32xf32>
    %297 = arith.mulf %290, %296 : vector<1x32xf32>
    %298 = vector.extract_strided_slice %174 {offsets = [6, 0], sizes = [1, 128], strides = [1, 1]} : vector<8x128xf32> to vector<1x128xf32>
    %cst_74 = arith.constant dense<0.000000e+00> : vector<1x128xf32>
    %299 = tpu.matmul %297, %175, %cst_74 {dimension_numbers = #tpu.dot_dimension_numbers<[1], [0], [0], [1], [0, 0, 1, 1], [], []>} : vector<1x32xf32>, vector<32x128xf32>, vector<1x128xf32> -> vector<1x128xf32>
    %300 = arith.addf %298, %299 : vector<1x128xf32>
    %cst_75 = arith.constant 5.000000e-01 : f32
    %301 = vector.broadcast %cst_75 : f32 to vector<1x128xf32>
    %302 = arith.mulf %301, %300 : vector<1x128xf32>
    %303 = math.tanh %302 : vector<1x128xf32>
    %cst_76 = arith.constant 5.000000e-01 : f32
    %304 = vector.broadcast %cst_76 : f32 to vector<1x128xf32>
    %305 = arith.mulf %304, %303 : vector<1x128xf32>
    %cst_77 = arith.constant 5.000000e-01 : f32
    %306 = vector.broadcast %cst_77 : f32 to vector<1x128xf32>
    %307 = arith.addf %305, %306 : vector<1x128xf32>
    %308 = vector.extract_strided_slice %307 {offsets = [0, 0], sizes = [1, 32], strides = [1, 1]} : vector<1x128xf32> to vector<1x32xf32>
    %309 = vector.extract_strided_slice %307 {offsets = [0, 32], sizes = [1, 32], strides = [1, 1]} : vector<1x128xf32> to vector<1x32xf32>
    %310 = vector.extract_strided_slice %307 {offsets = [0, 96], sizes = [1, 32], strides = [1, 1]} : vector<1x128xf32> to vector<1x32xf32>
    %311 = vector.extract_strided_slice %300 {offsets = [0, 64], sizes = [1, 32], strides = [1, 1]} : vector<1x128xf32> to vector<1x32xf32>
    %312 = math.tanh %311 : vector<1x32xf32>
    %313 = arith.mulf %309, %295 : vector<1x32xf32>
    %314 = arith.mulf %308, %312 : vector<1x32xf32>
    %315 = arith.addf %313, %314 : vector<1x32xf32>
    %316 = math.tanh %315 : vector<1x32xf32>
    %317 = arith.mulf %310, %316 : vector<1x32xf32>
    %318 = vector.extract_strided_slice %174 {offsets = [7, 0], sizes = [1, 128], strides = [1, 1]} : vector<8x128xf32> to vector<1x128xf32>
    %cst_78 = arith.constant dense<0.000000e+00> : vector<1x128xf32>
    %319 = tpu.matmul %317, %175, %cst_78 {dimension_numbers = #tpu.dot_dimension_numbers<[1], [0], [0], [1], [0, 0, 1, 1], [], []>} : vector<1x32xf32>, vector<32x128xf32>, vector<1x128xf32> -> vector<1x128xf32>
    %320 = arith.addf %318, %319 : vector<1x128xf32>
    %cst_79 = arith.constant 5.000000e-01 : f32
    %321 = vector.broadcast %cst_79 : f32 to vector<1x128xf32>
    %322 = arith.mulf %321, %320 : vector<1x128xf32>
    %323 = math.tanh %322 : vector<1x128xf32>
    %cst_80 = arith.constant 5.000000e-01 : f32
    %324 = vector.broadcast %cst_80 : f32 to vector<1x128xf32>
    %325 = arith.mulf %324, %323 : vector<1x128xf32>
    %cst_81 = arith.constant 5.000000e-01 : f32
    %326 = vector.broadcast %cst_81 : f32 to vector<1x128xf32>
    %327 = arith.addf %325, %326 : vector<1x128xf32>
    %328 = vector.extract_strided_slice %327 {offsets = [0, 0], sizes = [1, 32], strides = [1, 1]} : vector<1x128xf32> to vector<1x32xf32>
    %329 = vector.extract_strided_slice %327 {offsets = [0, 32], sizes = [1, 32], strides = [1, 1]} : vector<1x128xf32> to vector<1x32xf32>
    %330 = vector.extract_strided_slice %327 {offsets = [0, 96], sizes = [1, 32], strides = [1, 1]} : vector<1x128xf32> to vector<1x32xf32>
    %331 = vector.extract_strided_slice %320 {offsets = [0, 64], sizes = [1, 32], strides = [1, 1]} : vector<1x128xf32> to vector<1x32xf32>
    %332 = math.tanh %331 : vector<1x32xf32>
    %333 = arith.mulf %329, %315 : vector<1x32xf32>
    %334 = arith.mulf %328, %332 : vector<1x32xf32>
    %335 = arith.addf %333, %334 : vector<1x32xf32>
    %336 = math.tanh %335 : vector<1x32xf32>
    %337 = arith.mulf %330, %336 : vector<1x32xf32>
    %338 = tpu.concatenate %197, %217, %237, %257, %277, %297, %317, %337 in 0 : vector<1x32xf32>, vector<1x32xf32>, vector<1x32xf32>, vector<1x32xf32>, vector<1x32xf32>, vector<1x32xf32>, vector<1x32xf32>, vector<1x32xf32> -> vector<8x32xf32>
    %c0_82 = arith.constant 0 : index
    %c0_83 = arith.constant 0 : index
    %339 = vector.load %arg13[%c0_82, %c0_83] : memref<32x1xf32, #tpu.memory_space<vmem>>, vector<32x1xf32>
    %cst_84 = arith.constant dense<0.000000e+00> : vector<8x1xf32>
    %340 = tpu.matmul %338, %339, %cst_84 {dimension_numbers = #tpu.dot_dimension_numbers<[1], [0], [0], [1], [0, 0, 1, 1], [], []>} : vector<8x32xf32>, vector<32x1xf32>, vector<8x1xf32> -> vector<8x1xf32>
    %c0_85 = arith.constant 0 : index
    %c0_86 = arith.constant 0 : index
    %341 = vector.load %arg14[%c0_85, %c0_86] : memref<1x1xf32, #tpu.memory_space<vmem>>, vector<1x1xf32>
    %342 = vector.broadcast %341 : vector<1x1xf32> to vector<8x1xf32>
    %343 = arith.addf %340, %342 : vector<8x1xf32>
    %344 = math.tanh %343 : vector<8x1xf32>
    %cst_87 = arith.constant dense<0xFF800000> : vector<1xf32>
    %345 = vector.multi_reduction <maximumf>, %344, %cst_87 [0] : vector<8x1xf32> to vector<1xf32>
    %346 = vector.shape_cast %345 : vector<1xf32> to vector<1x1xf32>
    %347 = vector.broadcast %346 : vector<1x1xf32> to vector<8x1xf32>
    %348 = arith.subf %344, %347 : vector<8x1xf32>
    %349 = math.exp %348 : vector<8x1xf32>
    %cst_88 = arith.constant dense<0.000000e+00> : vector<1xf32>
    %350 = vector.multi_reduction <add>, %349, %cst_88 [0] : vector<8x1xf32> to vector<1xf32>
    %351 = vector.shape_cast %350 : vector<1xf32> to vector<1x1xf32>
    %352 = vector.broadcast %351 : vector<1x1xf32> to vector<8x1xf32>
    %353 = arith.divf %349, %352 : vector<8x1xf32>
    %cst_89 = arith.constant dense<0.000000e+00> : vector<1xf32>
    %354 = vector.multi_reduction <add>, %353, %cst_89 [0] : vector<8x1xf32> to vector<1xf32>
    %355 = vector.shape_cast %354 : vector<1xf32> to vector<1x1xf32>
    %cst_90 = arith.constant 8.000000e+00 : f32
    %356 = vector.broadcast %cst_90 : f32 to vector<1x1xf32>
    %357 = arith.divf %355, %356 : vector<1x1xf32>
    %358 = vector.broadcast %357 : vector<1x1xf32> to vector<8x1xf32>
    %359 = arith.divf %353, %358 : vector<8x1xf32>
    %360 = vector.broadcast %359 : vector<8x1xf32> to vector<8x8xf32>
    %361 = arith.mulf %360, %0 : vector<8x8xf32>
    %c0_91 = arith.constant 0 : index
    %c0_92 = arith.constant 0 : index
    %362 = vector.load %arg7[%c0_91, %c0_92] : memref<8x128xf32, #tpu.memory_space<vmem>>, vector<8x128xf32>
    %cst_93 = arith.constant dense<0.000000e+00> : vector<8x128xf32>
    %363 = tpu.matmul %361, %362, %cst_93 {dimension_numbers = #tpu.dot_dimension_numbers<[1], [0], [0], [1], [0, 0, 1, 1], [], []>} : vector<8x8xf32>, vector<8x128xf32>, vector<8x128xf32> -> vector<8x128xf32>
    %c0_94 = arith.constant 0 : index
    %c0_95 = arith.constant 0 : index
    %364 = vector.load %arg9[%c0_94, %c0_95] : memref<1x128xf32, #tpu.memory_space<vmem>>, vector<1x128xf32>
    %365 = vector.broadcast %364 : vector<1x128xf32> to vector<8x128xf32>
    %366 = arith.addf %363, %365 : vector<8x128xf32>
    %c0_96 = arith.constant 0 : index
    %c0_97 = arith.constant 0 : index
    %367 = vector.load %arg8[%c0_96, %c0_97] : memref<32x128xf32, #tpu.memory_space<vmem>>, vector<32x128xf32>
    %cst_98 = arith.constant 0.000000e+00 : f32
    %368 = vector.broadcast %cst_98 : f32 to vector<1x32xf32>
    %cst_99 = arith.constant 0.000000e+00 : f32
    %369 = vector.broadcast %cst_99 : f32 to vector<1x32xf32>
    %370 = vector.extract_strided_slice %366 {offsets = [0, 0], sizes = [1, 128], strides = [1, 1]} : vector<8x128xf32> to vector<1x128xf32>
    %cst_100 = arith.constant dense<0.000000e+00> : vector<1x128xf32>
    %371 = tpu.matmul %368, %367, %cst_100 {dimension_numbers = #tpu.dot_dimension_numbers<[1], [0], [0], [1], [0, 0, 1, 1], [], []>} : vector<1x32xf32>, vector<32x128xf32>, vector<1x128xf32> -> vector<1x128xf32>
    %372 = arith.addf %370, %371 : vector<1x128xf32>
    %cst_101 = arith.constant 5.000000e-01 : f32
    %373 = vector.broadcast %cst_101 : f32 to vector<1x128xf32>
    %374 = arith.mulf %373, %372 : vector<1x128xf32>
    %375 = math.tanh %374 : vector<1x128xf32>
    %cst_102 = arith.constant 5.000000e-01 : f32
    %376 = vector.broadcast %cst_102 : f32 to vector<1x128xf32>
    %377 = arith.mulf %376, %375 : vector<1x128xf32>
    %cst_103 = arith.constant 5.000000e-01 : f32
    %378 = vector.broadcast %cst_103 : f32 to vector<1x128xf32>
    %379 = arith.addf %377, %378 : vector<1x128xf32>
    %380 = vector.extract_strided_slice %379 {offsets = [0, 0], sizes = [1, 32], strides = [1, 1]} : vector<1x128xf32> to vector<1x32xf32>
    %381 = vector.extract_strided_slice %379 {offsets = [0, 32], sizes = [1, 32], strides = [1, 1]} : vector<1x128xf32> to vector<1x32xf32>
    %382 = vector.extract_strided_slice %379 {offsets = [0, 96], sizes = [1, 32], strides = [1, 1]} : vector<1x128xf32> to vector<1x32xf32>
    %383 = vector.extract_strided_slice %372 {offsets = [0, 64], sizes = [1, 32], strides = [1, 1]} : vector<1x128xf32> to vector<1x32xf32>
    %384 = math.tanh %383 : vector<1x32xf32>
    %385 = arith.mulf %381, %369 : vector<1x32xf32>
    %386 = arith.mulf %380, %384 : vector<1x32xf32>
    %387 = arith.addf %385, %386 : vector<1x32xf32>
    %388 = math.tanh %387 : vector<1x32xf32>
    %389 = arith.mulf %382, %388 : vector<1x32xf32>
    %390 = vector.extract_strided_slice %366 {offsets = [1, 0], sizes = [1, 128], strides = [1, 1]} : vector<8x128xf32> to vector<1x128xf32>
    %cst_104 = arith.constant dense<0.000000e+00> : vector<1x128xf32>
    %391 = tpu.matmul %389, %367, %cst_104 {dimension_numbers = #tpu.dot_dimension_numbers<[1], [0], [0], [1], [0, 0, 1, 1], [], []>} : vector<1x32xf32>, vector<32x128xf32>, vector<1x128xf32> -> vector<1x128xf32>
    %392 = arith.addf %390, %391 : vector<1x128xf32>
    %cst_105 = arith.constant 5.000000e-01 : f32
    %393 = vector.broadcast %cst_105 : f32 to vector<1x128xf32>
    %394 = arith.mulf %393, %392 : vector<1x128xf32>
    %395 = math.tanh %394 : vector<1x128xf32>
    %cst_106 = arith.constant 5.000000e-01 : f32
    %396 = vector.broadcast %cst_106 : f32 to vector<1x128xf32>
    %397 = arith.mulf %396, %395 : vector<1x128xf32>
    %cst_107 = arith.constant 5.000000e-01 : f32
    %398 = vector.broadcast %cst_107 : f32 to vector<1x128xf32>
    %399 = arith.addf %397, %398 : vector<1x128xf32>
    %400 = vector.extract_strided_slice %399 {offsets = [0, 0], sizes = [1, 32], strides = [1, 1]} : vector<1x128xf32> to vector<1x32xf32>
    %401 = vector.extract_strided_slice %399 {offsets = [0, 32], sizes = [1, 32], strides = [1, 1]} : vector<1x128xf32> to vector<1x32xf32>
    %402 = vector.extract_strided_slice %399 {offsets = [0, 96], sizes = [1, 32], strides = [1, 1]} : vector<1x128xf32> to vector<1x32xf32>
    %403 = vector.extract_strided_slice %392 {offsets = [0, 64], sizes = [1, 32], strides = [1, 1]} : vector<1x128xf32> to vector<1x32xf32>
    %404 = math.tanh %403 : vector<1x32xf32>
    %405 = arith.mulf %401, %387 : vector<1x32xf32>
    %406 = arith.mulf %400, %404 : vector<1x32xf32>
    %407 = arith.addf %405, %406 : vector<1x32xf32>
    %408 = math.tanh %407 : vector<1x32xf32>
    %409 = arith.mulf %402, %408 : vector<1x32xf32>
    %410 = vector.extract_strided_slice %366 {offsets = [2, 0], sizes = [1, 128], strides = [1, 1]} : vector<8x128xf32> to vector<1x128xf32>
    %cst_108 = arith.constant dense<0.000000e+00> : vector<1x128xf32>
    %411 = tpu.matmul %409, %367, %cst_108 {dimension_numbers = #tpu.dot_dimension_numbers<[1], [0], [0], [1], [0, 0, 1, 1], [], []>} : vector<1x32xf32>, vector<32x128xf32>, vector<1x128xf32> -> vector<1x128xf32>
    %412 = arith.addf %410, %411 : vector<1x128xf32>
    %cst_109 = arith.constant 5.000000e-01 : f32
    %413 = vector.broadcast %cst_109 : f32 to vector<1x128xf32>
    %414 = arith.mulf %413, %412 : vector<1x128xf32>
    %415 = math.tanh %414 : vector<1x128xf32>
    %cst_110 = arith.constant 5.000000e-01 : f32
    %416 = vector.broadcast %cst_110 : f32 to vector<1x128xf32>
    %417 = arith.mulf %416, %415 : vector<1x128xf32>
    %cst_111 = arith.constant 5.000000e-01 : f32
    %418 = vector.broadcast %cst_111 : f32 to vector<1x128xf32>
    %419 = arith.addf %417, %418 : vector<1x128xf32>
    %420 = vector.extract_strided_slice %419 {offsets = [0, 0], sizes = [1, 32], strides = [1, 1]} : vector<1x128xf32> to vector<1x32xf32>
    %421 = vector.extract_strided_slice %419 {offsets = [0, 32], sizes = [1, 32], strides = [1, 1]} : vector<1x128xf32> to vector<1x32xf32>
    %422 = vector.extract_strided_slice %419 {offsets = [0, 96], sizes = [1, 32], strides = [1, 1]} : vector<1x128xf32> to vector<1x32xf32>
    %423 = vector.extract_strided_slice %412 {offsets = [0, 64], sizes = [1, 32], strides = [1, 1]} : vector<1x128xf32> to vector<1x32xf32>
    %424 = math.tanh %423 : vector<1x32xf32>
    %425 = arith.mulf %421, %407 : vector<1x32xf32>
    %426 = arith.mulf %420, %424 : vector<1x32xf32>
    %427 = arith.addf %425, %426 : vector<1x32xf32>
    %428 = math.tanh %427 : vector<1x32xf32>
    %429 = arith.mulf %422, %428 : vector<1x32xf32>
    %430 = vector.extract_strided_slice %366 {offsets = [3, 0], sizes = [1, 128], strides = [1, 1]} : vector<8x128xf32> to vector<1x128xf32>
    %cst_112 = arith.constant dense<0.000000e+00> : vector<1x128xf32>
    %431 = tpu.matmul %429, %367, %cst_112 {dimension_numbers = #tpu.dot_dimension_numbers<[1], [0], [0], [1], [0, 0, 1, 1], [], []>} : vector<1x32xf32>, vector<32x128xf32>, vector<1x128xf32> -> vector<1x128xf32>
    %432 = arith.addf %430, %431 : vector<1x128xf32>
    %cst_113 = arith.constant 5.000000e-01 : f32
    %433 = vector.broadcast %cst_113 : f32 to vector<1x128xf32>
    %434 = arith.mulf %433, %432 : vector<1x128xf32>
    %435 = math.tanh %434 : vector<1x128xf32>
    %cst_114 = arith.constant 5.000000e-01 : f32
    %436 = vector.broadcast %cst_114 : f32 to vector<1x128xf32>
    %437 = arith.mulf %436, %435 : vector<1x128xf32>
    %cst_115 = arith.constant 5.000000e-01 : f32
    %438 = vector.broadcast %cst_115 : f32 to vector<1x128xf32>
    %439 = arith.addf %437, %438 : vector<1x128xf32>
    %440 = vector.extract_strided_slice %439 {offsets = [0, 0], sizes = [1, 32], strides = [1, 1]} : vector<1x128xf32> to vector<1x32xf32>
    %441 = vector.extract_strided_slice %439 {offsets = [0, 32], sizes = [1, 32], strides = [1, 1]} : vector<1x128xf32> to vector<1x32xf32>
    %442 = vector.extract_strided_slice %439 {offsets = [0, 96], sizes = [1, 32], strides = [1, 1]} : vector<1x128xf32> to vector<1x32xf32>
    %443 = vector.extract_strided_slice %432 {offsets = [0, 64], sizes = [1, 32], strides = [1, 1]} : vector<1x128xf32> to vector<1x32xf32>
    %444 = math.tanh %443 : vector<1x32xf32>
    %445 = arith.mulf %441, %427 : vector<1x32xf32>
    %446 = arith.mulf %440, %444 : vector<1x32xf32>
    %447 = arith.addf %445, %446 : vector<1x32xf32>
    %448 = math.tanh %447 : vector<1x32xf32>
    %449 = arith.mulf %442, %448 : vector<1x32xf32>
    %450 = vector.extract_strided_slice %366 {offsets = [4, 0], sizes = [1, 128], strides = [1, 1]} : vector<8x128xf32> to vector<1x128xf32>
    %cst_116 = arith.constant dense<0.000000e+00> : vector<1x128xf32>
    %451 = tpu.matmul %449, %367, %cst_116 {dimension_numbers = #tpu.dot_dimension_numbers<[1], [0], [0], [1], [0, 0, 1, 1], [], []>} : vector<1x32xf32>, vector<32x128xf32>, vector<1x128xf32> -> vector<1x128xf32>
    %452 = arith.addf %450, %451 : vector<1x128xf32>
    %cst_117 = arith.constant 5.000000e-01 : f32
    %453 = vector.broadcast %cst_117 : f32 to vector<1x128xf32>
    %454 = arith.mulf %453, %452 : vector<1x128xf32>
    %455 = math.tanh %454 : vector<1x128xf32>
    %cst_118 = arith.constant 5.000000e-01 : f32
    %456 = vector.broadcast %cst_118 : f32 to vector<1x128xf32>
    %457 = arith.mulf %456, %455 : vector<1x128xf32>
    %cst_119 = arith.constant 5.000000e-01 : f32
    %458 = vector.broadcast %cst_119 : f32 to vector<1x128xf32>
    %459 = arith.addf %457, %458 : vector<1x128xf32>
    %460 = vector.extract_strided_slice %459 {offsets = [0, 0], sizes = [1, 32], strides = [1, 1]} : vector<1x128xf32> to vector<1x32xf32>
    %461 = vector.extract_strided_slice %459 {offsets = [0, 32], sizes = [1, 32], strides = [1, 1]} : vector<1x128xf32> to vector<1x32xf32>
    %462 = vector.extract_strided_slice %459 {offsets = [0, 96], sizes = [1, 32], strides = [1, 1]} : vector<1x128xf32> to vector<1x32xf32>
    %463 = vector.extract_strided_slice %452 {offsets = [0, 64], sizes = [1, 32], strides = [1, 1]} : vector<1x128xf32> to vector<1x32xf32>
    %464 = math.tanh %463 : vector<1x32xf32>
    %465 = arith.mulf %461, %447 : vector<1x32xf32>
    %466 = arith.mulf %460, %464 : vector<1x32xf32>
    %467 = arith.addf %465, %466 : vector<1x32xf32>
    %468 = math.tanh %467 : vector<1x32xf32>
    %469 = arith.mulf %462, %468 : vector<1x32xf32>
    %470 = vector.extract_strided_slice %366 {offsets = [5, 0], sizes = [1, 128], strides = [1, 1]} : vector<8x128xf32> to vector<1x128xf32>
    %cst_120 = arith.constant dense<0.000000e+00> : vector<1x128xf32>
    %471 = tpu.matmul %469, %367, %cst_120 {dimension_numbers = #tpu.dot_dimension_numbers<[1], [0], [0], [1], [0, 0, 1, 1], [], []>} : vector<1x32xf32>, vector<32x128xf32>, vector<1x128xf32> -> vector<1x128xf32>
    %472 = arith.addf %470, %471 : vector<1x128xf32>
    %cst_121 = arith.constant 5.000000e-01 : f32
    %473 = vector.broadcast %cst_121 : f32 to vector<1x128xf32>
    %474 = arith.mulf %473, %472 : vector<1x128xf32>
    %475 = math.tanh %474 : vector<1x128xf32>
    %cst_122 = arith.constant 5.000000e-01 : f32
    %476 = vector.broadcast %cst_122 : f32 to vector<1x128xf32>
    %477 = arith.mulf %476, %475 : vector<1x128xf32>
    %cst_123 = arith.constant 5.000000e-01 : f32
    %478 = vector.broadcast %cst_123 : f32 to vector<1x128xf32>
    %479 = arith.addf %477, %478 : vector<1x128xf32>
    %480 = vector.extract_strided_slice %479 {offsets = [0, 0], sizes = [1, 32], strides = [1, 1]} : vector<1x128xf32> to vector<1x32xf32>
    %481 = vector.extract_strided_slice %479 {offsets = [0, 32], sizes = [1, 32], strides = [1, 1]} : vector<1x128xf32> to vector<1x32xf32>
    %482 = vector.extract_strided_slice %479 {offsets = [0, 96], sizes = [1, 32], strides = [1, 1]} : vector<1x128xf32> to vector<1x32xf32>
    %483 = vector.extract_strided_slice %472 {offsets = [0, 64], sizes = [1, 32], strides = [1, 1]} : vector<1x128xf32> to vector<1x32xf32>
    %484 = math.tanh %483 : vector<1x32xf32>
    %485 = arith.mulf %481, %467 : vector<1x32xf32>
    %486 = arith.mulf %480, %484 : vector<1x32xf32>
    %487 = arith.addf %485, %486 : vector<1x32xf32>
    %488 = math.tanh %487 : vector<1x32xf32>
    %489 = arith.mulf %482, %488 : vector<1x32xf32>
    %490 = vector.extract_strided_slice %366 {offsets = [6, 0], sizes = [1, 128], strides = [1, 1]} : vector<8x128xf32> to vector<1x128xf32>
    %cst_124 = arith.constant dense<0.000000e+00> : vector<1x128xf32>
    %491 = tpu.matmul %489, %367, %cst_124 {dimension_numbers = #tpu.dot_dimension_numbers<[1], [0], [0], [1], [0, 0, 1, 1], [], []>} : vector<1x32xf32>, vector<32x128xf32>, vector<1x128xf32> -> vector<1x128xf32>
    %492 = arith.addf %490, %491 : vector<1x128xf32>
    %cst_125 = arith.constant 5.000000e-01 : f32
    %493 = vector.broadcast %cst_125 : f32 to vector<1x128xf32>
    %494 = arith.mulf %493, %492 : vector<1x128xf32>
    %495 = math.tanh %494 : vector<1x128xf32>
    %cst_126 = arith.constant 5.000000e-01 : f32
    %496 = vector.broadcast %cst_126 : f32 to vector<1x128xf32>
    %497 = arith.mulf %496, %495 : vector<1x128xf32>
    %cst_127 = arith.constant 5.000000e-01 : f32
    %498 = vector.broadcast %cst_127 : f32 to vector<1x128xf32>
    %499 = arith.addf %497, %498 : vector<1x128xf32>
    %500 = vector.extract_strided_slice %499 {offsets = [0, 0], sizes = [1, 32], strides = [1, 1]} : vector<1x128xf32> to vector<1x32xf32>
    %501 = vector.extract_strided_slice %499 {offsets = [0, 32], sizes = [1, 32], strides = [1, 1]} : vector<1x128xf32> to vector<1x32xf32>
    %502 = vector.extract_strided_slice %499 {offsets = [0, 96], sizes = [1, 32], strides = [1, 1]} : vector<1x128xf32> to vector<1x32xf32>
    %503 = vector.extract_strided_slice %492 {offsets = [0, 64], sizes = [1, 32], strides = [1, 1]} : vector<1x128xf32> to vector<1x32xf32>
    %504 = math.tanh %503 : vector<1x32xf32>
    %505 = arith.mulf %501, %487 : vector<1x32xf32>
    %506 = arith.mulf %500, %504 : vector<1x32xf32>
    %507 = arith.addf %505, %506 : vector<1x32xf32>
    %508 = math.tanh %507 : vector<1x32xf32>
    %509 = arith.mulf %502, %508 : vector<1x32xf32>
    %510 = vector.extract_strided_slice %366 {offsets = [7, 0], sizes = [1, 128], strides = [1, 1]} : vector<8x128xf32> to vector<1x128xf32>
    %cst_128 = arith.constant dense<0.000000e+00> : vector<1x128xf32>
    %511 = tpu.matmul %509, %367, %cst_128 {dimension_numbers = #tpu.dot_dimension_numbers<[1], [0], [0], [1], [0, 0, 1, 1], [], []>} : vector<1x32xf32>, vector<32x128xf32>, vector<1x128xf32> -> vector<1x128xf32>
    %512 = arith.addf %510, %511 : vector<1x128xf32>
    %cst_129 = arith.constant 5.000000e-01 : f32
    %513 = vector.broadcast %cst_129 : f32 to vector<1x128xf32>
    %514 = arith.mulf %513, %512 : vector<1x128xf32>
    %515 = math.tanh %514 : vector<1x128xf32>
    %cst_130 = arith.constant 5.000000e-01 : f32
    %516 = vector.broadcast %cst_130 : f32 to vector<1x128xf32>
    %517 = arith.mulf %516, %515 : vector<1x128xf32>
    %cst_131 = arith.constant 5.000000e-01 : f32
    %518 = vector.broadcast %cst_131 : f32 to vector<1x128xf32>
    %519 = arith.addf %517, %518 : vector<1x128xf32>
    %520 = vector.extract_strided_slice %519 {offsets = [0, 0], sizes = [1, 32], strides = [1, 1]} : vector<1x128xf32> to vector<1x32xf32>
    %521 = vector.extract_strided_slice %519 {offsets = [0, 32], sizes = [1, 32], strides = [1, 1]} : vector<1x128xf32> to vector<1x32xf32>
    %522 = vector.extract_strided_slice %519 {offsets = [0, 96], sizes = [1, 32], strides = [1, 1]} : vector<1x128xf32> to vector<1x32xf32>
    %523 = vector.extract_strided_slice %512 {offsets = [0, 64], sizes = [1, 32], strides = [1, 1]} : vector<1x128xf32> to vector<1x32xf32>
    %524 = math.tanh %523 : vector<1x32xf32>
    %525 = arith.mulf %521, %507 : vector<1x32xf32>
    %526 = arith.mulf %520, %524 : vector<1x32xf32>
    %527 = arith.addf %525, %526 : vector<1x32xf32>
    %528 = math.tanh %527 : vector<1x32xf32>
    %529 = arith.mulf %522, %528 : vector<1x32xf32>
    %530 = tpu.concatenate %389, %409, %429, %449, %469, %489, %509, %529 in 0 : vector<1x32xf32>, vector<1x32xf32>, vector<1x32xf32>, vector<1x32xf32>, vector<1x32xf32>, vector<1x32xf32>, vector<1x32xf32>, vector<1x32xf32> -> vector<8x32xf32>
    %c0_132 = arith.constant 0 : index
    %c0_133 = arith.constant 0 : index
    %531 = vector.load %arg10[%c0_132, %c0_133] : memref<32x128xf32, #tpu.memory_space<vmem>>, vector<32x128xf32>
    %cst_134 = arith.constant dense<0.000000e+00> : vector<8x128xf32>
    %532 = tpu.matmul %530, %531, %cst_134 {dimension_numbers = #tpu.dot_dimension_numbers<[1], [0], [0], [1], [0, 0, 1, 1], [], []>} : vector<8x32xf32>, vector<32x128xf32>, vector<8x128xf32> -> vector<8x128xf32>
    %c0_135 = arith.constant 0 : index
    %c0_136 = arith.constant 0 : index
    %533 = vector.load %arg12[%c0_135, %c0_136] : memref<1x128xf32, #tpu.memory_space<vmem>>, vector<1x128xf32>
    %534 = vector.broadcast %533 : vector<1x128xf32> to vector<8x128xf32>
    %535 = arith.addf %532, %534 : vector<8x128xf32>
    %c0_137 = arith.constant 0 : index
    %c0_138 = arith.constant 0 : index
    %536 = vector.load %arg11[%c0_137, %c0_138] : memref<32x128xf32, #tpu.memory_space<vmem>>, vector<32x128xf32>
    %cst_139 = arith.constant 0.000000e+00 : f32
    %537 = vector.broadcast %cst_139 : f32 to vector<1x32xf32>
    %cst_140 = arith.constant 0.000000e+00 : f32
    %538 = vector.broadcast %cst_140 : f32 to vector<1x32xf32>
    %539 = vector.extract_strided_slice %535 {offsets = [0, 0], sizes = [1, 128], strides = [1, 1]} : vector<8x128xf32> to vector<1x128xf32>
    %cst_141 = arith.constant dense<0.000000e+00> : vector<1x128xf32>
    %540 = tpu.matmul %537, %536, %cst_141 {dimension_numbers = #tpu.dot_dimension_numbers<[1], [0], [0], [1], [0, 0, 1, 1], [], []>} : vector<1x32xf32>, vector<32x128xf32>, vector<1x128xf32> -> vector<1x128xf32>
    %541 = arith.addf %539, %540 : vector<1x128xf32>
    %cst_142 = arith.constant 5.000000e-01 : f32
    %542 = vector.broadcast %cst_142 : f32 to vector<1x128xf32>
    %543 = arith.mulf %542, %541 : vector<1x128xf32>
    %544 = math.tanh %543 : vector<1x128xf32>
    %cst_143 = arith.constant 5.000000e-01 : f32
    %545 = vector.broadcast %cst_143 : f32 to vector<1x128xf32>
    %546 = arith.mulf %545, %544 : vector<1x128xf32>
    %cst_144 = arith.constant 5.000000e-01 : f32
    %547 = vector.broadcast %cst_144 : f32 to vector<1x128xf32>
    %548 = arith.addf %546, %547 : vector<1x128xf32>
    %549 = vector.extract_strided_slice %548 {offsets = [0, 0], sizes = [1, 32], strides = [1, 1]} : vector<1x128xf32> to vector<1x32xf32>
    %550 = vector.extract_strided_slice %548 {offsets = [0, 32], sizes = [1, 32], strides = [1, 1]} : vector<1x128xf32> to vector<1x32xf32>
    %551 = vector.extract_strided_slice %548 {offsets = [0, 96], sizes = [1, 32], strides = [1, 1]} : vector<1x128xf32> to vector<1x32xf32>
    %552 = vector.extract_strided_slice %541 {offsets = [0, 64], sizes = [1, 32], strides = [1, 1]} : vector<1x128xf32> to vector<1x32xf32>
    %553 = math.tanh %552 : vector<1x32xf32>
    %554 = arith.mulf %550, %538 : vector<1x32xf32>
    %555 = arith.mulf %549, %553 : vector<1x32xf32>
    %556 = arith.addf %554, %555 : vector<1x32xf32>
    %557 = math.tanh %556 : vector<1x32xf32>
    %558 = arith.mulf %551, %557 : vector<1x32xf32>
    %559 = vector.extract_strided_slice %535 {offsets = [1, 0], sizes = [1, 128], strides = [1, 1]} : vector<8x128xf32> to vector<1x128xf32>
    %cst_145 = arith.constant dense<0.000000e+00> : vector<1x128xf32>
    %560 = tpu.matmul %558, %536, %cst_145 {dimension_numbers = #tpu.dot_dimension_numbers<[1], [0], [0], [1], [0, 0, 1, 1], [], []>} : vector<1x32xf32>, vector<32x128xf32>, vector<1x128xf32> -> vector<1x128xf32>
    %561 = arith.addf %559, %560 : vector<1x128xf32>
    %cst_146 = arith.constant 5.000000e-01 : f32
    %562 = vector.broadcast %cst_146 : f32 to vector<1x128xf32>
    %563 = arith.mulf %562, %561 : vector<1x128xf32>
    %564 = math.tanh %563 : vector<1x128xf32>
    %cst_147 = arith.constant 5.000000e-01 : f32
    %565 = vector.broadcast %cst_147 : f32 to vector<1x128xf32>
    %566 = arith.mulf %565, %564 : vector<1x128xf32>
    %cst_148 = arith.constant 5.000000e-01 : f32
    %567 = vector.broadcast %cst_148 : f32 to vector<1x128xf32>
    %568 = arith.addf %566, %567 : vector<1x128xf32>
    %569 = vector.extract_strided_slice %568 {offsets = [0, 0], sizes = [1, 32], strides = [1, 1]} : vector<1x128xf32> to vector<1x32xf32>
    %570 = vector.extract_strided_slice %568 {offsets = [0, 32], sizes = [1, 32], strides = [1, 1]} : vector<1x128xf32> to vector<1x32xf32>
    %571 = vector.extract_strided_slice %568 {offsets = [0, 96], sizes = [1, 32], strides = [1, 1]} : vector<1x128xf32> to vector<1x32xf32>
    %572 = vector.extract_strided_slice %561 {offsets = [0, 64], sizes = [1, 32], strides = [1, 1]} : vector<1x128xf32> to vector<1x32xf32>
    %573 = math.tanh %572 : vector<1x32xf32>
    %574 = arith.mulf %570, %556 : vector<1x32xf32>
    %575 = arith.mulf %569, %573 : vector<1x32xf32>
    %576 = arith.addf %574, %575 : vector<1x32xf32>
    %577 = math.tanh %576 : vector<1x32xf32>
    %578 = arith.mulf %571, %577 : vector<1x32xf32>
    %579 = vector.extract_strided_slice %535 {offsets = [2, 0], sizes = [1, 128], strides = [1, 1]} : vector<8x128xf32> to vector<1x128xf32>
    %cst_149 = arith.constant dense<0.000000e+00> : vector<1x128xf32>
    %580 = tpu.matmul %578, %536, %cst_149 {dimension_numbers = #tpu.dot_dimension_numbers<[1], [0], [0], [1], [0, 0, 1, 1], [], []>} : vector<1x32xf32>, vector<32x128xf32>, vector<1x128xf32> -> vector<1x128xf32>
    %581 = arith.addf %579, %580 : vector<1x128xf32>
    %cst_150 = arith.constant 5.000000e-01 : f32
    %582 = vector.broadcast %cst_150 : f32 to vector<1x128xf32>
    %583 = arith.mulf %582, %581 : vector<1x128xf32>
    %584 = math.tanh %583 : vector<1x128xf32>
    %cst_151 = arith.constant 5.000000e-01 : f32
    %585 = vector.broadcast %cst_151 : f32 to vector<1x128xf32>
    %586 = arith.mulf %585, %584 : vector<1x128xf32>
    %cst_152 = arith.constant 5.000000e-01 : f32
    %587 = vector.broadcast %cst_152 : f32 to vector<1x128xf32>
    %588 = arith.addf %586, %587 : vector<1x128xf32>
    %589 = vector.extract_strided_slice %588 {offsets = [0, 0], sizes = [1, 32], strides = [1, 1]} : vector<1x128xf32> to vector<1x32xf32>
    %590 = vector.extract_strided_slice %588 {offsets = [0, 32], sizes = [1, 32], strides = [1, 1]} : vector<1x128xf32> to vector<1x32xf32>
    %591 = vector.extract_strided_slice %588 {offsets = [0, 96], sizes = [1, 32], strides = [1, 1]} : vector<1x128xf32> to vector<1x32xf32>
    %592 = vector.extract_strided_slice %581 {offsets = [0, 64], sizes = [1, 32], strides = [1, 1]} : vector<1x128xf32> to vector<1x32xf32>
    %593 = math.tanh %592 : vector<1x32xf32>
    %594 = arith.mulf %590, %576 : vector<1x32xf32>
    %595 = arith.mulf %589, %593 : vector<1x32xf32>
    %596 = arith.addf %594, %595 : vector<1x32xf32>
    %597 = math.tanh %596 : vector<1x32xf32>
    %598 = arith.mulf %591, %597 : vector<1x32xf32>
    %599 = vector.extract_strided_slice %535 {offsets = [3, 0], sizes = [1, 128], strides = [1, 1]} : vector<8x128xf32> to vector<1x128xf32>
    %cst_153 = arith.constant dense<0.000000e+00> : vector<1x128xf32>
    %600 = tpu.matmul %598, %536, %cst_153 {dimension_numbers = #tpu.dot_dimension_numbers<[1], [0], [0], [1], [0, 0, 1, 1], [], []>} : vector<1x32xf32>, vector<32x128xf32>, vector<1x128xf32> -> vector<1x128xf32>
    %601 = arith.addf %599, %600 : vector<1x128xf32>
    %cst_154 = arith.constant 5.000000e-01 : f32
    %602 = vector.broadcast %cst_154 : f32 to vector<1x128xf32>
    %603 = arith.mulf %602, %601 : vector<1x128xf32>
    %604 = math.tanh %603 : vector<1x128xf32>
    %cst_155 = arith.constant 5.000000e-01 : f32
    %605 = vector.broadcast %cst_155 : f32 to vector<1x128xf32>
    %606 = arith.mulf %605, %604 : vector<1x128xf32>
    %cst_156 = arith.constant 5.000000e-01 : f32
    %607 = vector.broadcast %cst_156 : f32 to vector<1x128xf32>
    %608 = arith.addf %606, %607 : vector<1x128xf32>
    %609 = vector.extract_strided_slice %608 {offsets = [0, 0], sizes = [1, 32], strides = [1, 1]} : vector<1x128xf32> to vector<1x32xf32>
    %610 = vector.extract_strided_slice %608 {offsets = [0, 32], sizes = [1, 32], strides = [1, 1]} : vector<1x128xf32> to vector<1x32xf32>
    %611 = vector.extract_strided_slice %608 {offsets = [0, 96], sizes = [1, 32], strides = [1, 1]} : vector<1x128xf32> to vector<1x32xf32>
    %612 = vector.extract_strided_slice %601 {offsets = [0, 64], sizes = [1, 32], strides = [1, 1]} : vector<1x128xf32> to vector<1x32xf32>
    %613 = math.tanh %612 : vector<1x32xf32>
    %614 = arith.mulf %610, %596 : vector<1x32xf32>
    %615 = arith.mulf %609, %613 : vector<1x32xf32>
    %616 = arith.addf %614, %615 : vector<1x32xf32>
    %617 = math.tanh %616 : vector<1x32xf32>
    %618 = arith.mulf %611, %617 : vector<1x32xf32>
    %619 = vector.extract_strided_slice %535 {offsets = [4, 0], sizes = [1, 128], strides = [1, 1]} : vector<8x128xf32> to vector<1x128xf32>
    %cst_157 = arith.constant dense<0.000000e+00> : vector<1x128xf32>
    %620 = tpu.matmul %618, %536, %cst_157 {dimension_numbers = #tpu.dot_dimension_numbers<[1], [0], [0], [1], [0, 0, 1, 1], [], []>} : vector<1x32xf32>, vector<32x128xf32>, vector<1x128xf32> -> vector<1x128xf32>
    %621 = arith.addf %619, %620 : vector<1x128xf32>
    %cst_158 = arith.constant 5.000000e-01 : f32
    %622 = vector.broadcast %cst_158 : f32 to vector<1x128xf32>
    %623 = arith.mulf %622, %621 : vector<1x128xf32>
    %624 = math.tanh %623 : vector<1x128xf32>
    %cst_159 = arith.constant 5.000000e-01 : f32
    %625 = vector.broadcast %cst_159 : f32 to vector<1x128xf32>
    %626 = arith.mulf %625, %624 : vector<1x128xf32>
    %cst_160 = arith.constant 5.000000e-01 : f32
    %627 = vector.broadcast %cst_160 : f32 to vector<1x128xf32>
    %628 = arith.addf %626, %627 : vector<1x128xf32>
    %629 = vector.extract_strided_slice %628 {offsets = [0, 0], sizes = [1, 32], strides = [1, 1]} : vector<1x128xf32> to vector<1x32xf32>
    %630 = vector.extract_strided_slice %628 {offsets = [0, 32], sizes = [1, 32], strides = [1, 1]} : vector<1x128xf32> to vector<1x32xf32>
    %631 = vector.extract_strided_slice %628 {offsets = [0, 96], sizes = [1, 32], strides = [1, 1]} : vector<1x128xf32> to vector<1x32xf32>
    %632 = vector.extract_strided_slice %621 {offsets = [0, 64], sizes = [1, 32], strides = [1, 1]} : vector<1x128xf32> to vector<1x32xf32>
    %633 = math.tanh %632 : vector<1x32xf32>
    %634 = arith.mulf %630, %616 : vector<1x32xf32>
    %635 = arith.mulf %629, %633 : vector<1x32xf32>
    %636 = arith.addf %634, %635 : vector<1x32xf32>
    %637 = math.tanh %636 : vector<1x32xf32>
    %638 = arith.mulf %631, %637 : vector<1x32xf32>
    %639 = vector.extract_strided_slice %535 {offsets = [5, 0], sizes = [1, 128], strides = [1, 1]} : vector<8x128xf32> to vector<1x128xf32>
    %cst_161 = arith.constant dense<0.000000e+00> : vector<1x128xf32>
    %640 = tpu.matmul %638, %536, %cst_161 {dimension_numbers = #tpu.dot_dimension_numbers<[1], [0], [0], [1], [0, 0, 1, 1], [], []>} : vector<1x32xf32>, vector<32x128xf32>, vector<1x128xf32> -> vector<1x128xf32>
    %641 = arith.addf %639, %640 : vector<1x128xf32>
    %cst_162 = arith.constant 5.000000e-01 : f32
    %642 = vector.broadcast %cst_162 : f32 to vector<1x128xf32>
    %643 = arith.mulf %642, %641 : vector<1x128xf32>
    %644 = math.tanh %643 : vector<1x128xf32>
    %cst_163 = arith.constant 5.000000e-01 : f32
    %645 = vector.broadcast %cst_163 : f32 to vector<1x128xf32>
    %646 = arith.mulf %645, %644 : vector<1x128xf32>
    %cst_164 = arith.constant 5.000000e-01 : f32
    %647 = vector.broadcast %cst_164 : f32 to vector<1x128xf32>
    %648 = arith.addf %646, %647 : vector<1x128xf32>
    %649 = vector.extract_strided_slice %648 {offsets = [0, 0], sizes = [1, 32], strides = [1, 1]} : vector<1x128xf32> to vector<1x32xf32>
    %650 = vector.extract_strided_slice %648 {offsets = [0, 32], sizes = [1, 32], strides = [1, 1]} : vector<1x128xf32> to vector<1x32xf32>
    %651 = vector.extract_strided_slice %648 {offsets = [0, 96], sizes = [1, 32], strides = [1, 1]} : vector<1x128xf32> to vector<1x32xf32>
    %652 = vector.extract_strided_slice %641 {offsets = [0, 64], sizes = [1, 32], strides = [1, 1]} : vector<1x128xf32> to vector<1x32xf32>
    %653 = math.tanh %652 : vector<1x32xf32>
    %654 = arith.mulf %650, %636 : vector<1x32xf32>
    %655 = arith.mulf %649, %653 : vector<1x32xf32>
    %656 = arith.addf %654, %655 : vector<1x32xf32>
    %657 = math.tanh %656 : vector<1x32xf32>
    %658 = arith.mulf %651, %657 : vector<1x32xf32>
    %659 = vector.extract_strided_slice %535 {offsets = [6, 0], sizes = [1, 128], strides = [1, 1]} : vector<8x128xf32> to vector<1x128xf32>
    %cst_165 = arith.constant dense<0.000000e+00> : vector<1x128xf32>
    %660 = tpu.matmul %658, %536, %cst_165 {dimension_numbers = #tpu.dot_dimension_numbers<[1], [0], [0], [1], [0, 0, 1, 1], [], []>} : vector<1x32xf32>, vector<32x128xf32>, vector<1x128xf32> -> vector<1x128xf32>
    %661 = arith.addf %659, %660 : vector<1x128xf32>
    %cst_166 = arith.constant 5.000000e-01 : f32
    %662 = vector.broadcast %cst_166 : f32 to vector<1x128xf32>
    %663 = arith.mulf %662, %661 : vector<1x128xf32>
    %664 = math.tanh %663 : vector<1x128xf32>
    %cst_167 = arith.constant 5.000000e-01 : f32
    %665 = vector.broadcast %cst_167 : f32 to vector<1x128xf32>
    %666 = arith.mulf %665, %664 : vector<1x128xf32>
    %cst_168 = arith.constant 5.000000e-01 : f32
    %667 = vector.broadcast %cst_168 : f32 to vector<1x128xf32>
    %668 = arith.addf %666, %667 : vector<1x128xf32>
    %669 = vector.extract_strided_slice %668 {offsets = [0, 0], sizes = [1, 32], strides = [1, 1]} : vector<1x128xf32> to vector<1x32xf32>
    %670 = vector.extract_strided_slice %668 {offsets = [0, 32], sizes = [1, 32], strides = [1, 1]} : vector<1x128xf32> to vector<1x32xf32>
    %671 = vector.extract_strided_slice %668 {offsets = [0, 96], sizes = [1, 32], strides = [1, 1]} : vector<1x128xf32> to vector<1x32xf32>
    %672 = vector.extract_strided_slice %661 {offsets = [0, 64], sizes = [1, 32], strides = [1, 1]} : vector<1x128xf32> to vector<1x32xf32>
    %673 = math.tanh %672 : vector<1x32xf32>
    %674 = arith.mulf %670, %656 : vector<1x32xf32>
    %675 = arith.mulf %669, %673 : vector<1x32xf32>
    %676 = arith.addf %674, %675 : vector<1x32xf32>
    %677 = math.tanh %676 : vector<1x32xf32>
    %678 = arith.mulf %671, %677 : vector<1x32xf32>
    %679 = vector.extract_strided_slice %535 {offsets = [7, 0], sizes = [1, 128], strides = [1, 1]} : vector<8x128xf32> to vector<1x128xf32>
    %cst_169 = arith.constant dense<0.000000e+00> : vector<1x128xf32>
    %680 = tpu.matmul %678, %536, %cst_169 {dimension_numbers = #tpu.dot_dimension_numbers<[1], [0], [0], [1], [0, 0, 1, 1], [], []>} : vector<1x32xf32>, vector<32x128xf32>, vector<1x128xf32> -> vector<1x128xf32>
    %681 = arith.addf %679, %680 : vector<1x128xf32>
    %cst_170 = arith.constant 5.000000e-01 : f32
    %682 = vector.broadcast %cst_170 : f32 to vector<1x128xf32>
    %683 = arith.mulf %682, %681 : vector<1x128xf32>
    %684 = math.tanh %683 : vector<1x128xf32>
    %cst_171 = arith.constant 5.000000e-01 : f32
    %685 = vector.broadcast %cst_171 : f32 to vector<1x128xf32>
    %686 = arith.mulf %685, %684 : vector<1x128xf32>
    %cst_172 = arith.constant 5.000000e-01 : f32
    %687 = vector.broadcast %cst_172 : f32 to vector<1x128xf32>
    %688 = arith.addf %686, %687 : vector<1x128xf32>
    %689 = vector.extract_strided_slice %688 {offsets = [0, 0], sizes = [1, 32], strides = [1, 1]} : vector<1x128xf32> to vector<1x32xf32>
    %690 = vector.extract_strided_slice %688 {offsets = [0, 32], sizes = [1, 32], strides = [1, 1]} : vector<1x128xf32> to vector<1x32xf32>
    %691 = vector.extract_strided_slice %688 {offsets = [0, 96], sizes = [1, 32], strides = [1, 1]} : vector<1x128xf32> to vector<1x32xf32>
    %692 = vector.extract_strided_slice %681 {offsets = [0, 64], sizes = [1, 32], strides = [1, 1]} : vector<1x128xf32> to vector<1x32xf32>
    %693 = math.tanh %692 : vector<1x32xf32>
    %694 = arith.mulf %690, %676 : vector<1x32xf32>
    %695 = arith.mulf %689, %693 : vector<1x32xf32>
    %696 = arith.addf %694, %695 : vector<1x32xf32>
    %697 = math.tanh %696 : vector<1x32xf32>
    %698 = arith.mulf %691, %697 : vector<1x32xf32>
    %c0_173 = arith.constant 0 : index
    %c0_174 = arith.constant 0 : index
    %699 = vector.load %arg15[%c0_173, %c0_174] : memref<32x8xf32, #tpu.memory_space<vmem>>, vector<32x8xf32>
    %cst_175 = arith.constant dense<0.000000e+00> : vector<1x8xf32>
    %700 = tpu.matmul %698, %699, %cst_175 {dimension_numbers = #tpu.dot_dimension_numbers<[1], [0], [0], [1], [0, 0, 1, 1], [], []>} : vector<1x32xf32>, vector<32x8xf32>, vector<1x8xf32> -> vector<1x8xf32>
    %c0_176 = arith.constant 0 : index
    %c0_177 = arith.constant 0 : index
    %701 = vector.load %arg16[%c0_176, %c0_177] : memref<1x8xf32, #tpu.memory_space<vmem>>, vector<1x8xf32>
    %702 = arith.addf %700, %701 : vector<1x8xf32>
    %c0_178 = arith.constant 0 : index
    %c0_179 = arith.constant 0 : index
    %703 = vector.load %arg17[%c0_178, %c0_179] : memref<8x4xf32, #tpu.memory_space<vmem>>, vector<8x4xf32>
    %cst_180 = arith.constant dense<0.000000e+00> : vector<1x4xf32>
    %704 = tpu.matmul %702, %703, %cst_180 {dimension_numbers = #tpu.dot_dimension_numbers<[1], [0], [0], [1], [0, 0, 1, 1], [], []>} : vector<1x8xf32>, vector<8x4xf32>, vector<1x4xf32> -> vector<1x4xf32>
    %c0_181 = arith.constant 0 : index
    %c0_182 = arith.constant 0 : index
    %705 = vector.load %arg18[%c0_181, %c0_182] : memref<1x4xf32, #tpu.memory_space<vmem>>, vector<1x4xf32>
    %706 = arith.addf %704, %705 : vector<1x4xf32>
    %cst_183 = arith.constant 5.000000e-01 : f32
    %707 = vector.broadcast %cst_183 : f32 to vector<1x4xf32>
    %708 = arith.mulf %707, %706 : vector<1x4xf32>
    %709 = math.tanh %708 : vector<1x4xf32>
    %cst_184 = arith.constant 5.000000e-01 : f32
    %710 = vector.broadcast %cst_184 : f32 to vector<1x4xf32>
    %711 = arith.mulf %710, %709 : vector<1x4xf32>
    %cst_185 = arith.constant 5.000000e-01 : f32
    %712 = vector.broadcast %cst_185 : f32 to vector<1x4xf32>
    %713 = arith.addf %711, %712 : vector<1x4xf32>
    %c0_186 = arith.constant 0 : index
    %c0_187 = arith.constant 0 : index
    %714 = vector.load %arg19[%c0_186, %c0_187] : memref<1x4xf32, #tpu.memory_space<vmem>>, vector<1x4xf32>
    tpu.vector_store %arg19[%c0_186, %c0_187], %713 {strides = array<i32>} : memref<1x4xf32, #tpu.memory_space<vmem>>, vector<1x4xf32>,
    return
  }
}

</mosaic_0001>

<bundles_post_ra>
// kernel: tpu_custom_call.1
= control target key start
LH: loop header
LB: loop body
LE: loop exit
PB: predicated region body
PF: predicated region fallthrough
CT: control target
= control target key end

     0   :  { %s6238_s0 = inlined_call_operand.hbm [shape: f32[8,8], index: 0, kind: input, shape index: {}]   ;;  %s6239_s1 = inlined_call_operand.hbm [shape: f32[8,128], index: 1, kind: input, shape index: {}]   ;;  %s6240_s2 = inlined_call_operand.vmem [shape: f32[32,128], index: 2, kind: input, shape index: {}]   ;;  %s6241_s3 = inlined_call_operand.vmem [shape: f32[1,128], index: 3, kind: input, shape index: {}]   ;;  %s6242_s4 = inlined_call_operand.vmem [shape: f32[32,128], index: 4, kind: input, shape index: {}]   ;;  %s6243_s5 = inlined_call_operand.vmem [shape: f32[32,128], index: 5, kind: input, shape index: {}]   ;;  %s6244_s6 = inlined_call_operand.hbm [shape: f32[1,128], index: 6, kind: input, shape index: {}]   ;;  %s6245_s7 = inlined_call_operand.hbm [shape: f32[8,128], index: 7, kind: input, shape index: {}]   ;;  %s6246_s8 = inlined_call_operand.hbm [shape: f32[32,128], index: 8, kind: input, shape index: {}]   ;;  %s6247_s9 = inlined_call_operand.hbm [shape: f32[1,128], index: 9, kind: input, shape index: {}]   ;;  %s6248_s10 = inlined_call_operand.hbm [shape: f32[32,128], index: 10, kind: input, shape index: {}]   ;;  %s6249_s11 = inlined_call_operand.vmem [shape: f32[32,128], index: 11, kind: input, shape index: {}]   ;;  %s6250_s12 = inlined_call_operand.hbm [shape: f32[1,128], index: 12, kind: input, shape index: {}]   ;;  %s6251_s13 = inlined_call_operand.vmem [shape: f32[32,1], index: 13, kind: input, shape index: {}]   ;;  %s6252_s14 = inlined_call_operand.<no memory space> [shape: f32[1,1], index: 14, kind: input, shape index: {}]   ;;  %s6253_s15 = inlined_call_operand.vmem [shape: f32[32,8], index: 15, kind: input, shape index: {}]   ;;  %s6254_s16 = inlined_call_operand.vmem [shape: f32[1,8], index: 16, kind: input, shape index: {}]   ;;  %s6255_s17 = inlined_call_operand.vmem [shape: f32[8,4], index: 17, kind: input, shape index: {}]   ;;  %s6256_s18 = inlined_call_operand.vmem [shape: f32[1,4], index: 18, kind: input, shape index: {}]   ;;  %s6257_s19 = inlined_call_operand.hbm [shape: f32[1,4], index: 19, kind: output, shape index: {}]  }
   0x1   :  { %6261 = sst [smem:[#allocation24_spill]] %s6238_s0  ;;  %v24_v0 = vstv %s6252_s14 }
   0x2   :  { %6262 = sst [smem:[#allocation25_spill]] %s6239_s1  ;;  %25 = vst [vmem:[#allocation2] sm:$0x1] %v24_v0 }
   0x3   :  { %6263 = sst [smem:[#allocation26_spill]] %s6240_s2 }
   0x4   :  { %6264 = sst [smem:[#allocation27_spill]] %s6241_s3 }
   0x5   :  { %26 = vsyncpa [#allocation4], 0 }
   0x6   :  { %27 = vsyncpa [#allocation7], 0 }
   0x7   :  { %28 = vsyncpa [#allocation10], 0 }
   0x8   :  { %29 = vsyncpa [#allocation13], 0 }
   0x9   :  { %30 = vsyncpa [#allocation16], 0 }
   0xa   :  { %31 = vsyncpa [#allocation5], 0  ;;  %s5443_s20 = smov [#allocation6]   ;;  %s5444_s1 = smov [#allocation9]  }
   0xb   :  { %s48_s21 = sshll.u32 %s5443_s20, 4  ;;  %s76_s22 = sshll.u32 %s5444_s1, 4  ;;  %s49_s21 = int_to_ptr.vmem [resolvable:$true] %s48_s21  ;;  %s77_s22 = int_to_ptr.vmem [resolvable:$true] %s76_s22 }
   0xc   :  { %s6265_s24 = sld [smem:[#allocation25_spill]] }
  0x12   :  { %s5233_s25 = scalar_lea.hbm %s6265_s24, 128 }
  0x13   :  { %p5234_p0 = scmp.ne.s32.totalorder %s6265_s24, %s5233_s25  ;;  %p5237_p1 = scmp.lt.u32.totalorder %s5233_s25, %s6265_s24 }
  0x15   :  { %p5239_p2 = pnand %p5237_p1, %p5234_p0 }
  0x17   :  { %5242 = shalt.err (!%p5239_p2)
}
  0x18   :  { %s5243_s28 = scalar_lea.vmem %s49_s21, 128  ;;  %p5248_p4 = scmp.lt.s32.totalorder %s49_s21, %s49_s21 }
  0x19   :  { %p5244_p3 = scmp.ne.s32.totalorder %s49_s21, %s5243_s28  ;;  %p5249_p5 = scmp.lt.s32.totalorder %s5243_s28, %s5243_s28 }
  0x1b   :  { %p5250_p6 = por %p5249_p5, %p5248_p4 }
  0x1d   :  { %p5251_p7 = pnand %p5250_p6, %p5244_p3 }
  0x1f   :  { %5254 = shalt.err (!%p5251_p7)
}
  0x20   :  { %51 = dma.hbm_to_vmem [thread:$0]  %s6265_s24, 128, %s49_s21, [#allocation7]  }
  0x21   :  { %s5255_s1 = scalar_lea.hbm %s6245_s7, 128 }
  0x22   :  { %p5256_p8 = scmp.ne.s32.totalorder %s6245_s7, %s5255_s1  ;;  %p5259_p9 = scmp.lt.u32.totalorder %s5255_s1, %s6245_s7 }
  0x24   :  { %p5261_p10 = pnand %p5259_p9, %p5256_p8 }
  0x26   :  { %5264 = shalt.err (!%p5261_p10)
}
  0x27   :  { %s5265_s26 = scalar_lea.vmem %s77_s22, 128  ;;  %p5270_p12 = scmp.lt.s32.totalorder %s77_s22, %s77_s22 }
  0x28   :  { %p5266_p11 = scmp.ne.s32.totalorder %s77_s22, %s5265_s26  ;;  %p5271_p13 = scmp.lt.s32.totalorder %s5265_s26, %s5265_s26 }
  0x2a   :  { %p5272_p0 = por %p5271_p13, %p5270_p12 }
  0x2c   :  { %p5273_p1 = pnand %p5272_p0, %p5266_p11 }
  0x2e   :  { %5276 = shalt.err (!%p5273_p1)
}
  0x2f   :  { %79 = dma.hbm_to_vmem [thread:$0]  %s6245_s7, 128, %s77_s22, [#allocation10]  }
  0x30   :  { %s5445_s14 = smov [#allocation12]   ;;  %s5446_s28 = smov [#allocation3]  }
  0x31   :  { %s98_s27 = sshll.u32 %s5445_s14, 4  ;;  %s38_s29 = sshll.u32 %s5446_s28, 4  ;;  %s99_s27 = int_to_ptr.vmem [resolvable:$true] %s98_s27  ;;  %s39_s29 = int_to_ptr.vmem [resolvable:$true] %s38_s29 }
  0x32   :  { %s5277_s20 = scalar_lea.hbm %s6247_s9, 16 }
  0x33   :  { %p5278_p2 = scmp.ne.s32.totalorder %s6247_s9, %s5277_s20  ;;  %p5281_p3 = scmp.lt.u32.totalorder %s5277_s20, %s6247_s9 }
  0x35   :  { %p5283_p4 = pnand %p5281_p3, %p5278_p2 }
  0x37   :  { %5286 = shalt.err (!%p5283_p4)
}
  0x38   :  { %s5287_s7 = scalar_lea.vmem %s99_s27, 16  ;;  %s5291_s22 = scalar_lea.vmem %s99_s27, 32 }
  0x39   :  { %p5288_p5 = scmp.ne.s32.totalorder %s99_s27, %s5287_s7  ;;  %p5292_p6 = scmp.lt.s32.totalorder %s99_s27, %s99_s27 }
  0x3a   :  { %p5293_p7 = scmp.lt.s32.totalorder %s5291_s22, %s5287_s7 }
  0x3c   :  { %p5294_p8 = por %p5293_p7, %p5292_p6 }
  0x3e   :  { %p5295_p9 = pnand %p5294_p8, %p5288_p5 }
  0x40   :  { %5298 = shalt.err (!%p5295_p9)
}
  0x41   :  { %101 = dma.hbm_to_vmem [thread:$0]  %s6247_s9, 16, %s99_s27, [#allocation13]  }
  0x42   :  { %s6266_s14 = sld [smem:[#allocation24_spill]] }
  0x48   :  { %s5299_s28 = scalar_lea.hbm %s6266_s14, 128 }
  0x49   :  { %p5300_p10 = scmp.ne.s32.totalorder %s6266_s14, %s5299_s28  ;;  %p5303_p11 = scmp.lt.u32.totalorder %s5299_s28, %s6266_s14 }
  0x4b   :  { %p5305_p12 = pnand %p5303_p11, %p5300_p10 }
  0x4d   :  { %5308 = shalt.err (!%p5305_p12)
}
  0x4e   :  { %s5309_s2 = scalar_lea.vmem %s39_s29, 128  ;;  %p5314_p0 = scmp.lt.s32.totalorder %s39_s29, %s39_s29 }
  0x4f   :  { %p5310_p13 = scmp.ne.s32.totalorder %s39_s29, %s5309_s2  ;;  %p5315_p1 = scmp.lt.s32.totalorder %s5309_s2, %s5309_s2 }
  0x51   :  { %p5316_p2 = por %p5315_p1, %p5314_p0 }
  0x53   :  { %p5317_p3 = pnand %p5316_p2, %p5310_p13 }
  0x55   :  { %5320 = shalt.err (!%p5317_p3)
}
  0x56   :  { %41 = dma.hbm_to_vmem [thread:$0]  %s6266_s14, 128, %s39_s29, [#allocation4]  }
  0x57   :  { %s5447_s23 = smov [#allocation8]   ;;  %s5448_s7 = smov [#allocation11]  }
  0x58   :  { %s66_s25 = sshll.u32 %s5447_s23, 4  ;;  %s85_s22 = sshll.u32 %s5448_s7, 4  ;;  %s67_s25 = int_to_ptr.vmem [resolvable:$true] %s66_s25  ;;  %s5611_s22 = int_to_ptr.vmem [resolvable:$true] %s85_s22 }
  0x59   :  { %s5321_s21 = scalar_lea.hbm %s6244_s6, 16 }
  0x5a   :  { %p5322_p4 = scmp.ne.s32.totalorder %s6244_s6, %s5321_s21  ;;  %p5325_p5 = scmp.lt.u32.totalorder %s5321_s21, %s6244_s6 }
  0x5c   :  { %p5327_p6 = pnand %p5325_p5, %p5322_p4 }
  0x5e   :  { %5330 = shalt.err (!%p5327_p6)
}
  0x5f   :  { %s5331_s29 = scalar_lea.vmem %s67_s25, 16  ;;  %s5335_s14 = scalar_lea.vmem %s67_s25, 32 }
  0x60   :  { %p5332_p7 = scmp.ne.s32.totalorder %s67_s25, %s5331_s29  ;;  %p5336_p8 = scmp.lt.s32.totalorder %s67_s25, %s67_s25 }
  0x61   :  { %p5337_p9 = scmp.lt.s32.totalorder %s5335_s14, %s5331_s29 }
  0x63   :  { %p5338_p10 = por %p5337_p9, %p5336_p8 }
  0x65   :  { %p5339_p11 = pnand %p5338_p10, %p5332_p7 }
  0x67   :  { %5342 = shalt.err (!%p5339_p11)
}
  0x68   :  { %69 = dma.hbm_to_vmem [thread:$0]  %s6244_s6, 16, %s67_s25, [#allocation7]  }
  0x69   :  { %s5343_s27 = scalar_lea.hbm %s6246_s8, 512 }
  0x6a   :  { %p5344_p12 = scmp.ne.s32.totalorder %s6246_s8, %s5343_s27  ;;  %p5347_p13 = scmp.lt.u32.totalorder %s5343_s27, %s6246_s8 }
  0x6c   :  { %p5349_p0 = pnand %p5347_p13, %p5344_p12 }
  0x6e   :  { %5352 = shalt.err (!%p5349_p0)
}
  0x6f   :  { %s5353_s21 = scalar_lea.vmem %s5611_s22, 512  ;;  %p5358_p2 = scmp.lt.s32.totalorder %s5611_s22, %s5611_s22 }
  0x70   :  { %p5354_p1 = scmp.ne.s32.totalorder %s5611_s22, %s5353_s21  ;;  %p5359_p3 = scmp.lt.s32.totalorder %s5353_s21, %s5353_s21 }
  0x72   :  { %p5360_p4 = por %p5359_p3, %p5358_p2 }
  0x74   :  { %p5361_p5 = pnand %p5360_p4, %p5354_p1 }
  0x76   :  { %5364 = shalt.err (!%p5361_p5)
}
  0x77   :  { %s5449_s6 = smov 128   ;;  %s5450_s25 = smov 8  }
  0x78   :  { %91 = dma.hbm_to_vmem [thread:$0]  %s6246_s8, 512, %s5611_s22, [#allocation10], %s5449_s6, %s5449_s6, %s5450_s25  }
  0x79   :  { %s5451_s0 = smov [#allocation14]   ;;  %s5452_s29 = smov [#allocation15]  }
  0x7a   :  { %s107_s30 = sshll.u32 %s5451_s0, 4  ;;  %s122_s14 = sshll.u32 %s5452_s29, 4  ;;  %s108_s30 = int_to_ptr.vmem [resolvable:$true] %s107_s30  ;;  %s123_s14 = int_to_ptr.vmem [resolvable:$true] %s122_s14 }
  0x7b   :  { %s5365_s2 = scalar_lea.hbm %s6248_s10, 512 }
  0x7c   :  { %p5366_p6 = scmp.ne.s32.totalorder %s6248_s10, %s5365_s2  ;;  %p5369_p7 = scmp.lt.u32.totalorder %s5365_s2, %s6248_s10 }
  0x7e   :  { %p5371_p8 = pnand %p5369_p7, %p5366_p6 }
  0x80   :  { %5374 = shalt.err (!%p5371_p8)
}
  0x81   :  { %s5375_s8 = scalar_lea.vmem %s108_s30, 512  ;;  %p5380_p10 = scmp.lt.s32.totalorder %s108_s30, %s108_s30 }
  0x82   :  { %p5376_p9 = scmp.ne.s32.totalorder %s108_s30, %s5375_s8  ;;  %p5381_p11 = scmp.lt.s32.totalorder %s5375_s8, %s5375_s8 }
  0x84   :  { %p5382_p12 = por %p5381_p11, %p5380_p10 }
  0x86   :  { %p5383_p13 = pnand %p5382_p12, %p5376_p9 }
  0x88   :  { %5386 = shalt.err (!%p5383_p13)
}
  0x89   :  { %113 = dma.hbm_to_vmem [thread:$0]  %s6248_s10, 512, %s108_s30, [#allocation13], %s5449_s6, %s5449_s6, %s5450_s25  }
  0x8a   :  { %s5387_s24 = scalar_lea.hbm %s6250_s12, 16 }
  0x8b   :  { %p5388_p0 = scmp.ne.s32.totalorder %s6250_s12, %s5387_s24  ;;  %p5391_p1 = scmp.lt.u32.totalorder %s5387_s24, %s6250_s12 }
  0x8d   :  { %p5393_p2 = pnand %p5391_p1, %p5388_p0 }
  0x8f   :  { %5396 = shalt.err (!%p5393_p2)
}
  0x90   :  { %s5397_s1 = scalar_lea.vmem %s123_s14, 16  ;;  %s5401_s2 = scalar_lea.vmem %s123_s14, 32 }
  0x91   :  { %p5398_p3 = scmp.ne.s32.totalorder %s123_s14, %s5397_s1  ;;  %p5402_p4 = scmp.lt.s32.totalorder %s123_s14, %s123_s14 }
  0x92   :  { %p5403_p5 = scmp.lt.s32.totalorder %s5401_s2, %s5397_s1 }
  0x94   :  { %p5404_p6 = por %p5403_p5, %p5402_p4 }
  0x96   :  { %p5405_p7 = pnand %p5404_p6, %p5398_p3 }
  0x98   :  { %5408 = shalt.err (!%p5405_p7)
}
  0x99   :  { %125 = dma.hbm_to_vmem [thread:$0]  %s6250_s12, 16, %s123_s14, [#allocation16]  }
  0x9a   :  { %5431 = dma.done.wait [#allocation4], 128  }
  0x9b   :  { %5432 = vsyncadd [#allocation4], 4294967168 }
  0x9c   :  { %5433 = dma.done.wait [#allocation7], 144  }
  0x9d   :  { %5434 = vsyncadd [#allocation7], 4294967152 }
  0x9e   :  { %5435 = dma.done.wait [#allocation10], 640  }
  0x9f   :  { %5436 = vsyncadd [#allocation10], 4294966656 }
  0xa0   :  { %5437 = dma.done.wait [#allocation13], 528  }
  0xa1   :  { %5438 = vsyncadd [#allocation13], 4294966768 }
  0xa2   :  { %5439 = dma.done.wait [#allocation16], 16  }
  0xa3   :  { %5440 = vsyncadd [#allocation16], 4294967280  ;;  %v5453_v1 = vmov 0.0|0.0   ;;  %v5454_v2 = vmov 0.0   ;;  %vm5455_vm0 = vmmov 0   ;;  %vm171_vm1 = vcmask 64512  }
  0xa4   :  { %4796 = vmatprep.subr.bf16.mxu1 %v5453_v1  ;;  %4385 = vmatprep.subr.mxu0 %v5454_v2  ;;  %s6267_s30 = sld [smem:[#allocation26_spill]]  ;;  %v163_v5 = vld [vmem:[#allocation6] sm:$0xff]  ;;  %v162_v7 = vld [vmem:[#allocation3] sm:$0xff]  ;;  %s6268_s26 = sld [smem:[#allocation27_spill]]  ;;  %vm249_vm2 = vcmask 261120   ;;  %vm1080_vm3 = vcmask 1040384  }
  0xa5   :  { %4387 = vmatprep.mubr.msk.f32.mxu0 %vm5455_vm0, %v5454_v2  ;;  %4398 = vmatprep.mubr.msk.f32.mxu1 %vm5455_vm0, %v5454_v2  ;;  %s5456_s21 = smov 64   ;;  %s5457_s24 = smov 32   ;;  %vm1082_vm4 = vcmask 1041408   ;;  %vm1084_vm5 = vcmask 1042432   ;;  %vm1086_vm6 = vcmask 1043456   ;;  %vm1088_vm7 = vcmask 1044480  }
  0xa6   :  { %4386 = vmatpush3.msra.mxu0 %v163_v5  ;;  %vm1090_vm8 = vcmask 1045504   ;;  %vm1092_vm9 = vcmask 1046528   ;;  %vm2105_vm10 = vcmask 7168   ;;  %vm4138_vm11 = vcmask 24576  }
  0xa7   :  { %4388 = vmatmul.mubr.msk.f32.vlgmr.msra.gmra.mrb[0].mxu0 %vm171_vm1, %v162_v7  ;;  %4802 = vmatprep.subr.bf16.mxu0 %v5453_v1 }
  0xa8   :  { %4409 = vmatprep.mubr.msk.f32.mxu0 %vm5455_vm0, %v5454_v2 }
  0xaa   :  { %v245_v3 = vld [vmem:[%s6267_s30] sm:$0xff]  ;;  %v246_v4 = vld [vmem:[%s6267_s30 + $0x8] sm:$0xff]  ;;  %v247_v8 = vld [vmem:[%s6267_s30 + $0x10] sm:$0xff] }
  0xab   :  { %v5678_v6 = vpack.c.bf16 %v246_v4, %v245_v3  ;;  %v248_v9 = vld [vmem:[%s6267_s30 + $0x18] sm:$0xff]  ;;  %v4159_v13 = vld [vmem:[%s6268_s26] ss:$0 sm:$0xff] }
  0xac   :  { %v5689_v10 = vpack.c.bf16 %v248_v9, %v247_v8 }
  0xad   :  { %4798 = vmatpush3.bf16.msra.mxu1 %v5678_v6  ;;  %4804 = vmatpush3.bf16.msra.mxu0 %v5678_v6 }
  0xae   :  { %4799 = vmatprep.subr.bf16.mxu1 %v5453_v1  ;;  %4805 = vmatprep.subr.bf16.mxu0 %v5453_v1 }
  0xb1   :  { %4801 = vmatpush3.bf16.msra.mxu1 %v5689_v10  ;;  %4807 = vmatpush3.bf16.msra.mxu0 %v5689_v10 }
  0xb2   :  { %4808 = vmatprep.subr.bf16.mxu1 %v5453_v1  ;;  %4814 = vmatprep.subr.bf16.mxu0 %v5453_v1 }
  0xb4   :  { %4399 = vmatmul.mubr.f32.vlgmr.msra.gmra.mrb[0].mxu1 %v5454_v2 }
  0xb5   :  { %4810 = vmatpush3.bf16.msra.mxu1 %v5678_v6  ;;  %4420 = vmatprep.mubr.msk.f32.mxu1 %vm5455_vm0, %v5454_v2 }
  0xb6   :  { %4811 = vmatprep.subr.bf16.mxu1 %v5453_v1 }
  0xb9   :  { %4813 = vmatpush3.bf16.msra.mxu1 %v5689_v10 }
  0xba   :  { %4820 = vmatprep.subr.bf16.mxu1 %v5453_v1 }
 0x17a   :  { %v241_v11 = vpop.f32.mrb[0].mxu0 }
 0x17b   :  { %v4389_v12 = vpop.f32.mrb[1].mxu0  ;;  %v5710_v14 = vadd.f32 %v4159_v13, %v241_v11 }
 0x187   :  { %v319_v15 = vpop.f32.mrb[0].mxu1 }
 0x188   :  { %v323_v16 = vadd.f32 %v319_v15, %v5710_v14  ;;  %v4400_v17 = vpop.f32.mrb[1].mxu1 }
 0x18a   :  { %5030 = vtanh.f32 %v323_v16  ;;  %v324_v19 = vmul.f32 0.5, %v323_v16 }
 0x18c   :  { %5032 = vtanh.f32 %v324_v19 }
 0x194   :  { %v5031_v18 = vpop.eup %5030 }
 0x195   :  { %331 = vrot.lane.b32.xlu0 %v5031_v18, %s5456_s21 }
 0x196   :  { %v5033_v20 = vpop.eup %5032 }
 0x197   :  { %v326_v21 = vmul.f32 0.5, %v5033_v20 }
 0x199   :  { %v327_v22 = vadd.f32 0.5, %v326_v21 }
 0x19b   :  { %v329_v25 = vmul.f32 0.0, %v327_v22 }
 0x207   :  { %v332_v23 = vpop.permute.xlu0 %331 }
 0x208   :  { %v334_v24 = vmul.f32 %v332_v23, %v327_v22 }
 0x20a   :  { %336 = vrot.lane.b32.xlu0 %v334_v24, %s5457_s24 }
 0x27c   :  { %v337_v26 = vpop.permute.xlu0 %336 }
 0x27d   :  { %v339_v27 = vadd.f32 %v337_v26, %v329_v25 }
 0x27f   :  { %5034 = vtanh.f32 %v339_v27  ;;  %v431_v43 = vrot.slane %v339_v27, 7 }
 0x289   :  { %v5035_v28 = vpop.eup %5034 }
 0x28a   :  { %342 = vrot.lane.b32.xlu1 %v5035_v28, %s5456_s21 }
 0x2fc   :  { %v343_v29 = vpop.permute.xlu1 %342 }
 0x2fd   :  { %v5716_v30 = vmul.f32 %v343_v29, %v327_v22 }
 0x2ff   :  { %347 = vrot.lane.b32.xlu1 %v5716_v30, %s5457_s24 }
 0x371   :  { %v348_v31 = vpop.permute.xlu1 %347 }
 0x372   :  { %4410 = vmatmul.mubr.msk.f32.vlgmr.msra.gmra.mrb[2].mxu0 %vm249_vm2, %v348_v31 }
 0x373   :  { %4816 = vmatpush3.bf16.msra.mxu0 %v5678_v6  ;;  %4431 = vmatprep.mubr.msk.f32.mxu0 %vm5455_vm0, %v5454_v2 }
 0x374   :  { %4817 = vmatprep.subr.bf16.mxu0 %v5453_v1 }
 0x377   :  { %4819 = vmatpush3.bf16.msra.mxu0 %v5689_v10 }
 0x378   :  { %4826 = vmatprep.subr.bf16.mxu0 %v5453_v1 }
 0x445   :  { %v417_v32 = vpop.f32.mrb[2].mxu0 }
 0x446   :  { %v422_v33 = vrot.slane %v417_v32, 7  ;;  %v4411_v34 = vpop.f32.mrb[3].mxu0 }
 0x448   :  { %v424_v35 = vadd.f32 %v422_v33, %v5710_v14 }
 0x44a   :  { %5036 = vtanh.f32 %v424_v35  ;;  %v425_v37 = vmul.f32 0.5, %v424_v35 }
 0x44c   :  { %5038 = vtanh.f32 %v425_v37 }
 0x454   :  { %v5037_v36 = vpop.eup %5036 }
 0x455   :  { %435 = vrot.lane.b32.xlu0 %v5037_v36, %s5456_s21 }
 0x456   :  { %v5039_v38 = vpop.eup %5038 }
 0x457   :  { %v427_v39 = vmul.f32 0.5, %v5039_v38 }
 0x459   :  { %v428_v40 = vadd.f32 0.5, %v427_v39 }
 0x45b   :  { %v433_v44 = vmul.f32 %v431_v43, %v428_v40 }
 0x4c7   :  { %v436_v41 = vpop.permute.xlu0 %435 }
 0x4c8   :  { %v438_v42 = vmul.f32 %v436_v41, %v428_v40 }
 0x4ca   :  { %440 = vrot.lane.b32.xlu1 %v438_v42, %s5457_s24 }
 0x53c   :  { %v441_v45 = vpop.permute.xlu1 %440 }
 0x53d   :  { %v443_v46 = vadd.f32 %v441_v45, %v433_v44 }
 0x53f   :  { %5040 = vtanh.f32 %v443_v46  ;;  %v536_v63 = vrot.slane %v443_v46, 7 }
 0x549   :  { %v5041_v47 = vpop.eup %5040 }
 0x54a   :  { %446 = vrot.lane.b32.xlu0 %v5041_v47, %s5456_s21 }
 0x5bc   :  { %v447_v48 = vpop.permute.xlu0 %446 }
 0x5bd   :  { %v449_v49 = vmul.f32 %v447_v48, %v428_v40 }
 0x5bf   :  { %v451_v50 = vrot.slane %v449_v49, 1  ;;  %v1081_v9 = vsel %vm1080_vm3, %v5716_v30, %v449_v49 }
 0x5c1   :  { %452 = vrot.lane.b32.xlu1 %v451_v50, %s5457_s24 }
 0x633   :  { %v453_v51 = vpop.permute.xlu1 %452 }
 0x634   :  { %4421 = vmatmul.mubr.msk.f32.vlgmr.msra.gmra.mrb[2].mxu1 %vm249_vm2, %v453_v51 }
 0x635   :  { %4822 = vmatpush3.bf16.msra.mxu1 %v5678_v6  ;;  %4442 = vmatprep.mubr.msk.f32.mxu1 %vm5455_vm0, %v5454_v2 }
 0x636   :  { %4823 = vmatprep.subr.bf16.mxu1 %v5453_v1 }
 0x639   :  { %4825 = vmatpush3.bf16.msra.mxu1 %v5689_v10 }
 0x63a   :  { %4832 = vmatprep.subr.bf16.mxu1 %v5453_v1 }
 0x707   :  { %v522_v52 = vpop.f32.mrb[2].mxu1 }
 0x708   :  { %v527_v53 = vrot.slane %v522_v52, 6  ;;  %v4422_v54 = vpop.f32.mrb[3].mxu1 }
 0x70a   :  { %v529_v55 = vadd.f32 %v527_v53, %v5710_v14 }
 0x70c   :  { %5042 = vtanh.f32 %v529_v55  ;;  %v530_v57 = vmul.f32 0.5, %v529_v55 }
 0x70e   :  { %5044 = vtanh.f32 %v530_v57 }
 0x716   :  { %v5043_v56 = vpop.eup %5042 }
 0x717   :  { %540 = vrot.lane.b32.xlu0 %v5043_v56, %s5456_s21 }
 0x718   :  { %v5045_v58 = vpop.eup %5044 }
 0x719   :  { %v532_v59 = vmul.f32 0.5, %v5045_v58 }
 0x71b   :  { %v533_v60 = vadd.f32 0.5, %v532_v59 }
 0x71d   :  { %v538_v0 = vmul.f32 %v536_v63, %v533_v60 }
 0x789   :  { %v541_v61 = vpop.permute.xlu0 %540 }
 0x78a   :  { %v543_v62 = vmul.f32 %v541_v61, %v533_v60 }
 0x78c   :  { %545 = vrot.lane.b32.xlu1 %v543_v62, %s5457_s24 }
 0x7fe   :  { %v546_v3 = vpop.permute.xlu1 %545 }
 0x7ff   :  { %v548_v4 = vadd.f32 %v546_v3, %v538_v0 }
 0x801   :  { %5046 = vtanh.f32 %v548_v4  ;;  %v641_v26 = vrot.slane %v548_v4, 7 }
 0x80b   :  { %v5047_v5 = vpop.eup %5046 }
 0x80c   :  { %551 = vrot.lane.b32.xlu0 %v5047_v5, %s5456_s21 }
 0x87e   :  { %v552_v7 = vpop.permute.xlu0 %551 }
 0x87f   :  { %v554_v8 = vmul.f32 %v552_v7, %v533_v60 }
 0x881   :  { %v556_v11 = vrot.slane %v554_v8, 2  ;;  %v1083_v12 = vsel %vm1082_vm4, %v1081_v9, %v554_v8 }
 0x883   :  { %557 = vrot.lane.b32.xlu1 %v556_v11, %s5457_s24 }
 0x8f5   :  { %v558_v13 = vpop.permute.xlu1 %557 }
 0x8f6   :  { %4432 = vmatmul.mubr.msk.f32.vlgmr.msra.gmra.mrb[4].mxu0 %vm249_vm2, %v558_v13 }
 0x8f7   :  { %4828 = vmatpush3.bf16.msra.mxu0 %v5678_v6  ;;  %4453 = vmatprep.mubr.msk.f32.mxu0 %vm5455_vm0, %v5454_v2 }
 0x8f8   :  { %4829 = vmatprep.subr.bf16.mxu0 %v5453_v1 }
 0x8fb   :  { %4831 = vmatpush3.bf16.msra.mxu0 %v5689_v10 }
 0x8fc   :  { %4838 = vmatprep.subr.bf16.mxu0 %v5453_v1 }
 0x9c9   :  { %v627_v15 = vpop.f32.mrb[4].mxu0 }
 0x9ca   :  { %v632_v16 = vrot.slane %v627_v15, 5  ;;  %v4433_v17 = vpop.f32.mrb[5].mxu0 }
 0x9cc   :  { %v634_v18 = vadd.f32 %v632_v16, %v5710_v14 }
 0x9ce   :  { %5048 = vtanh.f32 %v634_v18  ;;  %v635_v20 = vmul.f32 0.5, %v634_v18 }
 0x9d0   :  { %5050 = vtanh.f32 %v635_v20 }
 0x9d8   :  { %v5049_v19 = vpop.eup %5048 }
 0x9d9   :  { %645 = vrot.lane.b32.xlu0 %v5049_v19, %s5456_s21 }
 0x9da   :  { %v5051_v21 = vpop.eup %5050 }
 0x9db   :  { %v637_v22 = vmul.f32 0.5, %v5051_v21 }
 0x9dd   :  { %v638_v23 = vadd.f32 0.5, %v637_v22 }
 0x9df   :  { %v643_v27 = vmul.f32 %v641_v26, %v638_v23 }
 0xa4b   :  { %v646_v24 = vpop.permute.xlu0 %645 }
 0xa4c   :  { %v648_v25 = vmul.f32 %v646_v24, %v638_v23 }
 0xa4e   :  { %650 = vrot.lane.b32.xlu1 %v648_v25, %s5457_s24 }
 0xac0   :  { %v651_v28 = vpop.permute.xlu1 %650 }
 0xac1   :  { %v653_v29 = vadd.f32 %v651_v28, %v643_v27 }
 0xac3   :  { %5052 = vtanh.f32 %v653_v29  ;;  %v746_v47 = vrot.slane %v653_v29, 7 }
 0xacd   :  { %v5053_v30 = vpop.eup %5052 }
 0xace   :  { %656 = vrot.lane.b32.xlu0 %v5053_v30, %s5456_s21 }
 0xb40   :  { %v657_v31 = vpop.permute.xlu0 %656 }
 0xb41   :  { %v659_v32 = vmul.f32 %v657_v31, %v638_v23 }
 0xb43   :  { %v661_v33 = vrot.slane %v659_v32, 3  ;;  %v1085_v34 = vsel %vm1084_vm5, %v1083_v12, %v659_v32 }
 0xb45   :  { %662 = vrot.lane.b32.xlu1 %v661_v33, %s5457_s24 }
 0xbb7   :  { %v663_v35 = vpop.permute.xlu1 %662 }
 0xbb8   :  { %4443 = vmatmul.mubr.msk.f32.vlgmr.msra.gmra.mrb[4].mxu1 %vm249_vm2, %v663_v35 }
 0xbb9   :  { %4834 = vmatpush3.bf16.msra.mxu1 %v5678_v6  ;;  %4464 = vmatprep.mubr.msk.f32.mxu1 %vm5455_vm0, %v5454_v2 }
 0xbba   :  { %4835 = vmatprep.subr.bf16.mxu1 %v5453_v1 }
 0xbbd   :  { %4837 = vmatpush3.bf16.msra.mxu1 %v5689_v10 }
 0xbbe   :  { %4844 = vmatprep.subr.bf16.mxu1 %v5453_v1 }
 0xc8b   :  { %v732_v36 = vpop.f32.mrb[4].mxu1 }
 0xc8c   :  { %v737_v37 = vrot.slane %v732_v36, 4  ;;  %v4444_v38 = vpop.f32.mrb[5].mxu1 }
 0xc8e   :  { %v739_v39 = vadd.f32 %v737_v37, %v5710_v14 }
 0xc90   :  { %5054 = vtanh.f32 %v739_v39  ;;  %v740_v41 = vmul.f32 0.5, %v739_v39 }
 0xc92   :  { %5056 = vtanh.f32 %v740_v41 }
 0xc9a   :  { %v5055_v40 = vpop.eup %5054 }
 0xc9b   :  { %750 = vrot.lane.b32.xlu0 %v5055_v40, %s5456_s21 }
 0xc9c   :  { %v5057_v42 = vpop.eup %5056 }
 0xc9d   :  { %v742_v43 = vmul.f32 0.5, %v5057_v42 }
 0xc9f   :  { %v743_v44 = vadd.f32 0.5, %v742_v43 }
 0xca1   :  { %v748_v48 = vmul.f32 %v746_v47, %v743_v44 }
 0xd0d   :  { %v751_v45 = vpop.permute.xlu0 %750 }
 0xd0e   :  { %v753_v46 = vmul.f32 %v751_v45, %v743_v44 }
 0xd10   :  { %755 = vrot.lane.b32.xlu1 %v753_v46, %s5457_s24 }
 0xd82   :  { %v756_v49 = vpop.permute.xlu1 %755 }
 0xd83   :  { %v758_v50 = vadd.f32 %v756_v49, %v748_v48 }
 0xd85   :  { %5058 = vtanh.f32 %v758_v50 }
 0xd8f   :  { %v5059_v51 = vpop.eup %5058 }
 0xd90   :  { %761 = vrot.lane.b32.xlu0 %v5059_v51, %s5456_s21 }
 0xe02   :  { %v762_v52 = vpop.permute.xlu0 %761 }
 0xe03   :  { %v764_v53 = vmul.f32 %v762_v52, %v743_v44 }
 0xe05   :  { %v766_v54 = vrot.slane %v764_v53, 4  ;;  %v1087_v55 = vsel %vm1086_vm6, %v1085_v34, %v764_v53  ;;  %v1095_v53 = vld [vmem:[%s6242_s4 + $0x8] sm:$0xff] }
 0xe07   :  { %767 = vrot.lane.b32.xlu1 %v766_v54, %s5457_s24  ;;  %v1180_v54 = vld [vmem:[%s6243_s5] sm:$0xff] }
 0xe79   :  { %v768_v56 = vpop.permute.xlu1 %767 }
 0xe7a   :  { %4454 = vmatmul.mubr.msk.f32.vlgmr.msra.gmra.mrb[6].mxu0 %vm249_vm2, %v768_v56  ;;  %v1181_v56 = vld [vmem:[%s6243_s5 + $0x8] sm:$0xff] }
 0xe7b   :  { %4840 = vmatpush3.bf16.msra.mxu0 %v5678_v6  ;;  %4475 = vmatprep.mubr.msk.f32.mxu0 %vm5455_vm0, %v5454_v2 }
 0xe7c   :  { %4841 = vmatprep.subr.bf16.mxu0 %v5453_v1 }
 0xe7f   :  { %4843 = vmatpush3.bf16.msra.mxu0 %v5689_v10  ;;  %v851_v10 = vrot.slane %v758_v50, 7 }
 0xe80   :  { %4850 = vmatprep.subr.bf16.mxu0 %v5453_v1 }
 0xf4d   :  { %v837_v57 = vpop.f32.mrb[6].mxu0 }
 0xf4e   :  { %v842_v58 = vrot.slane %v837_v57, 3  ;;  %v4455_v59 = vpop.f32.mrb[7].mxu0  ;;  %v1096_v57 = vld [vmem:[%s6242_s4 + $0x10] sm:$0xff] }
 0xf4f   :  { %v5819_v59 = vpack.c.bf16 %v1181_v56, %v1180_v54 }
 0xf50   :  { %v844_v60 = vadd.f32 %v842_v58, %v5710_v14  ;;  %v1097_v58 = vld [vmem:[%s6242_s4 + $0x18] sm:$0xff] }
 0xf52   :  { %5060 = vtanh.f32 %v844_v60  ;;  %v845_v62 = vmul.f32 0.5, %v844_v60  ;;  %v1182_v60 = vld [vmem:[%s6243_s5 + $0x10] sm:$0xff] }
 0xf54   :  { %5062 = vtanh.f32 %v845_v62  ;;  %v4848_v62 = vpack.c.bf16 %v1097_v58, %v1096_v57 }
 0xf5c   :  { %v5061_v61 = vpop.eup %5060 }
 0xf5d   :  { %855 = vrot.lane.b32.xlu0 %v5061_v61, %s5456_s21  ;;  %v1183_v61 = vld [vmem:[%s6243_s5 + $0x18] sm:$0xff] }
 0xf5e   :  { %v5063_v6 = vpop.eup %5062 }
 0xf5f   :  { %v847_v63 = vmul.f32 0.5, %v5063_v6  ;;  %v5829_v6 = vpack.c.bf16 %v1183_v61, %v1182_v60 }
 0xf61   :  { %v848_v0 = vadd.f32 0.5, %v847_v63 }
 0xf63   :  { %v853_v5 = vmul.f32 %v851_v10, %v848_v0 }
 0xfcf   :  { %v856_v3 = vpop.permute.xlu0 %855 }
 0xfd0   :  { %v858_v4 = vmul.f32 %v856_v3, %v848_v0 }
 0xfd2   :  { %860 = vrot.lane.b32.xlu1 %v858_v4, %s5457_s24 }
0x1044   :  { %v861_v7 = vpop.permute.xlu1 %860 }
0x1045   :  { %v863_v8 = vadd.f32 %v861_v7, %v853_v5 }
0x1047   :  { %5064 = vtanh.f32 %v863_v8  ;;  %v956_v28 = vrot.slane %v863_v8, 7  ;;  %v4168_v8 = vld [vmem:[#allocation8] ss:$0 sm:$0xff] }
0x1051   :  { %v5065_v9 = vpop.eup %5064 }
0x1052   :  { %866 = vrot.lane.b32.xlu0 %v5065_v9, %s5456_s21 }
0x10c4   :  { %v867_v11 = vpop.permute.xlu0 %866 }
0x10c5   :  { %v869_v12 = vmul.f32 %v867_v11, %v848_v0 }
0x10c7   :  { %v871_v13 = vrot.slane %v869_v12, 5  ;;  %v1089_v15 = vsel %vm1088_vm7, %v1087_v55, %v869_v12 }
0x10c9   :  { %872 = vrot.lane.b32.xlu1 %v871_v13, %s5457_s24 }
0x113b   :  { %v873_v16 = vpop.permute.xlu1 %872 }
0x113c   :  { %4465 = vmatmul.mubr.msk.f32.vlgmr.msra.gmra.mrb[6].mxu1 %vm249_vm2, %v873_v16 }
0x113d   :  { %4486 = vmatprep.mubr.msk.f32.mxu1 %vm5455_vm0, %v5454_v2 }
0x120f   :  { %v942_v17 = vpop.f32.mrb[6].mxu1 }
0x1210   :  { %v947_v18 = vrot.slane %v942_v17, 2  ;;  %v4466_v19 = vpop.f32.mrb[7].mxu1 }
0x1212   :  { %v949_v20 = vadd.f32 %v947_v18, %v5710_v14 }
0x1214   :  { %5066 = vtanh.f32 %v949_v20  ;;  %v950_v22 = vmul.f32 0.5, %v949_v20 }
0x1216   :  { %5068 = vtanh.f32 %v950_v22 }
0x121e   :  { %v5067_v21 = vpop.eup %5066 }
0x121f   :  { %960 = vrot.lane.b32.xlu0 %v5067_v21, %s5456_s21 }
0x1220   :  { %v5069_v23 = vpop.eup %5068 }
0x1221   :  { %v952_v24 = vmul.f32 0.5, %v5069_v23 }
0x1223   :  { %v953_v25 = vadd.f32 0.5, %v952_v24 }
0x1225   :  { %v958_v29 = vmul.f32 %v956_v28, %v953_v25 }
0x1291   :  { %v961_v26 = vpop.permute.xlu0 %960 }
0x1292   :  { %v963_v27 = vmul.f32 %v961_v26, %v953_v25 }
0x1294   :  { %965 = vrot.lane.b32.xlu1 %v963_v27, %s5457_s24 }
0x1306   :  { %v966_v30 = vpop.permute.xlu1 %965 }
0x1307   :  { %v968_v31 = vadd.f32 %v966_v30, %v958_v29 }
0x1309   :  { %5070 = vtanh.f32 %v968_v31  ;;  %v1061_v49 = vrot.slane %v968_v31, 7 }
0x1313   :  { %v5071_v32 = vpop.eup %5070 }
0x1314   :  { %971 = vrot.lane.b32.xlu0 %v5071_v32, %s5456_s21 }
0x1386   :  { %v972_v33 = vpop.permute.xlu0 %971 }
0x1387   :  { %v974_v34 = vmul.f32 %v972_v33, %v953_v25 }
0x1389   :  { %v976_v35 = vrot.slane %v974_v34, 6  ;;  %v1091_v36 = vsel %vm1090_vm8, %v1089_v15, %v974_v34 }
0x138b   :  { %977 = vrot.lane.b32.xlu1 %v976_v35, %s5457_s24 }
0x13fd   :  { %v978_v37 = vpop.permute.xlu1 %977 }
0x13fe   :  { %4476 = vmatmul.mubr.msk.f32.vlgmr.msra.gmra.mrb[8].mxu0 %vm249_vm2, %v978_v37 }
0x13ff   :  { %4497 = vmatprep.mubr.msk.f32.mxu0 %vm5455_vm0, %v5454_v2  ;;  %4852 = vmatpush3.bf16.msra.mxu0 %v5819_v59 }
0x1400   :  { %4853 = vmatprep.subr.bf16.mxu0 %v5453_v1 }
0x1403   :  { %4855 = vmatpush3.bf16.msra.mxu0 %v5829_v6 }
0x1404   :  { %4862 = vmatprep.subr.bf16.mxu0 %v5453_v1 }
0x1406   :  { %4498 = vmatmul.mubr.f32.vlgmr.msra.gmra.mrb[10].mxu0 %v5454_v2 }
0x1407   :  { %4864 = vmatpush3.bf16.msra.mxu0 %v5819_v59  ;;  %4519 = vmatprep.mubr.msk.f32.mxu0 %vm5455_vm0, %v5454_v2 }
0x1408   :  { %4865 = vmatprep.subr.bf16.mxu0 %v5453_v1 }
0x140b   :  { %4867 = vmatpush3.bf16.msra.mxu0 %v5829_v6 }
0x140c   :  { %4874 = vmatprep.subr.bf16.mxu0 %v5453_v1 }
0x14d1   :  { %v1047_v38 = vpop.f32.mrb[8].mxu0 }
0x14d2   :  { %v1052_v39 = vrot.slane %v1047_v38, 1  ;;  %v4477_v40 = vpop.f32.mrb[9].mxu0 }
0x14d4   :  { %v1054_v41 = vadd.f32 %v1052_v39, %v5710_v14  ;;  %v1094_v14 = vld [vmem:[%s6242_s4] sm:$0xff] }
0x14d5   :  { %v4845_v55 = vpack.c.bf16 %v1095_v53, %v1094_v14 }
0x14d6   :  { %5072 = vtanh.f32 %v1054_v41  ;;  %v1055_v43 = vmul.f32 0.5, %v1054_v41 }
0x14d7   :  { %4846 = vmatpush3.bf16.msra.mxu1 %v4845_v55 }
0x14d8   :  { %5074 = vtanh.f32 %v1055_v43  ;;  %4847 = vmatprep.subr.bf16.mxu1 %v5453_v1 }
0x14d9   :  { %v1250_v5 = vpop.f32.mrb[10].mxu0 }
0x14da   :  { %v4499_v7 = vpop.f32.mrb[11].mxu0 }
0x14db   :  { %4849 = vmatpush3.bf16.msra.mxu1 %v4848_v62 }
0x14dc   :  { %4856 = vmatprep.subr.bf16.mxu1 %v5453_v1 }
0x14e0   :  { %v5073_v42 = vpop.eup %5072 }
0x14e1   :  { %1065 = vrot.lane.b32.xlu0 %v5073_v42, %s5456_s21 }
0x14e2   :  { %v5075_v44 = vpop.eup %5074 }
0x14e3   :  { %v1057_v45 = vmul.f32 0.5, %v5075_v44 }
0x14e5   :  { %v1058_v46 = vadd.f32 0.5, %v1057_v45 }
0x14e7   :  { %v1063_v50 = vmul.f32 %v1061_v49, %v1058_v46 }
0x1553   :  { %v1066_v47 = vpop.permute.xlu0 %1065 }
0x1554   :  { %v1068_v48 = vmul.f32 %v1066_v47, %v1058_v46 }
0x1556   :  { %1070 = vrot.lane.b32.xlu1 %v1068_v48, %s5457_s24 }
0x15c8   :  { %v1071_v51 = vpop.permute.xlu1 %1070 }
0x15c9   :  { %v1073_v52 = vadd.f32 %v1071_v51, %v1063_v50 }
0x15cb   :  { %5076 = vtanh.f32 %v1073_v52 }
0x15d5   :  { %v5077_v63 = vpop.eup %5076 }
0x15d6   :  { %1076 = vrot.lane.b32.xlu0 %v5077_v63, %s5456_s21 }
0x1648   :  { %v1077_v0 = vpop.permute.xlu0 %1076 }
0x1649   :  { %v1079_v3 = vmul.f32 %v1077_v0, %v1058_v46 }
0x164b   :  { %v1093_v4 = vsel %vm1092_vm9, %v1091_v36, %v1079_v3 }
0x164c   :  { %1106 = vrot.lane.b32.xlu1 %v1093_v4, %s5457_s24 }
0x16be   :  { %v1107_v10 = vpop.permute.xlu1 %1106 }
0x16bf   :  { %4487 = vmatmul.mubr.msk.f32.vlgmr.msra.gmra.mrb[8].mxu1 %vm249_vm2, %v1107_v10 }
0x16c0   :  { %4858 = vmatpush3.bf16.msra.mxu1 %v5819_v59  ;;  %4508 = vmatprep.mubr.msk.f32.mxu1 %vm5455_vm0, %v5454_v2 }
0x16c1   :  { %4859 = vmatprep.subr.bf16.mxu1 %v5453_v1 }
0x16c4   :  { %4861 = vmatpush3.bf16.msra.mxu1 %v5829_v6 }
0x16c5   :  { %4868 = vmatprep.subr.bf16.mxu1 %v5453_v1 }
0x1792   :  { %v1176_v9 = vpop.f32.mrb[8].mxu1 }
0x1793   :  { %v5852_v11 = vadd.f32 %v4168_v8, %v1176_v9  ;;  %v4488_v12 = vpop.f32.mrb[9].mxu1 }
0x1795   :  { %v1254_v13 = vadd.f32 %v1250_v5, %v5852_v11 }
0x1797   :  { %5078 = vtanh.f32 %v1254_v13  ;;  %v1255_v16 = vmul.f32 0.5, %v1254_v13 }
0x1799   :  { %5080 = vtanh.f32 %v1255_v16 }
0x17a1   :  { %v5079_v15 = vpop.eup %5078 }
0x17a2   :  { %1262 = vrot.lane.b32.xlu0 %v5079_v15, %s5456_s21 }
0x17a3   :  { %v5081_v17 = vpop.eup %5080 }
0x17a4   :  { %v1257_v18 = vmul.f32 0.5, %v5081_v17 }
0x17a6   :  { %v1258_v19 = vadd.f32 0.5, %v1257_v18 }
0x17a8   :  { %v1260_v22 = vmul.f32 0.0, %v1258_v19 }
0x1814   :  { %v1263_v20 = vpop.permute.xlu0 %1262 }
0x1815   :  { %v1265_v21 = vmul.f32 %v1263_v20, %v1258_v19 }
0x1817   :  { %1267 = vrot.lane.b32.xlu1 %v1265_v21, %s5457_s24 }
0x1889   :  { %v1268_v23 = vpop.permute.xlu1 %1267 }
0x188a   :  { %v1270_v24 = vadd.f32 %v1268_v23, %v1260_v22 }
0x188c   :  { %5082 = vtanh.f32 %v1270_v24  ;;  %v1362_v40 = vrot.slane %v1270_v24, 7 }
0x1896   :  { %v5083_v25 = vpop.eup %5082 }
0x1897   :  { %1273 = vrot.lane.b32.xlu0 %v5083_v25, %s5456_s21 }
0x1909   :  { %v1274_v26 = vpop.permute.xlu0 %1273 }
0x190a   :  { %v5858_v27 = vmul.f32 %v1274_v26, %v1258_v19 }
0x190c   :  { %1278 = vrot.lane.b32.xlu1 %v5858_v27, %s5457_s24 }
0x197e   :  { %v1279_v28 = vpop.permute.xlu1 %1278 }
0x197f   :  { %4509 = vmatmul.mubr.msk.f32.vlgmr.msra.gmra.mrb[10].mxu1 %vm249_vm2, %v1279_v28 }
0x1980   :  { %4870 = vmatpush3.bf16.msra.mxu1 %v5819_v59  ;;  %4530 = vmatprep.mubr.msk.f32.mxu1 %vm5455_vm0, %v5454_v2 }
0x1981   :  { %4871 = vmatprep.subr.bf16.mxu1 %v5453_v1 }
0x1984   :  { %4873 = vmatpush3.bf16.msra.mxu1 %v5829_v6 }
0x1985   :  { %4880 = vmatprep.subr.bf16.mxu1 %v5453_v1 }
0x1a52   :  { %v1348_v29 = vpop.f32.mrb[10].mxu1 }
0x1a53   :  { %v1353_v30 = vrot.slane %v1348_v29, 7  ;;  %v4510_v31 = vpop.f32.mrb[11].mxu1 }
0x1a55   :  { %v1355_v32 = vadd.f32 %v1353_v30, %v5852_v11 }
0x1a57   :  { %5084 = vtanh.f32 %v1355_v32  ;;  %v1356_v34 = vmul.f32 0.5, %v1355_v32 }
0x1a59   :  { %5086 = vtanh.f32 %v1356_v34 }
0x1a61   :  { %v5085_v33 = vpop.eup %5084 }
0x1a62   :  { %1366 = vrot.lane.b32.xlu0 %v5085_v33, %s5456_s21 }
0x1a63   :  { %v5087_v35 = vpop.eup %5086 }
0x1a64   :  { %v1358_v36 = vmul.f32 0.5, %v5087_v35 }
0x1a66   :  { %v1359_v37 = vadd.f32 0.5, %v1358_v36 }
0x1a68   :  { %v1364_v41 = vmul.f32 %v1362_v40, %v1359_v37 }
0x1ad4   :  { %v1367_v38 = vpop.permute.xlu0 %1366 }
0x1ad5   :  { %v1369_v39 = vmul.f32 %v1367_v38, %v1359_v37 }
0x1ad7   :  { %1371 = vrot.lane.b32.xlu1 %v1369_v39, %s5457_s24 }
0x1b49   :  { %v1372_v42 = vpop.permute.xlu1 %1371 }
0x1b4a   :  { %v1374_v43 = vadd.f32 %v1372_v42, %v1364_v41 }
0x1b4c   :  { %5088 = vtanh.f32 %v1374_v43  ;;  %v1467_v60 = vrot.slane %v1374_v43, 7 }
0x1b56   :  { %v5089_v44 = vpop.eup %5088 }
0x1b57   :  { %1377 = vrot.lane.b32.xlu0 %v5089_v44, %s5456_s21 }
0x1bc9   :  { %v1378_v45 = vpop.permute.xlu0 %1377 }
0x1bca   :  { %v1380_v46 = vmul.f32 %v1378_v45, %v1359_v37 }
0x1bcc   :  { %v1382_v47 = vrot.slane %v1380_v46, 1  ;;  %v2011_v10 = vsel %vm1080_vm3, %v5858_v27, %v1380_v46 }
0x1bce   :  { %1383 = vrot.lane.b32.xlu1 %v1382_v47, %s5457_s24 }
0x1c40   :  { %v1384_v48 = vpop.permute.xlu1 %1383 }
0x1c41   :  { %4520 = vmatmul.mubr.msk.f32.vlgmr.msra.gmra.mrb[12].mxu0 %vm249_vm2, %v1384_v48 }
0x1c42   :  { %4876 = vmatpush3.bf16.msra.mxu0 %v5819_v59  ;;  %4541 = vmatprep.mubr.msk.f32.mxu0 %vm5455_vm0, %v5454_v2 }
0x1c43   :  { %4877 = vmatprep.subr.bf16.mxu0 %v5453_v1 }
0x1c46   :  { %4879 = vmatpush3.bf16.msra.mxu0 %v5829_v6 }
0x1c47   :  { %4886 = vmatprep.subr.bf16.mxu0 %v5453_v1 }
0x1d14   :  { %v1453_v49 = vpop.f32.mrb[12].mxu0 }
0x1d15   :  { %v1458_v50 = vrot.slane %v1453_v49, 6  ;;  %v4521_v51 = vpop.f32.mrb[13].mxu0 }
0x1d17   :  { %v1460_v52 = vadd.f32 %v1458_v50, %v5852_v11 }
0x1d19   :  { %5090 = vtanh.f32 %v1460_v52  ;;  %v1461_v53 = vmul.f32 0.5, %v1460_v52 }
0x1d1b   :  { %5092 = vtanh.f32 %v1461_v53 }
0x1d23   :  { %v5091_v14 = vpop.eup %5090 }
0x1d24   :  { %1471 = vrot.lane.b32.xlu0 %v5091_v14, %s5456_s21 }
0x1d25   :  { %v5093_v54 = vpop.eup %5092 }
0x1d26   :  { %v1463_v55 = vmul.f32 0.5, %v5093_v54 }
0x1d28   :  { %v1464_v56 = vadd.f32 0.5, %v1463_v55 }
0x1d2a   :  { %v1469_v61 = vmul.f32 %v1467_v60, %v1464_v56 }
0x1d96   :  { %v1472_v57 = vpop.permute.xlu0 %1471 }
0x1d97   :  { %v1474_v58 = vmul.f32 %v1472_v57, %v1464_v56 }
0x1d99   :  { %1476 = vrot.lane.b32.xlu1 %v1474_v58, %s5457_s24 }
0x1e0b   :  { %v1477_v62 = vpop.permute.xlu1 %1476 }
0x1e0c   :  { %v1479_v63 = vadd.f32 %v1477_v62, %v1469_v61 }
0x1e0e   :  { %5094 = vtanh.f32 %v1479_v63  ;;  %v1572_v23 = vrot.slane %v1479_v63, 7 }
0x1e18   :  { %v5095_v0 = vpop.eup %5094 }
0x1e19   :  { %1482 = vrot.lane.b32.xlu0 %v5095_v0, %s5456_s21 }
0x1e8b   :  { %v1483_v3 = vpop.permute.xlu0 %1482 }
0x1e8c   :  { %v1485_v4 = vmul.f32 %v1483_v3, %v1464_v56 }
0x1e8e   :  { %v1487_v5 = vrot.slane %v1485_v4, 2  ;;  %v2012_v7 = vsel %vm1082_vm4, %v2011_v10, %v1485_v4 }
0x1e90   :  { %1488 = vrot.lane.b32.xlu1 %v1487_v5, %s5457_s24 }
0x1f02   :  { %v1489_v8 = vpop.permute.xlu1 %1488 }
0x1f03   :  { %4531 = vmatmul.mubr.msk.f32.vlgmr.msra.gmra.mrb[12].mxu1 %vm249_vm2, %v1489_v8 }
0x1f04   :  { %4882 = vmatpush3.bf16.msra.mxu1 %v5819_v59  ;;  %4552 = vmatprep.mubr.msk.f32.mxu1 %vm5455_vm0, %v5454_v2 }
0x1f05   :  { %4883 = vmatprep.subr.bf16.mxu1 %v5453_v1 }
0x1f08   :  { %4885 = vmatpush3.bf16.msra.mxu1 %v5829_v6 }
0x1f09   :  { %4892 = vmatprep.subr.bf16.mxu1 %v5453_v1 }
0x1fd6   :  { %v1558_v9 = vpop.f32.mrb[12].mxu1 }
0x1fd7   :  { %v1563_v12 = vrot.slane %v1558_v9, 5  ;;  %v4532_v13 = vpop.f32.mrb[13].mxu1 }
0x1fd9   :  { %v1565_v15 = vadd.f32 %v1563_v12, %v5852_v11 }
0x1fdb   :  { %5096 = vtanh.f32 %v1565_v15  ;;  %v1566_v17 = vmul.f32 0.5, %v1565_v15 }
0x1fdd   :  { %5098 = vtanh.f32 %v1566_v17 }
0x1fe5   :  { %v5097_v16 = vpop.eup %5096 }
0x1fe6   :  { %1576 = vrot.lane.b32.xlu0 %v5097_v16, %s5456_s21 }
0x1fe7   :  { %v5099_v18 = vpop.eup %5098 }
0x1fe8   :  { %v1568_v19 = vmul.f32 0.5, %v5099_v18 }
0x1fea   :  { %v1569_v20 = vadd.f32 0.5, %v1568_v19 }
0x1fec   :  { %v1574_v24 = vmul.f32 %v1572_v23, %v1569_v20 }
0x2058   :  { %v1577_v21 = vpop.permute.xlu0 %1576 }
0x2059   :  { %v1579_v22 = vmul.f32 %v1577_v21, %v1569_v20 }
0x205b   :  { %1581 = vrot.lane.b32.xlu1 %v1579_v22, %s5457_s24 }
0x20cd   :  { %v1582_v25 = vpop.permute.xlu1 %1581 }
0x20ce   :  { %v1584_v26 = vadd.f32 %v1582_v25, %v1574_v24 }
0x20d0   :  { %5100 = vtanh.f32 %v1584_v26  ;;  %v1677_v44 = vrot.slane %v1584_v26, 7 }
0x20da   :  { %v5101_v27 = vpop.eup %5100 }
0x20db   :  { %1587 = vrot.lane.b32.xlu0 %v5101_v27, %s5456_s21 }
0x214d   :  { %v1588_v28 = vpop.permute.xlu0 %1587 }
0x214e   :  { %v1590_v29 = vmul.f32 %v1588_v28, %v1569_v20 }
0x2150   :  { %v1592_v30 = vrot.slane %v1590_v29, 3  ;;  %v2013_v31 = vsel %vm1084_vm5, %v2012_v7, %v1590_v29 }
0x2152   :  { %1593 = vrot.lane.b32.xlu1 %v1592_v30, %s5457_s24 }
0x21c4   :  { %v1594_v32 = vpop.permute.xlu1 %1593 }
0x21c5   :  { %4542 = vmatmul.mubr.msk.f32.vlgmr.msra.gmra.mrb[14].mxu0 %vm249_vm2, %v1594_v32 }
0x21c6   :  { %4888 = vmatpush3.bf16.msra.mxu0 %v5819_v59  ;;  %4563 = vmatprep.mubr.msk.f32.mxu0 %vm5455_vm0, %v5454_v2 }
0x21c7   :  { %4889 = vmatprep.subr.bf16.mxu0 %v5453_v1 }
0x21ca   :  { %4891 = vmatpush3.bf16.msra.mxu0 %v5829_v6 }
0x21cb   :  { %4898 = vmatprep.subr.bf16.mxu0 %v5453_v1 }
0x2298   :  { %v1663_v33 = vpop.f32.mrb[14].mxu0 }
0x2299   :  { %v1668_v34 = vrot.slane %v1663_v33, 4  ;;  %v4543_v35 = vpop.f32.mrb[15].mxu0 }
0x229b   :  { %v1670_v36 = vadd.f32 %v1668_v34, %v5852_v11 }
0x229d   :  { %5102 = vtanh.f32 %v1670_v36  ;;  %v1671_v38 = vmul.f32 0.5, %v1670_v36 }
0x229f   :  { %5104 = vtanh.f32 %v1671_v38 }
0x22a7   :  { %v5103_v37 = vpop.eup %5102 }
0x22a8   :  { %1681 = vrot.lane.b32.xlu0 %v5103_v37, %s5456_s21 }
0x22a9   :  { %v5105_v39 = vpop.eup %5104 }
0x22aa   :  { %v1673_v40 = vmul.f32 0.5, %v5105_v39 }
0x22ac   :  { %v1674_v41 = vadd.f32 0.5, %v1673_v40 }
0x22ae   :  { %v1679_v45 = vmul.f32 %v1677_v44, %v1674_v41 }
0x231a   :  { %v1682_v42 = vpop.permute.xlu0 %1681 }
0x231b   :  { %v1684_v43 = vmul.f32 %v1682_v42, %v1674_v41 }
0x231d   :  { %1686 = vrot.lane.b32.xlu1 %v1684_v43, %s5457_s24 }
0x238f   :  { %v1687_v46 = vpop.permute.xlu1 %1686 }
0x2390   :  { %v1689_v47 = vadd.f32 %v1687_v46, %v1679_v45 }
0x2392   :  { %5106 = vtanh.f32 %v1689_v47 }
0x239c   :  { %v5107_v48 = vpop.eup %5106 }
0x239d   :  { %1692 = vrot.lane.b32.xlu0 %v5107_v48, %s5456_s21 }
0x240f   :  { %v1693_v49 = vpop.permute.xlu0 %1692 }
0x2410   :  { %v1695_v50 = vmul.f32 %v1693_v49, %v1674_v41 }
0x2412   :  { %v1697_v51 = vrot.slane %v1695_v50, 4  ;;  %v2014_v52 = vsel %vm1086_vm6, %v2013_v31, %v1695_v50  ;;  %v2019_v50 = vld [vmem:[%s6251_s13 + $0x8] sm:$0xff] }
0x2414   :  { %1698 = vrot.lane.b32.xlu1 %v1697_v51, %s5457_s24  ;;  %v2020_v51 = vld [vmem:[%s6251_s13 + $0x10] sm:$0xff] }
0x2486   :  { %v1699_v14 = vpop.permute.xlu1 %1698 }
0x2487   :  { %4553 = vmatmul.mubr.msk.f32.vlgmr.msra.gmra.mrb[14].mxu1 %vm249_vm2, %v1699_v14  ;;  %v2021_v14 = vld [vmem:[%s6251_s13 + $0x18] sm:$0xff] }
0x2488   :  { %4894 = vmatpush3.bf16.msra.mxu1 %v5819_v59  ;;  %4574 = vmatprep.mubr.msk.f32.mxu1 %vm5455_vm0, %v5454_v2 }
0x2489   :  { %4895 = vmatprep.subr.bf16.mxu1 %v5453_v1 }
0x248c   :  { %4897 = vmatpush3.bf16.msra.mxu1 %v5829_v6  ;;  %v1782_v6 = vrot.slane %v1689_v47, 7 }
0x248d   :  { %4588 = vmatprep.subr.mxu1 %v5454_v2 }
0x255a   :  { %v1768_v53 = vpop.f32.mrb[14].mxu1 }
0x255b   :  { %v1773_v54 = vrot.slane %v1768_v53, 3  ;;  %v4554_v55 = vpop.f32.mrb[15].mxu1  ;;  %v4902_v53 = vpack.c.bf16 %v2021_v14, %v2020_v51 }
0x255d   :  { %v1775_v56 = vadd.f32 %v1773_v54, %v5852_v11 }
0x255f   :  { %5108 = vtanh.f32 %v1775_v56  ;;  %v1776_v58 = vmul.f32 0.5, %v1775_v56 }
0x2561   :  { %5110 = vtanh.f32 %v1776_v58 }
0x2569   :  { %v5109_v57 = vpop.eup %5108 }
0x256a   :  { %1786 = vrot.lane.b32.xlu0 %v5109_v57, %s5456_s21 }
0x256b   :  { %v5111_v59 = vpop.eup %5110 }
0x256c   :  { %v1778_v60 = vmul.f32 0.5, %v5111_v59  ;;  %v5458_v59 = vmov 0  }
0x256d   :  { %5029 = vset.pattern.permute.xlu0 %v5458_v59 }
0x256e   :  { %v1779_v61 = vadd.f32 0.5, %v1778_v60  ;;  %v2223_v60 = vld [vmem:[#allocation11] sm:$0xff] }
0x2570   :  { %v1784_v0 = vmul.f32 %v1782_v6, %v1779_v61  ;;  %v4177_v6 = vld [vmem:[#allocation2] ss:$0 sm:$0xff] }
0x25dc   :  { %v1787_v62 = vpop.permute.xlu0 %1786 }
0x25dd   :  { %v1789_v63 = vmul.f32 %v1787_v62, %v1779_v61  ;;  %v2142_v62 = vld [vmem:[#allocation9] sm:$0xff] }
0x25df   :  { %1791 = vrot.lane.b32.xlu1 %v1789_v63, %s5457_s24 }
0x2651   :  { %v1792_v3 = vpop.permute.xlu1 %1791 }
0x2652   :  { %v1794_v4 = vadd.f32 %v1792_v3, %v1784_v0 }
0x2654   :  { %5112 = vtanh.f32 %v1794_v4  ;;  %v1887_v25 = vrot.slane %v1794_v4, 7 }
0x265e   :  { %v5113_v10 = vpop.eup %5112 }
0x265f   :  { %1797 = vrot.lane.b32.xlu0 %v5113_v10, %s5456_s21 }
0x26d1   :  { %v1798_v5 = vpop.permute.xlu0 %1797 }
0x26d2   :  { %v1800_v7 = vmul.f32 %v1798_v5, %v1779_v61  ;;  %v2224_v61 = vld [vmem:[#allocation11 + $0x8] sm:$0xff] }
0x26d3   :  { %v5963_v63 = vpack.c.bf16 %v2224_v61, %v2223_v60 }
0x26d4   :  { %v1802_v8 = vrot.slane %v1800_v7, 5  ;;  %v2015_v9 = vsel %vm1088_vm7, %v2014_v52, %v1800_v7 }
0x26d6   :  { %1803 = vrot.lane.b32.xlu1 %v1802_v8, %s5457_s24 }
0x2748   :  { %v1804_v12 = vpop.permute.xlu1 %1803 }
0x2749   :  { %4564 = vmatmul.mubr.msk.f32.vlgmr.msra.gmra.mrb[16].mxu0 %vm249_vm2, %v1804_v12 }
0x274a   :  { %4585 = vmatprep.mubr.msk.f32.mxu0 %vm5455_vm0, %v5454_v2 }
0x281c   :  { %v1873_v13 = vpop.f32.mrb[16].mxu0 }
0x281d   :  { %v1878_v15 = vrot.slane %v1873_v13, 2  ;;  %v4565_v16 = vpop.f32.mrb[17].mxu0 }
0x281f   :  { %v1880_v17 = vadd.f32 %v1878_v15, %v5852_v11 }
0x2821   :  { %5114 = vtanh.f32 %v1880_v17  ;;  %v1881_v19 = vmul.f32 0.5, %v1880_v17 }
0x2823   :  { %5116 = vtanh.f32 %v1881_v19 }
0x282b   :  { %v5115_v18 = vpop.eup %5114 }
0x282c   :  { %1891 = vrot.lane.b32.xlu0 %v5115_v18, %s5456_s21 }
0x282d   :  { %v5117_v20 = vpop.eup %5116 }
0x282e   :  { %v1883_v21 = vmul.f32 0.5, %v5117_v20 }
0x2830   :  { %v1884_v22 = vadd.f32 0.5, %v1883_v21 }
0x2832   :  { %v1889_v26 = vmul.f32 %v1887_v25, %v1884_v22 }
0x289e   :  { %v1892_v23 = vpop.permute.xlu0 %1891 }
0x289f   :  { %v1894_v24 = vmul.f32 %v1892_v23, %v1884_v22 }
0x28a1   :  { %1896 = vrot.lane.b32.xlu1 %v1894_v24, %s5457_s24 }
0x2913   :  { %v1897_v27 = vpop.permute.xlu1 %1896 }
0x2914   :  { %v1899_v28 = vadd.f32 %v1897_v27, %v1889_v26 }
0x2916   :  { %5118 = vtanh.f32 %v1899_v28  ;;  %v1992_v46 = vrot.slane %v1899_v28, 7 }
0x2920   :  { %v5119_v29 = vpop.eup %5118 }
0x2921   :  { %1902 = vrot.lane.b32.xlu0 %v5119_v29, %s5456_s21 }
0x2993   :  { %v1903_v30 = vpop.permute.xlu0 %1902 }
0x2994   :  { %v1905_v31 = vmul.f32 %v1903_v30, %v1884_v22 }
0x2996   :  { %v1907_v32 = vrot.slane %v1905_v31, 6  ;;  %v2016_v33 = vsel %vm1090_vm8, %v2015_v9, %v1905_v31 }
0x2998   :  { %1908 = vrot.lane.b32.xlu1 %v1907_v32, %s5457_s24 }
0x2a0a   :  { %v1909_v34 = vpop.permute.xlu1 %1908 }
0x2a0b   :  { %4575 = vmatmul.mubr.msk.f32.vlgmr.msra.gmra.mrb[16].mxu1 %vm249_vm2, %v1909_v34 }
0x2a0c   :  { %4590 = vmatprep.mubr.msk.f32.mxu1 %vm5455_vm0, %v5454_v2  ;;  %4589 = vmatpush3.msra.mxu1 %v2142_v62 }
0x2a0d   :  { %4910 = vmatprep.subr.bf16.mxu1 %v5453_v1 }
0x2ade   :  { %v1978_v35 = vpop.f32.mrb[16].mxu1 }
0x2adf   :  { %v1983_v36 = vrot.slane %v1978_v35, 1  ;;  %v4576_v37 = vpop.f32.mrb[17].mxu1 }
0x2ae0   :  { %v2225_v37 = vld [vmem:[#allocation11 + $0x10] sm:$0xff] }
0x2ae1   :  { %v1985_v38 = vadd.f32 %v1983_v36, %v5852_v11  ;;  %v2018_v11 = vld [vmem:[%s6251_s13] sm:$0xff] }
0x2ae2   :  { %v4899_v52 = vpack.c.bf16 %v2019_v50, %v2018_v11 }
0x2ae3   :  { %5120 = vtanh.f32 %v1985_v38  ;;  %v1986_v40 = vmul.f32 0.5, %v1985_v38  ;;  %v2226_v38 = vld [vmem:[#allocation11 + $0x18] sm:$0xff] }
0x2ae4   :  { %4900 = vmatpush3.bf16.msra.mxu0 %v4899_v52 }
0x2ae5   :  { %5122 = vtanh.f32 %v1986_v40  ;;  %4901 = vmatprep.subr.bf16.mxu0 %v5453_v1  ;;  %v5971_v40 = vpack.c.bf16 %v2226_v38, %v2225_v37 }
0x2ae8   :  { %4903 = vmatpush3.bf16.msra.mxu0 %v4902_v53 }
0x2ae9   :  { %4904 = vmatprep.subr.bf16.mxu0 %v5453_v1 }
0x2aed   :  { %v5121_v39 = vpop.eup %5120 }
0x2aee   :  { %1996 = vrot.lane.b32.xlu0 %v5121_v39, %s5456_s21 }
0x2aef   :  { %v5123_v41 = vpop.eup %5122 }
0x2af0   :  { %v1988_v42 = vmul.f32 0.5, %v5123_v41 }
0x2af2   :  { %v1989_v43 = vadd.f32 0.5, %v1988_v42  ;;  %v5232_v42 = vld [vmem:[#allocation3] sm:$0xff] }
0x2af4   :  { %v1994_v47 = vmul.f32 %v1992_v46, %v1989_v43  ;;  %v4179_v46 = vld [vmem:[#allocation12] ss:$0 sm:$0xff] }
0x2b60   :  { %v1997_v44 = vpop.permute.xlu0 %1996 }
0x2b61   :  { %v1999_v45 = vmul.f32 %v1997_v44, %v1989_v43 }
0x2b63   :  { %2001 = vrot.lane.b32.xlu1 %v1999_v45, %s5457_s24 }
0x2bd5   :  { %v2002_v48 = vpop.permute.xlu1 %2001 }
0x2bd6   :  { %v2004_v49 = vadd.f32 %v2002_v48, %v1994_v47 }
0x2bd8   :  { %5124 = vtanh.f32 %v2004_v49 }
0x2be2   :  { %v5125_v54 = vpop.eup %5124 }
0x2be3   :  { %2007 = vrot.lane.b32.xlu0 %v5125_v54, %s5456_s21 }
0x2c55   :  { %v2008_v55 = vpop.permute.xlu0 %2007 }
0x2c56   :  { %v2010_v56 = vmul.f32 %v2008_v55, %v1989_v43 }
0x2c58   :  { %v2017_v57 = vsel %vm1092_vm9, %v2016_v33, %v2010_v56 }
0x2c59   :  { %2030 = vrot.lane.b32.xlu1 %v2017_v57, %s5457_s24 }
0x2ccb   :  { %v2031_v58 = vpop.permute.xlu1 %2030 }
0x2ccc   :  { %4586 = vmatmul.mubr.msk.f32.vlgmr.msra.gmra.mrb[18].mxu0 %vm249_vm2, %v2031_v58 }
0x2ccd   :  { %4601 = vmatprep.mubr.msk.f32.mxu0 %vm5455_vm0, %v5454_v2  ;;  %4906 = vmatpush3.bf16.msra.mxu0 %v5963_v63 }
0x2cce   :  { %4907 = vmatprep.subr.bf16.mxu0 %v5453_v1 }
0x2cd1   :  { %4909 = vmatpush3.bf16.msra.mxu0 %v5971_v40 }
0x2cd2   :  { %4916 = vmatprep.subr.bf16.mxu0 %v5453_v1 }
0x2cd4   :  { %4602 = vmatmul.mubr.f32.vlgmr.msra.gmra.mrb[20].mxu0 %v5454_v2 }
0x2cd5   :  { %4918 = vmatpush3.bf16.msra.mxu0 %v5963_v63  ;;  %4623 = vmatprep.mubr.msk.f32.mxu0 %vm5455_vm0, %v5454_v2 }
0x2cd6   :  { %4919 = vmatprep.subr.bf16.mxu0 %v5453_v1 }
0x2cd9   :  { %4921 = vmatpush3.bf16.msra.mxu0 %v5971_v40 }
0x2cda   :  { %4928 = vmatprep.subr.bf16.mxu0 %v5453_v1 }
0x2d9f   :  { %v2100_v0 = vpop.f32.mrb[18].mxu0 }
0x2da0   :  { %v2101_v3 = vadd.f32 %v4177_v6, %v2100_v0  ;;  %v4587_v4 = vpop.f32.mrb[19].mxu0 }
0x2da2   :  { %5126 = vtanh.f32 %v2101_v3 }
0x2da7   :  { %v2293_v44 = vpop.f32.mrb[20].mxu0 }
0x2da8   :  { %v4603_v45 = vpop.f32.mrb[21].mxu0 }
0x2dac   :  { %v5127_v10 = vpop.eup %5126 }
0x2dad   :  { %v2106_v5 = vsel %vm2105_vm10, %v5127_v10, -inf }
0x2dae   :  { %v2107_v7 = vrot.slane %v2106_v5, 4 }
0x2db0   :  { %v2108_v8 = vmax.f32 %v2106_v5, %v2107_v7 }
0x2db2   :  { %v2109_v9 = vrot.slane %v2108_v8, 2 }
0x2db4   :  { %v2110_v12 = vmax.f32 %v2108_v8, %v2109_v9 }
0x2db6   :  { %v2111_v13 = vrot.slane %v2110_v12, 1 }
0x2db8   :  { %v2112_v15 = vmax.f32 %v2110_v12, %v2111_v13 }
0x2dba   :  { %v2113_v16 = vsub.f32 %v5127_v10, %v2112_v15 }
0x2dbc   :  { %v2114_v17 = vmul.f32 1.442695, %v2113_v16 }
0x2dbe   :  { %5128 = vpow2.f32 %v2114_v17 }
0x2dc8   :  { %v5129_v18 = vpop.eup %5128 }
0x2dc9   :  { %v2116_v19 = vsel %vm2105_vm10, %v5129_v18, 0.0 }
0x2dca   :  { %v2117_v20 = vrot.slane %v2116_v19, 4 }
0x2dcc   :  { %v2118_v21 = vadd.f32 %v2117_v20, %v2116_v19 }
0x2dce   :  { %v2119_v22 = vrot.slane %v2118_v21, 2 }
0x2dd0   :  { %v2120_v23 = vadd.f32 %v2119_v22, %v2118_v21 }
0x2dd2   :  { %v2121_v24 = vrot.slane %v2120_v23, 1 }
0x2dd4   :  { %v2122_v25 = vadd.f32 %v2121_v24, %v2120_v23 }
0x2dd6   :  { %5130 = vrcp.f32 %v2122_v25 }
0x2de0   :  { %v5131_v26 = vpop.eup %5130 }
0x2de1   :  { %v2124_v27 = vmul.f32 %v5131_v26, %v5129_v18 }
0x2de3   :  { %v2125_v28 = vsel %vm2105_vm10, %v2124_v27, 0.0 }
0x2de4   :  { %v2126_v29 = vrot.slane %v2125_v28, 4 }
0x2de6   :  { %v2127_v30 = vadd.f32 %v2126_v29, %v2125_v28 }
0x2de8   :  { %v2128_v31 = vrot.slane %v2127_v30, 2 }
0x2dea   :  { %v2129_v32 = vadd.f32 %v2128_v31, %v2127_v30 }
0x2dec   :  { %v2130_v33 = vrot.slane %v2129_v32, 1 }
0x2dee   :  { %v2131_v34 = vadd.f32 %v2130_v33, %v2129_v32 }
0x2df0   :  { %v2133_v35 = vmul.f32 0.125, %v2131_v34 }
0x2df2   :  { %5132 = vrcp.f32 %v2133_v35 }
0x2dfc   :  { %v5133_v36 = vpop.eup %5132 }
0x2dfd   :  { %v2135_v39 = vmul.f32 %v5133_v36, %v2124_v27 }
0x2dff   :  { %2138 = vperm.xlu0 %5029, %v2135_v39  }
0x2e7e   :  { %v2139_v41 = vpop.permute.xlu0 %2138 }
0x2e7f   :  { %v2141_v43 = vmul.f32 %v5232_v42, %v2139_v41 }
0x2e81   :  { %4591 = vmatmul.mubr.msk.f32.vlgmr.msra.gmra.mrb[18].mxu1 %vm171_vm1, %v2141_v43 }
0x2e82   :  { %4912 = vmatpush3.bf16.msra.mxu1 %v5963_v63  ;;  %4612 = vmatprep.mubr.msk.f32.mxu1 %vm5455_vm0, %v5454_v2 }
0x2e83   :  { %4913 = vmatprep.subr.bf16.mxu1 %v5453_v1 }
0x2e86   :  { %4915 = vmatpush3.bf16.msra.mxu1 %v5971_v40 }
0x2e87   :  { %4922 = vmatprep.subr.bf16.mxu1 %v5453_v1 }
0x2f54   :  { %v2219_v47 = vpop.f32.mrb[18].mxu1 }
0x2f55   :  { %v5989_v48 = vadd.f32 %v4179_v46, %v2219_v47  ;;  %v4592_v49 = vpop.f32.mrb[19].mxu1 }
0x2f57   :  { %v2297_v11 = vadd.f32 %v2293_v44, %v5989_v48 }
0x2f59   :  { %5134 = vtanh.f32 %v2297_v11  ;;  %v2298_v51 = vmul.f32 0.5, %v2297_v11 }
0x2f5b   :  { %5136 = vtanh.f32 %v2298_v51 }
0x2f63   :  { %v5135_v50 = vpop.eup %5134 }
0x2f64   :  { %2305 = vrot.lane.b32.xlu1 %v5135_v50, %s5456_s21 }
0x2f65   :  { %v5137_v52 = vpop.eup %5136 }
0x2f66   :  { %v2300_v14 = vmul.f32 0.5, %v5137_v52 }
0x2f68   :  { %v2301_v53 = vadd.f32 0.5, %v2300_v14 }
0x2f6a   :  { %v2303_v56 = vmul.f32 0.0, %v2301_v53 }
0x2fd6   :  { %v2306_v54 = vpop.permute.xlu1 %2305 }
0x2fd7   :  { %v2308_v55 = vmul.f32 %v2306_v54, %v2301_v53 }
0x2fd9   :  { %2310 = vrot.lane.b32.xlu1 %v2308_v55, %s5457_s24 }
0x304b   :  { %v2311_v57 = vpop.permute.xlu1 %2310 }
0x304c   :  { %v2313_v58 = vadd.f32 %v2311_v57, %v2303_v56 }
0x304e   :  { %5138 = vtanh.f32 %v2313_v58  ;;  %v2405_v15 = vrot.slane %v2313_v58, 7 }
0x3058   :  { %v5139_v59 = vpop.eup %5138 }
0x3059   :  { %2316 = vrot.lane.b32.xlu0 %v5139_v59, %s5456_s21 }
0x30cb   :  { %v2317_v60 = vpop.permute.xlu0 %2316 }
0x30cc   :  { %v5995_v61 = vmul.f32 %v2317_v60, %v2301_v53 }
0x30ce   :  { %2321 = vrot.lane.b32.xlu1 %v5995_v61, %s5457_s24 }
0x3140   :  { %v2322_v62 = vpop.permute.xlu1 %2321 }
0x3141   :  { %4613 = vmatmul.mubr.msk.f32.vlgmr.msra.gmra.mrb[20].mxu1 %vm249_vm2, %v2322_v62 }
0x3142   :  { %4924 = vmatpush3.bf16.msra.mxu1 %v5963_v63  ;;  %4634 = vmatprep.mubr.msk.f32.mxu1 %vm5455_vm0, %v5454_v2 }
0x3143   :  { %4925 = vmatprep.subr.bf16.mxu1 %v5453_v1 }
0x3146   :  { %4927 = vmatpush3.bf16.msra.mxu1 %v5971_v40 }
0x3147   :  { %4934 = vmatprep.subr.bf16.mxu1 %v5453_v1 }
0x3214   :  { %v2391_v6 = vpop.f32.mrb[20].mxu1 }
0x3215   :  { %v2396_v0 = vrot.slane %v2391_v6, 7  ;;  %v4614_v3 = vpop.f32.mrb[21].mxu1 }
0x3217   :  { %v2398_v4 = vadd.f32 %v2396_v0, %v5989_v48 }
0x3219   :  { %5140 = vtanh.f32 %v2398_v4  ;;  %v2399_v5 = vmul.f32 0.5, %v2398_v4 }
0x321b   :  { %5142 = vtanh.f32 %v2399_v5 }
0x3223   :  { %v5141_v10 = vpop.eup %5140 }
0x3224   :  { %2409 = vrot.lane.b32.xlu0 %v5141_v10, %s5456_s21 }
0x3225   :  { %v5143_v7 = vpop.eup %5142 }
0x3226   :  { %v2401_v8 = vmul.f32 0.5, %v5143_v7 }
0x3228   :  { %v2402_v9 = vadd.f32 0.5, %v2401_v8 }
0x322a   :  { %v2407_v16 = vmul.f32 %v2405_v15, %v2402_v9 }
0x3296   :  { %v2410_v12 = vpop.permute.xlu0 %2409 }
0x3297   :  { %v2412_v13 = vmul.f32 %v2410_v12, %v2402_v9 }
0x3299   :  { %2414 = vrot.lane.b32.xlu1 %v2412_v13, %s5457_s24 }
0x330b   :  { %v2415_v17 = vpop.permute.xlu1 %2414 }
0x330c   :  { %v2417_v18 = vadd.f32 %v2415_v17, %v2407_v16 }
0x330e   :  { %5144 = vtanh.f32 %v2417_v18  ;;  %v2510_v35 = vrot.slane %v2417_v18, 7 }
0x3318   :  { %v5145_v19 = vpop.eup %5144 }
0x3319   :  { %2420 = vrot.lane.b32.xlu0 %v5145_v19, %s5456_s21 }
0x338b   :  { %v2421_v20 = vpop.permute.xlu0 %2420 }
0x338c   :  { %v2423_v21 = vmul.f32 %v2421_v20, %v2402_v9 }
0x338e   :  { %v2425_v22 = vrot.slane %v2423_v21, 1  ;;  %v3054_v43 = vsel %vm1080_vm3, %v5995_v61, %v2423_v21 }
0x3390   :  { %2426 = vrot.lane.b32.xlu1 %v2425_v22, %s5457_s24 }
0x3402   :  { %v2427_v23 = vpop.permute.xlu1 %2426 }
0x3403   :  { %4624 = vmatmul.mubr.msk.f32.vlgmr.msra.gmra.mrb[22].mxu0 %vm249_vm2, %v2427_v23 }
0x3404   :  { %4930 = vmatpush3.bf16.msra.mxu0 %v5963_v63  ;;  %4645 = vmatprep.mubr.msk.f32.mxu0 %vm5455_vm0, %v5454_v2 }
0x3405   :  { %4931 = vmatprep.subr.bf16.mxu0 %v5453_v1 }
0x3408   :  { %4933 = vmatpush3.bf16.msra.mxu0 %v5971_v40 }
0x3409   :  { %4940 = vmatprep.subr.bf16.mxu0 %v5453_v1 }
0x34d6   :  { %v2496_v24 = vpop.f32.mrb[22].mxu0 }
0x34d7   :  { %v2501_v25 = vrot.slane %v2496_v24, 6  ;;  %v4625_v26 = vpop.f32.mrb[23].mxu0 }
0x34d9   :  { %v2503_v27 = vadd.f32 %v2501_v25, %v5989_v48 }
0x34db   :  { %5146 = vtanh.f32 %v2503_v27  ;;  %v2504_v29 = vmul.f32 0.5, %v2503_v27 }
0x34dd   :  { %5148 = vtanh.f32 %v2504_v29 }
0x34e5   :  { %v5147_v28 = vpop.eup %5146 }
0x34e6   :  { %2514 = vrot.lane.b32.xlu0 %v5147_v28, %s5456_s21 }
0x34e7   :  { %v5149_v30 = vpop.eup %5148 }
0x34e8   :  { %v2506_v31 = vmul.f32 0.5, %v5149_v30 }
0x34ea   :  { %v2507_v32 = vadd.f32 0.5, %v2506_v31 }
0x34ec   :  { %v2512_v36 = vmul.f32 %v2510_v35, %v2507_v32 }
0x3558   :  { %v2515_v33 = vpop.permute.xlu0 %2514 }
0x3559   :  { %v2517_v34 = vmul.f32 %v2515_v33, %v2507_v32 }
0x355b   :  { %2519 = vrot.lane.b32.xlu1 %v2517_v34, %s5457_s24 }
0x35cd   :  { %v2520_v37 = vpop.permute.xlu1 %2519 }
0x35ce   :  { %v2522_v38 = vadd.f32 %v2520_v37, %v2512_v36 }
0x35d0   :  { %5150 = vtanh.f32 %v2522_v38  ;;  %v2615_v57 = vrot.slane %v2522_v38, 7 }
0x35da   :  { %v5151_v39 = vpop.eup %5150 }
0x35db   :  { %2525 = vrot.lane.b32.xlu0 %v5151_v39, %s5456_s21 }
0x364d   :  { %v2526_v41 = vpop.permute.xlu0 %2525 }
0x364e   :  { %v2528_v42 = vmul.f32 %v2526_v41, %v2507_v32 }
0x3650   :  { %v2530_v44 = vrot.slane %v2528_v42, 2  ;;  %v3055_v45 = vsel %vm1082_vm4, %v3054_v43, %v2528_v42 }
0x3652   :  { %2531 = vrot.lane.b32.xlu1 %v2530_v44, %s5457_s24 }
0x36c4   :  { %v2532_v46 = vpop.permute.xlu1 %2531 }
0x36c5   :  { %4635 = vmatmul.mubr.msk.f32.vlgmr.msra.gmra.mrb[22].mxu1 %vm249_vm2, %v2532_v46 }
0x36c6   :  { %4936 = vmatpush3.bf16.msra.mxu1 %v5963_v63  ;;  %4656 = vmatprep.mubr.msk.f32.mxu1 %vm5455_vm0, %v5454_v2 }
0x36c7   :  { %4937 = vmatprep.subr.bf16.mxu1 %v5453_v1 }
0x36ca   :  { %4939 = vmatpush3.bf16.msra.mxu1 %v5971_v40 }
0x36cb   :  { %4946 = vmatprep.subr.bf16.mxu1 %v5453_v1 }
0x3798   :  { %v2601_v47 = vpop.f32.mrb[22].mxu1 }
0x3799   :  { %v2606_v49 = vrot.slane %v2601_v47, 5  ;;  %v4636_v11 = vpop.f32.mrb[23].mxu1 }
0x379b   :  { %v2608_v50 = vadd.f32 %v2606_v49, %v5989_v48 }
0x379d   :  { %5152 = vtanh.f32 %v2608_v50  ;;  %v2609_v52 = vmul.f32 0.5, %v2608_v50 }
0x379f   :  { %5154 = vtanh.f32 %v2609_v52 }
0x37a7   :  { %v5153_v51 = vpop.eup %5152 }
0x37a8   :  { %2619 = vrot.lane.b32.xlu0 %v5153_v51, %s5456_s21 }
0x37a9   :  { %v5155_v14 = vpop.eup %5154 }
0x37aa   :  { %v2611_v53 = vmul.f32 0.5, %v5155_v14 }
0x37ac   :  { %v2612_v54 = vadd.f32 0.5, %v2611_v53 }
0x37ae   :  { %v2617_v58 = vmul.f32 %v2615_v57, %v2612_v54 }
0x381a   :  { %v2620_v55 = vpop.permute.xlu0 %2619 }
0x381b   :  { %v2622_v56 = vmul.f32 %v2620_v55, %v2612_v54 }
0x381d   :  { %2624 = vrot.lane.b32.xlu1 %v2622_v56, %s5457_s24 }
0x388f   :  { %v2625_v59 = vpop.permute.xlu1 %2624 }
0x3890   :  { %v2627_v60 = vadd.f32 %v2625_v59, %v2617_v58 }
0x3892   :  { %5156 = vtanh.f32 %v2627_v60  ;;  %v2720_v19 = vrot.slane %v2627_v60, 7 }
0x389c   :  { %v5157_v61 = vpop.eup %5156 }
0x389d   :  { %2630 = vrot.lane.b32.xlu0 %v5157_v61, %s5456_s21 }
0x390f   :  { %v2631_v62 = vpop.permute.xlu0 %2630 }
0x3910   :  { %v2633_v6 = vmul.f32 %v2631_v62, %v2612_v54 }
0x3912   :  { %v2635_v0 = vrot.slane %v2633_v6, 3  ;;  %v3056_v3 = vsel %vm1084_vm5, %v3055_v45, %v2633_v6 }
0x3914   :  { %2636 = vrot.lane.b32.xlu1 %v2635_v0, %s5457_s24 }
0x3986   :  { %v2637_v4 = vpop.permute.xlu1 %2636 }
0x3987   :  { %4646 = vmatmul.mubr.msk.f32.vlgmr.msra.gmra.mrb[24].mxu0 %vm249_vm2, %v2637_v4 }
0x3988   :  { %4942 = vmatpush3.bf16.msra.mxu0 %v5963_v63  ;;  %4667 = vmatprep.mubr.msk.f32.mxu0 %vm5455_vm0, %v5454_v2 }
0x3989   :  { %4943 = vmatprep.subr.bf16.mxu0 %v5453_v1 }
0x398c   :  { %4945 = vmatpush3.bf16.msra.mxu0 %v5971_v40 }
0x398d   :  { %4952 = vmatprep.subr.bf16.mxu0 %v5453_v1 }
0x3a5a   :  { %v2706_v10 = vpop.f32.mrb[24].mxu0 }
0x3a5b   :  { %v2711_v5 = vrot.slane %v2706_v10, 4  ;;  %v4647_v7 = vpop.f32.mrb[25].mxu0 }
0x3a5d   :  { %v2713_v8 = vadd.f32 %v2711_v5, %v5989_v48 }
0x3a5f   :  { %5158 = vtanh.f32 %v2713_v8  ;;  %v2714_v12 = vmul.f32 0.5, %v2713_v8 }
0x3a61   :  { %5160 = vtanh.f32 %v2714_v12 }
0x3a69   :  { %v5159_v9 = vpop.eup %5158 }
0x3a6a   :  { %2724 = vrot.lane.b32.xlu0 %v5159_v9, %s5456_s21 }
0x3a6b   :  { %v5161_v13 = vpop.eup %5160 }
0x3a6c   :  { %v2716_v15 = vmul.f32 0.5, %v5161_v13 }
0x3a6e   :  { %v2717_v16 = vadd.f32 0.5, %v2716_v15 }
0x3a70   :  { %v2722_v20 = vmul.f32 %v2720_v19, %v2717_v16 }
0x3adc   :  { %v2725_v17 = vpop.permute.xlu0 %2724 }
0x3add   :  { %v2727_v18 = vmul.f32 %v2725_v17, %v2717_v16 }
0x3adf   :  { %2729 = vrot.lane.b32.xlu1 %v2727_v18, %s5457_s24 }
0x3b51   :  { %v2730_v21 = vpop.permute.xlu1 %2729 }
0x3b52   :  { %v2732_v22 = vadd.f32 %v2730_v21, %v2722_v20 }
0x3b54   :  { %5162 = vtanh.f32 %v2732_v22 }
0x3b5e   :  { %v5163_v23 = vpop.eup %5162 }
0x3b5f   :  { %2735 = vrot.lane.b32.xlu0 %v5163_v23, %s5456_s21 }
0x3bd1   :  { %v2736_v24 = vpop.permute.xlu0 %2735 }
0x3bd2   :  { %v2738_v25 = vmul.f32 %v2736_v24, %v2717_v16 }
0x3bd4   :  { %v2740_v26 = vrot.slane %v2738_v25, 4  ;;  %v3057_v27 = vsel %vm1086_vm6, %v3056_v3, %v2738_v25  ;;  %v3061_v25 = vld [vmem:[#allocation14] sm:$0xff] }
0x3bd6   :  { %2741 = vrot.lane.b32.xlu1 %v2740_v26, %s5457_s24  ;;  %v3147_v26 = vld [vmem:[%s6249_s11] sm:$0xff] }
0x3c48   :  { %v2742_v28 = vpop.permute.xlu1 %2741 }
0x3c49   :  { %4657 = vmatmul.mubr.msk.f32.vlgmr.msra.gmra.mrb[24].mxu1 %vm249_vm2, %v2742_v28  ;;  %v3148_v28 = vld [vmem:[%s6249_s11 + $0x8] sm:$0xff] }
0x3c4a   :  { %4948 = vmatpush3.bf16.msra.mxu1 %v5963_v63  ;;  %4678 = vmatprep.mubr.msk.f32.mxu1 %vm5455_vm0, %v5454_v2 }
0x3c4b   :  { %4949 = vmatprep.subr.bf16.mxu1 %v5453_v1 }
0x3c4e   :  { %4951 = vmatpush3.bf16.msra.mxu1 %v5971_v40  ;;  %v2825_v40 = vrot.slane %v2732_v22, 7 }
0x3c4f   :  { %4958 = vmatprep.subr.bf16.mxu1 %v5453_v1 }
0x3d1c   :  { %v2811_v29 = vpop.f32.mrb[24].mxu1 }
0x3d1d   :  { %v2816_v30 = vrot.slane %v2811_v29, 3  ;;  %v4658_v31 = vpop.f32.mrb[25].mxu1  ;;  %v3063_v29 = vld [vmem:[#allocation14 + $0x10] sm:$0xff] }
0x3d1e   :  { %v6086_v31 = vpack.c.bf16 %v3148_v28, %v3147_v26 }
0x3d1f   :  { %v2818_v32 = vadd.f32 %v2816_v30, %v5989_v48  ;;  %v3064_v30 = vld [vmem:[#allocation14 + $0x18] sm:$0xff] }
0x3d21   :  { %5164 = vtanh.f32 %v2818_v32  ;;  %v2819_v34 = vmul.f32 0.5, %v2818_v32  ;;  %v3149_v32 = vld [vmem:[%s6249_s11 + $0x10] sm:$0xff] }
0x3d23   :  { %5166 = vtanh.f32 %v2819_v34  ;;  %v4956_v34 = vpack.c.bf16 %v3064_v30, %v3063_v29 }
0x3d2b   :  { %v5165_v33 = vpop.eup %5164 }
0x3d2c   :  { %2829 = vrot.lane.b32.xlu0 %v5165_v33, %s5456_s21  ;;  %v3150_v33 = vld [vmem:[%s6249_s11 + $0x18] sm:$0xff] }
0x3d2d   :  { %v5167_v63 = vpop.eup %5166 }
0x3d2e   :  { %v2821_v35 = vmul.f32 0.5, %v5167_v63  ;;  %v6096_v63 = vpack.c.bf16 %v3150_v33, %v3149_v32 }
0x3d30   :  { %v2822_v36 = vadd.f32 0.5, %v2821_v35 }
0x3d32   :  { %v2827_v39 = vmul.f32 %v2825_v40, %v2822_v36 }
0x3d9e   :  { %v2830_v37 = vpop.permute.xlu0 %2829 }
0x3d9f   :  { %v2832_v38 = vmul.f32 %v2830_v37, %v2822_v36 }
0x3da1   :  { %2834 = vrot.lane.b32.xlu1 %v2832_v38, %s5457_s24 }
0x3e13   :  { %v2835_v41 = vpop.permute.xlu1 %2834 }
0x3e14   :  { %v2837_v42 = vadd.f32 %v2835_v41, %v2827_v39 }
0x3e16   :  { %5168 = vtanh.f32 %v2837_v42  ;;  %v2930_v59 = vrot.slane %v2837_v42, 7  ;;  %v4188_v42 = vld [vmem:[#allocation15] ss:$0 sm:$0xff] }
0x3e20   :  { %v5169_v43 = vpop.eup %5168 }
0x3e21   :  { %2840 = vrot.lane.b32.xlu0 %v5169_v43, %s5456_s21 }
0x3e93   :  { %v2841_v44 = vpop.permute.xlu0 %2840 }
0x3e94   :  { %v2843_v45 = vmul.f32 %v2841_v44, %v2822_v36 }
0x3e96   :  { %v2845_v46 = vrot.slane %v2843_v45, 5  ;;  %v3058_v47 = vsel %vm1088_vm7, %v3057_v27, %v2843_v45 }
0x3e98   :  { %2846 = vrot.lane.b32.xlu1 %v2845_v46, %s5457_s24 }
0x3f0a   :  { %v2847_v49 = vpop.permute.xlu1 %2846 }
0x3f0b   :  { %4668 = vmatmul.mubr.msk.f32.vlgmr.msra.gmra.mrb[26].mxu0 %vm249_vm2, %v2847_v49 }
0x3f0c   :  { %4689 = vmatprep.mubr.msk.f32.mxu0 %vm5455_vm0, %v5454_v2 }
0x3fde   :  { %v2916_v11 = vpop.f32.mrb[26].mxu0 }
0x3fdf   :  { %v2921_v50 = vrot.slane %v2916_v11, 2  ;;  %v4669_v51 = vpop.f32.mrb[27].mxu0 }
0x3fe1   :  { %v2923_v52 = vadd.f32 %v2921_v50, %v5989_v48 }
0x3fe3   :  { %5170 = vtanh.f32 %v2923_v52  ;;  %v2924_v53 = vmul.f32 0.5, %v2923_v52 }
0x3fe5   :  { %5172 = vtanh.f32 %v2924_v53 }
0x3fed   :  { %v5171_v14 = vpop.eup %5170 }
0x3fee   :  { %2934 = vrot.lane.b32.xlu0 %v5171_v14, %s5456_s21 }
0x3fef   :  { %v5173_v54 = vpop.eup %5172 }
0x3ff0   :  { %v2926_v55 = vmul.f32 0.5, %v5173_v54 }
0x3ff2   :  { %v2927_v56 = vadd.f32 0.5, %v2926_v55 }
0x3ff4   :  { %v2932_v60 = vmul.f32 %v2930_v59, %v2927_v56 }
0x4060   :  { %v2935_v57 = vpop.permute.xlu0 %2934 }
0x4061   :  { %v2937_v58 = vmul.f32 %v2935_v57, %v2927_v56 }
0x4063   :  { %2939 = vrot.lane.b32.xlu1 %v2937_v58, %s5457_s24 }
0x40d5   :  { %v2940_v61 = vpop.permute.xlu1 %2939 }
0x40d6   :  { %v2942_v62 = vadd.f32 %v2940_v61, %v2932_v60 }
0x40d8   :  { %5174 = vtanh.f32 %v2942_v62  ;;  %v3035_v21 = vrot.slane %v2942_v62, 7 }
0x40e2   :  { %v5175_v6 = vpop.eup %5174 }
0x40e3   :  { %2945 = vrot.lane.b32.xlu0 %v5175_v6, %s5456_s21 }
0x4155   :  { %v2946_v0 = vpop.permute.xlu0 %2945 }
0x4156   :  { %v2948_v3 = vmul.f32 %v2946_v0, %v2927_v56 }
0x4158   :  { %v2950_v4 = vrot.slane %v2948_v3, 6  ;;  %v3059_v10 = vsel %vm1090_vm8, %v3058_v47, %v2948_v3 }
0x415a   :  { %2951 = vrot.lane.b32.xlu1 %v2950_v4, %s5457_s24 }
0x41cc   :  { %v2952_v5 = vpop.permute.xlu1 %2951 }
0x41cd   :  { %4679 = vmatmul.mubr.msk.f32.vlgmr.msra.gmra.mrb[26].mxu1 %vm249_vm2, %v2952_v5 }
0x41ce   :  { %4700 = vmatprep.mubr.msk.f32.mxu1 %vm5455_vm0, %v5454_v2  ;;  %4960 = vmatpush3.bf16.msra.mxu1 %v6086_v31 }
0x41cf   :  { %4961 = vmatprep.subr.bf16.mxu1 %v5453_v1 }
0x41d2   :  { %4963 = vmatpush3.bf16.msra.mxu1 %v6096_v63 }
0x41d3   :  { %4970 = vmatprep.subr.bf16.mxu1 %v5453_v1 }
0x41d5   :  { %4701 = vmatmul.mubr.f32.vlgmr.msra.gmra.mrb[28].mxu1 %v5454_v2 }
0x41d6   :  { %4972 = vmatpush3.bf16.msra.mxu1 %v6086_v31  ;;  %4722 = vmatprep.mubr.msk.f32.mxu1 %vm5455_vm0, %v5454_v2 }
0x41d7   :  { %4973 = vmatprep.subr.bf16.mxu1 %v5453_v1 }
0x41da   :  { %4975 = vmatpush3.bf16.msra.mxu1 %v6096_v63 }
0x41db   :  { %4982 = vmatprep.subr.bf16.mxu1 %v5453_v1 }
0x42a0   :  { %v3021_v7 = vpop.f32.mrb[26].mxu1 }
0x42a1   :  { %v3026_v8 = vrot.slane %v3021_v7, 1  ;;  %v4680_v9 = vpop.f32.mrb[27].mxu1 }
0x42a3   :  { %v3028_v12 = vadd.f32 %v3026_v8, %v5989_v48  ;;  %v3062_v48 = vld [vmem:[#allocation14 + $0x8] sm:$0xff] }
0x42a4   :  { %v4953_v27 = vpack.c.bf16 %v3062_v48, %v3061_v25 }
0x42a5   :  { %5176 = vtanh.f32 %v3028_v12  ;;  %v3029_v15 = vmul.f32 0.5, %v3028_v12 }
0x42a6   :  { %4954 = vmatpush3.bf16.msra.mxu0 %v4953_v27 }
0x42a7   :  { %5178 = vtanh.f32 %v3029_v15  ;;  %4955 = vmatprep.subr.bf16.mxu0 %v5453_v1 }
0x42a8   :  { %v3217_v39 = vpop.f32.mrb[28].mxu1 }
0x42a9   :  { %v4702_v41 = vpop.f32.mrb[29].mxu1 }
0x42aa   :  { %4957 = vmatpush3.bf16.msra.mxu0 %v4956_v34 }
0x42ab   :  { %4964 = vmatprep.subr.bf16.mxu0 %v5453_v1 }
0x42af   :  { %v5177_v13 = vpop.eup %5176 }
0x42b0   :  { %3039 = vrot.lane.b32.xlu0 %v5177_v13, %s5456_s21 }
0x42b1   :  { %v5179_v16 = vpop.eup %5178 }
0x42b2   :  { %v3031_v17 = vmul.f32 0.5, %v5179_v16 }
0x42b4   :  { %v3032_v18 = vadd.f32 0.5, %v3031_v17 }
0x42b6   :  { %v3037_v22 = vmul.f32 %v3035_v21, %v3032_v18 }
0x4322   :  { %v3040_v19 = vpop.permute.xlu0 %3039 }
0x4323   :  { %v3042_v20 = vmul.f32 %v3040_v19, %v3032_v18 }
0x4325   :  { %3044 = vrot.lane.b32.xlu1 %v3042_v20, %s5457_s24 }
0x4397   :  { %v3045_v23 = vpop.permute.xlu1 %3044 }
0x4398   :  { %v3047_v24 = vadd.f32 %v3045_v23, %v3037_v22 }
0x439a   :  { %5180 = vtanh.f32 %v3047_v24 }
0x43a4   :  { %v5181_v35 = vpop.eup %5180 }
0x43a5   :  { %3050 = vrot.lane.b32.xlu0 %v5181_v35, %s5456_s21 }
0x4417   :  { %v3051_v36 = vpop.permute.xlu0 %3050 }
0x4418   :  { %v3053_v37 = vmul.f32 %v3051_v36, %v3032_v18 }
0x441a   :  { %v3060_v38 = vsel %vm1092_vm9, %v3059_v10, %v3053_v37 }
0x441b   :  { %3073 = vrot.lane.b32.xlu1 %v3060_v38, %s5457_s24 }
0x448d   :  { %v3074_v40 = vpop.permute.xlu1 %3073 }
0x448e   :  { %4690 = vmatmul.mubr.msk.f32.vlgmr.msra.gmra.mrb[28].mxu0 %vm249_vm2, %v3074_v40 }
0x448f   :  { %4966 = vmatpush3.bf16.msra.mxu0 %v6086_v31  ;;  %4711 = vmatprep.mubr.msk.f32.mxu0 %vm5455_vm0, %v5454_v2 }
0x4490   :  { %4967 = vmatprep.subr.bf16.mxu0 %v5453_v1 }
0x4493   :  { %4969 = vmatpush3.bf16.msra.mxu0 %v6096_v63 }
0x4494   :  { %4976 = vmatprep.subr.bf16.mxu0 %v5453_v1 }
0x4561   :  { %v3143_v43 = vpop.f32.mrb[28].mxu0 }
0x4562   :  { %v6119_v44 = vadd.f32 %v4188_v42, %v3143_v43  ;;  %v4691_v45 = vpop.f32.mrb[29].mxu0 }
0x4564   :  { %v3221_v46 = vadd.f32 %v3217_v39, %v6119_v44 }
0x4566   :  { %5182 = vtanh.f32 %v3221_v46  ;;  %v3222_v49 = vmul.f32 0.5, %v3221_v46 }
0x4568   :  { %5184 = vtanh.f32 %v3222_v49 }
0x4570   :  { %v5183_v47 = vpop.eup %5182 }
0x4571   :  { %3229 = vrot.lane.b32.xlu0 %v5183_v47, %s5456_s21 }
0x4572   :  { %v5185_v11 = vpop.eup %5184 }
0x4573   :  { %v3224_v50 = vmul.f32 0.5, %v5185_v11 }
0x4575   :  { %v3225_v51 = vadd.f32 0.5, %v3224_v50 }
0x4577   :  { %v3227_v53 = vmul.f32 0.0, %v3225_v51 }
0x45e3   :  { %v3230_v52 = vpop.permute.xlu0 %3229 }
0x45e4   :  { %v3232_v14 = vmul.f32 %v3230_v52, %v3225_v51 }
0x45e6   :  { %3234 = vrot.lane.b32.xlu1 %v3232_v14, %s5457_s24 }
0x4658   :  { %v3235_v54 = vpop.permute.xlu1 %3234 }
0x4659   :  { %v3237_v55 = vadd.f32 %v3235_v54, %v3227_v53 }
0x465b   :  { %5186 = vtanh.f32 %v3237_v55  ;;  %v3329_v9 = vrot.slane %v3237_v55, 7 }
0x4665   :  { %v5187_v56 = vpop.eup %5186 }
0x4666   :  { %3240 = vrot.lane.b32.xlu0 %v5187_v56, %s5456_s21 }
0x46d8   :  { %v3241_v57 = vpop.permute.xlu0 %3240 }
0x46d9   :  { %v3243_v58 = vmul.f32 %v3241_v57, %v3225_v51 }
0x46db   :  { %3245 = vrot.lane.b32.xlu1 %v3243_v58, %s5457_s24 }
0x474d   :  { %v3246_v59 = vpop.permute.xlu1 %3245 }
0x474e   :  { %4712 = vmatmul.mubr.msk.f32.vlgmr.msra.gmra.mrb[30].mxu0 %vm249_vm2, %v3246_v59 }
0x474f   :  { %4978 = vmatpush3.bf16.msra.mxu0 %v6086_v31  ;;  %4733 = vmatprep.mubr.msk.f32.mxu0 %vm5455_vm0, %v5454_v2 }
0x4750   :  { %4979 = vmatprep.subr.bf16.mxu0 %v5453_v1 }
0x4753   :  { %4981 = vmatpush3.bf16.msra.mxu0 %v6096_v63 }
0x4754   :  { %4988 = vmatprep.subr.bf16.mxu0 %v5453_v1 }
0x4821   :  { %v3315_v60 = vpop.f32.mrb[30].mxu0 }
0x4822   :  { %v3320_v61 = vrot.slane %v3315_v60, 7  ;;  %v4713_v62 = vpop.f32.mrb[31].mxu0 }
0x4824   :  { %v3322_v6 = vadd.f32 %v3320_v61, %v6119_v44 }
0x4826   :  { %5188 = vtanh.f32 %v3322_v6  ;;  %v3323_v3 = vmul.f32 0.5, %v3322_v6 }
0x4828   :  { %5190 = vtanh.f32 %v3323_v3 }
0x4830   :  { %v5189_v0 = vpop.eup %5188 }
0x4831   :  { %3333 = vrot.lane.b32.xlu0 %v5189_v0, %s5456_s21 }
0x4832   :  { %v5191_v4 = vpop.eup %5190 }
0x4833   :  { %v3325_v10 = vmul.f32 0.5, %v5191_v4 }
0x4835   :  { %v3326_v5 = vadd.f32 0.5, %v3325_v10 }
0x4837   :  { %v3331_v12 = vmul.f32 %v3329_v9, %v3326_v5 }
0x48a3   :  { %v3334_v7 = vpop.permute.xlu0 %3333 }
0x48a4   :  { %v3336_v8 = vmul.f32 %v3334_v7, %v3326_v5 }
0x48a6   :  { %3338 = vrot.lane.b32.xlu1 %v3336_v8, %s5457_s24 }
0x4918   :  { %v3339_v13 = vpop.permute.xlu1 %3338 }
0x4919   :  { %v3341_v15 = vadd.f32 %v3339_v13, %v3331_v12 }
0x491b   :  { %5192 = vtanh.f32 %v3341_v15  ;;  %v3434_v32 = vrot.slane %v3341_v15, 7 }
0x4925   :  { %v5193_v16 = vpop.eup %5192 }
0x4926   :  { %3344 = vrot.lane.b32.xlu0 %v5193_v16, %s5456_s21 }
0x4998   :  { %v3345_v17 = vpop.permute.xlu0 %3344 }
0x4999   :  { %v3347_v18 = vmul.f32 %v3345_v17, %v3326_v5 }
0x499b   :  { %v3349_v19 = vrot.slane %v3347_v18, 1 }
0x499d   :  { %3350 = vrot.lane.b32.xlu1 %v3349_v19, %s5457_s24 }
0x4a0f   :  { %v3351_v20 = vpop.permute.xlu1 %3350 }
0x4a10   :  { %4723 = vmatmul.mubr.msk.f32.vlgmr.msra.gmra.mrb[30].mxu1 %vm249_vm2, %v3351_v20 }
0x4a11   :  { %4984 = vmatpush3.bf16.msra.mxu1 %v6086_v31  ;;  %4744 = vmatprep.mubr.msk.f32.mxu1 %vm5455_vm0, %v5454_v2 }
0x4a12   :  { %4985 = vmatprep.subr.bf16.mxu1 %v5453_v1 }
0x4a15   :  { %4987 = vmatpush3.bf16.msra.mxu1 %v6096_v63 }
0x4a16   :  { %4994 = vmatprep.subr.bf16.mxu1 %v5453_v1 }
0x4ae3   :  { %v3420_v21 = vpop.f32.mrb[30].mxu1 }
0x4ae4   :  { %v3425_v22 = vrot.slane %v3420_v21, 6  ;;  %v4724_v23 = vpop.f32.mrb[31].mxu1 }
0x4ae6   :  { %v3427_v24 = vadd.f32 %v3425_v22, %v6119_v44 }
0x4ae8   :  { %5194 = vtanh.f32 %v3427_v24  ;;  %v3428_v48 = vmul.f32 0.5, %v3427_v24 }
0x4aea   :  { %5196 = vtanh.f32 %v3428_v48 }
0x4af2   :  { %v5195_v25 = vpop.eup %5194 }
0x4af3   :  { %3438 = vrot.lane.b32.xlu0 %v5195_v25, %s5456_s21 }
0x4af4   :  { %v5197_v26 = vpop.eup %5196 }
0x4af5   :  { %v3430_v27 = vmul.f32 0.5, %v5197_v26 }
0x4af7   :  { %v3431_v28 = vadd.f32 0.5, %v3430_v27 }
0x4af9   :  { %v3436_v33 = vmul.f32 %v3434_v32, %v3431_v28 }
0x4b65   :  { %v3439_v29 = vpop.permute.xlu0 %3438 }
0x4b66   :  { %v3441_v30 = vmul.f32 %v3439_v29, %v3431_v28 }
0x4b68   :  { %3443 = vrot.lane.b32.xlu1 %v3441_v30, %s5457_s24 }
0x4bda   :  { %v3444_v34 = vpop.permute.xlu1 %3443 }
0x4bdb   :  { %v3446_v35 = vadd.f32 %v3444_v34, %v3436_v33 }
0x4bdd   :  { %5198 = vtanh.f32 %v3446_v35  ;;  %v3539_v14 = vrot.slane %v3446_v35, 7 }
0x4be7   :  { %v5199_v36 = vpop.eup %5198 }
0x4be8   :  { %3449 = vrot.lane.b32.xlu0 %v5199_v36, %s5456_s21 }
0x4c5a   :  { %v3450_v37 = vpop.permute.xlu0 %3449 }
0x4c5b   :  { %v3452_v38 = vmul.f32 %v3450_v37, %v3431_v28 }
0x4c5d   :  { %v3454_v40 = vrot.slane %v3452_v38, 2 }
0x4c5f   :  { %3455 = vrot.lane.b32.xlu1 %v3454_v40, %s5457_s24 }
0x4cd1   :  { %v3456_v39 = vpop.permute.xlu1 %3455 }
0x4cd2   :  { %4734 = vmatmul.mubr.msk.f32.vlgmr.msra.gmra.mrb[32].mxu0 %vm249_vm2, %v3456_v39 }
0x4cd3   :  { %4990 = vmatpush3.bf16.msra.mxu0 %v6086_v31  ;;  %4755 = vmatprep.mubr.msk.f32.mxu0 %vm5455_vm0, %v5454_v2 }
0x4cd4   :  { %4991 = vmatprep.subr.bf16.mxu0 %v5453_v1 }
0x4cd7   :  { %4993 = vmatpush3.bf16.msra.mxu0 %v6096_v63 }
0x4cd8   :  { %5000 = vmatprep.subr.bf16.mxu0 %v5453_v1 }
0x4da5   :  { %v3525_v41 = vpop.f32.mrb[32].mxu0 }
0x4da6   :  { %v3530_v42 = vrot.slane %v3525_v41, 5  ;;  %v4735_v43 = vpop.f32.mrb[33].mxu0 }
0x4da8   :  { %v3532_v45 = vadd.f32 %v3530_v42, %v6119_v44 }
0x4daa   :  { %5200 = vtanh.f32 %v3532_v45  ;;  %v3533_v47 = vmul.f32 0.5, %v3532_v45 }
0x4dac   :  { %5202 = vtanh.f32 %v3533_v47 }
0x4db4   :  { %v5201_v46 = vpop.eup %5200 }
0x4db5   :  { %3543 = vrot.lane.b32.xlu0 %v5201_v46, %s5456_s21 }
0x4db6   :  { %v5203_v49 = vpop.eup %5202 }
0x4db7   :  { %v3535_v11 = vmul.f32 0.5, %v5203_v49 }
0x4db9   :  { %v3536_v50 = vadd.f32 0.5, %v3535_v11 }
0x4dbb   :  { %v3541_v53 = vmul.f32 %v3539_v14, %v3536_v50 }
0x4e27   :  { %v3544_v51 = vpop.permute.xlu0 %3543 }
0x4e28   :  { %v3546_v52 = vmul.f32 %v3544_v51, %v3536_v50 }
0x4e2a   :  { %3548 = vrot.lane.b32.xlu1 %v3546_v52, %s5457_s24 }
0x4e9c   :  { %v3549_v54 = vpop.permute.xlu1 %3548 }
0x4e9d   :  { %v3551_v55 = vadd.f32 %v3549_v54, %v3541_v53 }
0x4e9f   :  { %5204 = vtanh.f32 %v3551_v55  ;;  %v3644_v12 = vrot.slane %v3551_v55, 7 }
0x4ea9   :  { %v5205_v56 = vpop.eup %5204 }
0x4eaa   :  { %3554 = vrot.lane.b32.xlu0 %v5205_v56, %s5456_s21 }
0x4f1c   :  { %v3555_v57 = vpop.permute.xlu0 %3554 }
0x4f1d   :  { %v3557_v58 = vmul.f32 %v3555_v57, %v3536_v50 }
0x4f1f   :  { %v3559_v59 = vrot.slane %v3557_v58, 3 }
0x4f21   :  { %3560 = vrot.lane.b32.xlu1 %v3559_v59, %s5457_s24 }
0x4f93   :  { %v3561_v60 = vpop.permute.xlu1 %3560 }
0x4f94   :  { %4745 = vmatmul.mubr.msk.f32.vlgmr.msra.gmra.mrb[32].mxu1 %vm249_vm2, %v3561_v60 }
0x4f95   :  { %4996 = vmatpush3.bf16.msra.mxu1 %v6086_v31  ;;  %4766 = vmatprep.mubr.msk.f32.mxu1 %vm5455_vm0, %v5454_v2 }
0x4f96   :  { %4997 = vmatprep.subr.bf16.mxu1 %v5453_v1 }
0x4f99   :  { %4999 = vmatpush3.bf16.msra.mxu1 %v6096_v63 }
0x4f9a   :  { %5006 = vmatprep.subr.bf16.mxu1 %v5453_v1 }
0x5067   :  { %v3630_v61 = vpop.f32.mrb[32].mxu1 }
0x5068   :  { %v3635_v62 = vrot.slane %v3630_v61, 4  ;;  %v4746_v6 = vpop.f32.mrb[33].mxu1 }
0x506a   :  { %v3637_v0 = vadd.f32 %v3635_v62, %v6119_v44 }
0x506c   :  { %5206 = vtanh.f32 %v3637_v0  ;;  %v3638_v4 = vmul.f32 0.5, %v3637_v0 }
0x506e   :  { %5208 = vtanh.f32 %v3638_v4 }
0x5076   :  { %v5207_v3 = vpop.eup %5206 }
0x5077   :  { %3648 = vrot.lane.b32.xlu0 %v5207_v3, %s5456_s21 }
0x5078   :  { %v5209_v10 = vpop.eup %5208 }
0x5079   :  { %v3640_v5 = vmul.f32 0.5, %v5209_v10 }
0x507b   :  { %v3641_v7 = vadd.f32 0.5, %v3640_v5 }
0x507d   :  { %v3646_v13 = vmul.f32 %v3644_v12, %v3641_v7 }
0x50e9   :  { %v3649_v8 = vpop.permute.xlu0 %3648 }
0x50ea   :  { %v3651_v9 = vmul.f32 %v3649_v8, %v3641_v7 }
0x50ec   :  { %3653 = vrot.lane.b32.xlu1 %v3651_v9, %s5457_s24 }
0x515e   :  { %v3654_v15 = vpop.permute.xlu1 %3653 }
0x515f   :  { %v3656_v16 = vadd.f32 %v3654_v15, %v3646_v13  ;;  %v3979_v15 = vld [vmem:[%s6253_s15 + $0x8] sm:$0xff] }
0x5161   :  { %5210 = vtanh.f32 %v3656_v16 }
0x516b   :  { %v5211_v17 = vpop.eup %5210 }
0x516c   :  { %3659 = vrot.lane.b32.xlu0 %v5211_v17, %s5456_s21 }
0x51de   :  { %v3660_v18 = vpop.permute.xlu0 %3659 }
0x51df   :  { %v3662_v19 = vmul.f32 %v3660_v18, %v3641_v7  ;;  %v3981_v18 = vld [vmem:[%s6253_s15 + $0x18] sm:$0xff] }
0x51e1   :  { %v3664_v20 = vrot.slane %v3662_v19, 4 }
0x51e3   :  { %3665 = vrot.lane.b32.xlu1 %v3664_v20, %s5457_s24 }
0x5255   :  { %v3666_v21 = vpop.permute.xlu1 %3665 }
0x5256   :  { %4756 = vmatmul.mubr.msk.f32.vlgmr.msra.gmra.mrb[34].mxu0 %vm249_vm2, %v3666_v21  ;;  %v4059_v21 = vld [vmem:[%s6255_s17] sm:$0xff] }
0x5257   :  { %5002 = vmatpush3.bf16.msra.mxu0 %v6086_v31  ;;  %4777 = vmatprep.mubr.msk.f32.mxu0 %vm5455_vm0, %v5454_v2 }
0x5258   :  { %5003 = vmatprep.subr.bf16.mxu0 %v5453_v1 }
0x525b   :  { %5005 = vmatpush3.bf16.msra.mxu0 %v6096_v63  ;;  %v3749_v63 = vrot.slane %v3656_v16, 7  ;;  %v3980_v16 = vld [vmem:[%s6253_s15 + $0x10] sm:$0xff] }
0x525c   :  { %4791 = vmatprep.subr.mxu0 %v5454_v2  ;;  %v5010_v19 = vpack.c.bf16 %v3981_v18, %v3980_v16 }
0x5329   :  { %v3735_v22 = vpop.f32.mrb[34].mxu0 }
0x532a   :  { %v3740_v23 = vrot.slane %v3735_v22, 3  ;;  %v4757_v24 = vpop.f32.mrb[35].mxu0 }
0x532c   :  { %v3742_v25 = vadd.f32 %v3740_v23, %v6119_v44 }
0x532e   :  { %5212 = vtanh.f32 %v3742_v25  ;;  %v3743_v26 = vmul.f32 0.5, %v3742_v25 }
0x5330   :  { %5214 = vtanh.f32 %v3743_v26 }
0x5338   :  { %v5213_v48 = vpop.eup %5212 }
0x5339   :  { %3753 = vrot.lane.b32.xlu0 %v5213_v48, %s5456_s21 }
0x533a   :  { %v5215_v31 = vpop.eup %5214 }
0x533b   :  { %v3745_v27 = vmul.f32 0.5, %v5215_v31 }
0x533d   :  { %v3746_v28 = vadd.f32 0.5, %v3745_v27  ;;  %v4060_v27 = vld [vmem:[%s6256_s18] sm:$0x1] }
0x533f   :  { %v3751_v32 = vmul.f32 %v3749_v63, %v3746_v28 }
0x53ab   :  { %v3754_v29 = vpop.permute.xlu0 %3753 }
0x53ac   :  { %v3756_v30 = vmul.f32 %v3754_v29, %v3746_v28 }
0x53ae   :  { %3758 = vrot.lane.b32.xlu1 %v3756_v30, %s5457_s24 }
0x5420   :  { %v3759_v33 = vpop.permute.xlu1 %3758 }
0x5421   :  { %v3761_v34 = vadd.f32 %v3759_v33, %v3751_v32 }
0x5423   :  { %5216 = vtanh.f32 %v3761_v34  ;;  %v3854_v52 = vrot.slane %v3761_v34, 7 }
0x542d   :  { %v5217_v35 = vpop.eup %5216 }
0x542e   :  { %3764 = vrot.lane.b32.xlu0 %v5217_v35, %s5456_s21 }
0x54a0   :  { %v3765_v36 = vpop.permute.xlu0 %3764 }
0x54a1   :  { %v3767_v37 = vmul.f32 %v3765_v36, %v3746_v28 }
0x54a3   :  { %v3769_v38 = vrot.slane %v3767_v37, 5 }
0x54a5   :  { %3770 = vrot.lane.b32.xlu1 %v3769_v38, %s5457_s24 }
0x5517   :  { %v3771_v40 = vpop.permute.xlu1 %3770 }
0x5518   :  { %4767 = vmatmul.mubr.msk.f32.vlgmr.msra.gmra.mrb[34].mxu1 %vm249_vm2, %v3771_v40 }
0x5519   :  { %4788 = vmatprep.mubr.msk.f32.mxu1 %vm5455_vm0, %v5454_v2 }
0x55eb   :  { %v3840_v39 = vpop.f32.mrb[34].mxu1 }
0x55ec   :  { %v3845_v41 = vrot.slane %v3840_v39, 2  ;;  %v4768_v42 = vpop.f32.mrb[35].mxu1 }
0x55ee   :  { %v3847_v43 = vadd.f32 %v3845_v41, %v6119_v44 }
0x55f0   :  { %5218 = vtanh.f32 %v3847_v43  ;;  %v3848_v46 = vmul.f32 0.5, %v3847_v43 }
0x55f2   :  { %5220 = vtanh.f32 %v3848_v46 }
0x55fa   :  { %v5219_v45 = vpop.eup %5218 }
0x55fb   :  { %3858 = vrot.lane.b32.xlu0 %v5219_v45, %s5456_s21 }
0x55fc   :  { %v5221_v47 = vpop.eup %5220 }
0x55fd   :  { %v3850_v49 = vmul.f32 0.5, %v5221_v47 }
0x55ff   :  { %v3851_v11 = vadd.f32 0.5, %v3850_v49 }
0x5601   :  { %v3856_v14 = vmul.f32 %v3854_v52, %v3851_v11 }
0x566d   :  { %v3859_v50 = vpop.permute.xlu0 %3858 }
0x566e   :  { %v3861_v51 = vmul.f32 %v3859_v50, %v3851_v11 }
0x5670   :  { %3863 = vrot.lane.b32.xlu1 %v3861_v51, %s5457_s24 }
0x56e2   :  { %v3864_v53 = vpop.permute.xlu1 %3863 }
0x56e3   :  { %v3866_v54 = vadd.f32 %v3864_v53, %v3856_v14 }
0x56e5   :  { %5222 = vtanh.f32 %v3866_v54  ;;  %v3959_v9 = vrot.slane %v3866_v54, 7 }
0x56ef   :  { %v5223_v55 = vpop.eup %5222 }
0x56f0   :  { %3869 = vrot.lane.b32.xlu0 %v5223_v55, %s5456_s21 }
0x5762   :  { %v3870_v56 = vpop.permute.xlu0 %3869 }
0x5763   :  { %v3872_v57 = vmul.f32 %v3870_v56, %v3851_v11 }
0x5765   :  { %v3874_v58 = vrot.slane %v3872_v57, 6 }
0x5767   :  { %3875 = vrot.lane.b32.xlu1 %v3874_v58, %s5457_s24 }
0x57d9   :  { %v3876_v59 = vpop.permute.xlu1 %3875 }
0x57da   :  { %4778 = vmatmul.mubr.msk.f32.vlgmr.msra.gmra.mrb[36].mxu0 %vm249_vm2, %v3876_v59 }
0x57db   :  { %4793 = vmatprep.mubr.msk.f32.mxu0 %vm5455_vm0, %v5454_v2  ;;  %4792 = vmatpush3.msra.mxu0 %v4059_v21 }
0x58ad   :  { %v3945_v60 = vpop.f32.mrb[36].mxu0 }
0x58ae   :  { %v3950_v61 = vrot.slane %v3945_v60, 1  ;;  %v4779_v62 = vpop.f32.mrb[37].mxu0 }
0x58b0   :  { %v3952_v6 = vadd.f32 %v3950_v61, %v6119_v44  ;;  %v3978_v44 = vld [vmem:[%s6253_s15] sm:$0xff] }
0x58b1   :  { %v5007_v17 = vpack.c.bf16 %v3979_v15, %v3978_v44 }
0x58b2   :  { %5224 = vtanh.f32 %v3952_v6  ;;  %v3953_v3 = vmul.f32 0.5, %v3952_v6 }
0x58b3   :  { %5008 = vmatpush3.bf16.msra.mxu1 %v5007_v17 }
0x58b4   :  { %5226 = vtanh.f32 %v3953_v3  ;;  %5009 = vmatprep.subr.bf16.mxu1 %v5453_v1  ;;  %v3982_v1 = vld [vmem:[%s6254_s16] sm:$0x1] }
0x58b7   :  { %5011 = vmatpush3.bf16.msra.mxu1 %v5010_v19 }
0x58bc   :  { %v5225_v0 = vpop.eup %5224 }
0x58bd   :  { %3963 = vrot.lane.b32.xlu0 %v5225_v0, %s5456_s21 }
0x58be   :  { %v5227_v4 = vpop.eup %5226 }
0x58bf   :  { %v3955_v10 = vmul.f32 0.5, %v5227_v4 }
0x58c1   :  { %v3956_v5 = vadd.f32 0.5, %v3955_v10 }
0x58c3   :  { %v3961_v2 = vmul.f32 %v3959_v9, %v3956_v5 }
0x592f   :  { %v3964_v7 = vpop.permute.xlu0 %3963 }
0x5930   :  { %v3966_v8 = vmul.f32 %v3964_v7, %v3956_v5 }
0x5932   :  { %3968 = vrot.lane.b32.xlu1 %v3966_v8, %s5457_s24 }
0x59a4   :  { %v3969_v12 = vpop.permute.xlu1 %3968 }
0x59a5   :  { %v3971_v13 = vadd.f32 %v3969_v12, %v3961_v2 }
0x59a7   :  { %5228 = vtanh.f32 %v3971_v13 }
0x59b1   :  { %v5229_v20 = vpop.eup %5228 }
0x59b2   :  { %3974 = vrot.lane.b32.xlu0 %v5229_v20, %s5456_s21 }
0x5a24   :  { %v3975_v22 = vpop.permute.xlu0 %3974 }
0x5a25   :  { %v3977_v23 = vmul.f32 %v3975_v22, %v3956_v5 }
0x5a27   :  { %v3984_v24 = vrot.slane %v3977_v23, 7 }
0x5a29   :  { %3985 = vrot.lane.b32.xlu1 %v3984_v24, %s5457_s24  ;;  %s5459_s24 = smov [#allocation17]  }
0x5a2a   :  { %s4146_s22 = sshll.u32 %s5459_s24, 4  ;;  %s4147_s22 = int_to_ptr.vmem [resolvable:$true] %s4146_s22 }
0x5a2b   :  { %s5409_s16 = scalar_lea.vmem %s4147_s22, 16  ;;  %s5413_s3 = scalar_lea.vmem %s4147_s22, 32 }
0x5a2c   :  { %p5410_p8 = scmp.ne.s32.totalorder %s4147_s22, %s5409_s16  ;;  %p5414_p9 = scmp.lt.s32.totalorder %s4147_s22, %s4147_s22 }
0x5a2d   :  { %p5415_p10 = scmp.lt.s32.totalorder %s5413_s3, %s5409_s16 }
0x5a2f   :  { %p5416_p11 = por %p5415_p10, %p5414_p9 }
0x5a31   :  { %p5417_p12 = pnand %p5416_p11, %p5410_p8 }
0x5a9b   :  { %v3986_v25 = vpop.permute.xlu1 %3985 }
0x5a9c   :  { %4789 = vmatmul.mubr.msk.f32.vlgmr.msra.gmra.mrb[36].mxu1 %vm249_vm2, %v3986_v25 }
0x5b6f   :  { %v4055_v48 = vpop.f32.mrb[36].mxu1 }
0x5b70   :  { %v4056_v26 = vadd.f32 %v4055_v48, %v3982_v1  ;;  %v4790_v31 = vpop.f32.mrb[37].mxu1 }
0x5b72   :  { %4794 = vmatmul.mubr.msk.f32.vlgmr.msra.gmra.mrb[38].mxu0 %vm171_vm1, %v4056_v26 }
0x5c45   :  { %v4130_v28 = vpop.f32.mrb[38].mxu0 }
0x5c46   :  { %v4131_v29 = vadd.f32 %v4130_v28, %v4060_v27  ;;  %v4795_v30 = vpop.f32.mrb[39].mxu0 }
0x5c48   :  { %v4134_v63 = vmul.f32 0.5, %v4131_v29 }
0x5c4a   :  { %5230 = vtanh.f32 %v4134_v63 }
0x5c54   :  { %v5231_v32 = vpop.eup %5230 }
0x5c55   :  { %v4136_v33 = vmul.f32 0.5, %v5231_v32 }
0x5c57   :  { %v4137_v34 = vadd.f32 0.5, %v4136_v33 }
0x5c59   :  { %4139 = vst.msk [vmem:[#allocation17] sm:$0x1] %vm4138_vm11, %v4137_v34 }
0x5c5a   :  { %5420 = shalt.err (!%p5417_p12)
}
0x5c5b   :  { %s5421_s28 = scalar_lea.hbm %s6257_s19, 16 }
0x5c5c   :  { %p5422_p13 = scmp.ne.s32.totalorder %s6257_s19, %s5421_s28  ;;  %p5425_p0 = scmp.lt.u32.totalorder %s5421_s28, %s6257_s19 }
0x5c5e   :  { %p5427_p1 = pnand %p5425_p0, %p5422_p13 }
0x5c60   :  { %5430 = shalt.err (!%p5427_p1)
}
0x5c61   :  { %4149 = dma.vmem_to_hbm [thread:$0]  %s4147_s22, 16, %s6257_s19, [#allocation5]  }
0x5c62   :  { %5441 = dma.done.wait [#allocation5], 16  }
0x5c63   :  { %5442 = vsyncadd [#allocation5], 4294967280 }
0x5c64   :  { %4153 = vsyncpa [#allocation4], 1 }
0x5c65   :  { %4154 = vsyncpa [#allocation7], 1 }
0x5c66   :  { %4155 = vsyncpa [#allocation10], 1 }
0x5c67   :  { %4156 = vsyncpa [#allocation13], 1 }
0x5c68   :  { %4157 = vsyncpa [#allocation16], 1 }
0x5c69   :  { %4158 = vsyncpa [#allocation5], 1 }

</bundles_post_ra>
